<compile_context>
chip_gen: v7x
topology: tpu7x:2x2x1
jax: 0.10.0
libtpu: 0.0.40
codegen_flags: <defaults>
</compile_context>

<pallas_src>
import jax
import jax.numpy as jnp
from jax.experimental import pallas as pl
from jax.experimental.pallas import tpu as pltpu


def _round_up(n, m):
    return ((n + m - 1) // m) * m


def gru_head_kernel(x_ref,        # (T*Bp, 1)   row t*Bp + b  holds x[b, t]
                    w_i_ref,      # (1, 3*Hp)   packed input weights  [r | z | n]  f32
                    b_i_ref,      # (1, 3*Hp)   packed biases [b_ir+b_hr | b_iz+b_hz | b_in]
                    w_hr_ref,     # (Hp, Hp)    bf16
                    w_hz_ref,     # (Hp, Hp)    bf16
                    w_hn_ref,     # (Hp, Hp)    bf16
                    b_hn_ref,     # (1, Hp)     f32
                    w_head_ref,   # (Hp, Cp)    bf16
                    b_head_ref,   # (1, Cp)     f32
                    out_ref,      # (Bp, Cp)    f32
                    gx_ref):      # VMEM scratch (T*Bp, 3*Hp) f32
    TB = x_ref.shape[0]
    Bp = out_ref.shape[0]
    T = TB // Bp
    Hp = w_hr_ref.shape[0]

    # ---- hoisted input contribution for every timestep (one shot, pre-loop) ----
    # input_size == 1  =>  gx[t*Bp + b, :] = x[b, t] * w_i + b_i
    gx_ref[...] = x_ref[...] * w_i_ref[...] + b_i_ref[...]      # (T*Bp, 3Hp) f32

    # hoist the (1,Hp)->(Bp,Hp) sublane broadcast out of the recurrence
    b_hn_b = jnp.broadcast_to(b_hn_ref[...], (Bp, Hp))

    h = jnp.zeros((Bp, Hp), dtype=jnp.float32)
    # T is small and static: a Python loop == full unroll with concrete indices.
    for t in range(T):
        gx = gx_ref[pl.ds(t * Bp, Bp), :]          # (Bp, 3Hp), static sublane-aligned slice
        h_b = h.astype(jnp.bfloat16)               # bf16 MXU operand; gate math stays f32
        # Per-gate dots, weights re-read from VMEM every iteration (bounded
        # live ranges, no hoisted 24/48-vreg weight block).  Issue order r, n,
        # z so the r/n result tiles drain first for the dependent
        # sigmoid -> r*(gh_n + b_hn) -> tanh chain.
        gh_r = jnp.dot(h_b, w_hr_ref[...], preferred_element_type=jnp.float32)
        gh_n = jnp.dot(h_b, w_hn_ref[...], preferred_element_type=jnp.float32)
        gh_z = jnp.dot(h_b, w_hz_ref[...], preferred_element_type=jnp.float32)
        r = jax.nn.sigmoid(gx[:, 0:Hp] + gh_r)
        n = jnp.tanh(gx[:, 2 * Hp:] + r * (gh_n + b_hn_b))
        z = jax.nn.sigmoid(gx[:, Hp:2 * Hp] + gh_z)
        h = (1.0 - z) * n + z * h

    # classification head -> lane-dense (Bp, Cp) store
    out_ref[...] = (jnp.dot(h.astype(jnp.bfloat16), w_head_ref[...],
                            preferred_element_type=jnp.float32)
                    + b_head_ref[...])


def init_params(key, hidden_size=64, classes_num=5, input_size=1):
    """PyTorch-style packed GRU + Linear parameters (gate order r, z, n)."""
    k = 1.0 / jnp.sqrt(jnp.float32(hidden_size))
    keys = jax.random.split(key, 6)
    w_ih = jax.random.uniform(keys[0], (3 * hidden_size, input_size), jnp.float32, -k, k)
    w_hh = jax.random.uniform(keys[1], (3 * hidden_size, hidden_size), jnp.float32, -k, k)
    b_ih = jax.random.uniform(keys[2], (3 * hidden_size,), jnp.float32, -k, k)
    b_hh = jax.random.uniform(keys[3], (3 * hidden_size,), jnp.float32, -k, k)
    w_head = jax.random.uniform(keys[4], (classes_num, hidden_size), jnp.float32, -k, k)
    b_head = jax.random.uniform(keys[5], (classes_num,), jnp.float32, -k, k)
    return (w_ih, w_hh, b_ih, b_hh, w_head, b_head)


def pack_params(params, hidden_size, classes_num):
    """Split per gate, transpose so the contraction dim is first, fold the
    r/z biases, zero-pad to the native 128-lane layout, and pre-cast the
    MXU-bound weights to bf16 host-side."""
    w_ih, w_hh, b_ih, b_hh, w_head, b_head = params
    H, C = hidden_size, classes_num
    Hp = _round_up(H, 128)
    Cp = _round_up(C, 128)

    def gate(m, i):                      # rows i*H:(i+1)*H of a packed (3H, *) tensor
        return m[i * H:(i + 1) * H]

    def pad_cols(m):                     # (rows, H) -> (rows, Hp)
        return jnp.pad(m, ((0, 0), (0, Hp - H)))

    def pad_hh(m):                       # (H, H) -> (Hp, Hp)
        return jnp.pad(m, ((0, Hp - H), (0, Hp - H)))

    w_ir, w_iz, w_in = (gate(w_ih, 0).T, gate(w_ih, 1).T, gate(w_ih, 2).T)   # (1, H)
    w_hr, w_hz, w_hn = (gate(w_hh, 0).T, gate(w_hh, 1).T, gate(w_hh, 2).T)   # (H, H)
    b_ir, b_iz, b_in = (gate(b_ih, 0)[None, :], gate(b_ih, 1)[None, :], gate(b_ih, 2)[None, :])
    b_hr, b_hz, b_hn = (gate(b_hh, 0)[None, :], gate(b_hh, 1)[None, :], gate(b_hh, 2)[None, :])

    w_i_all = jnp.concatenate([pad_cols(w_ir), pad_cols(w_iz), pad_cols(w_in)], axis=1)  # (1, 3Hp) f32
    b_i_all = jnp.concatenate([pad_cols(b_ir + b_hr),       # folded r bias
                               pad_cols(b_iz + b_hz),       # folded z bias
                               pad_cols(b_in)], axis=1)     # n input bias (b_hn stays separate)
    w_hr_p = pad_hh(w_hr).astype(jnp.bfloat16)                                            # (Hp, Hp)
    w_hz_p = pad_hh(w_hz).astype(jnp.bfloat16)
    w_hn_p = pad_hh(w_hn).astype(jnp.bfloat16)
    b_hn_p = pad_cols(b_hn)                                                               # (1, Hp) f32
    w_head_p = jnp.pad(w_head.T, ((0, Hp - H), (0, Cp - C))).astype(jnp.bfloat16)         # (Hp, Cp)
    b_head_p = jnp.pad(b_head[None, :], ((0, 0), (0, Cp - C)))                            # (1, Cp) f32
    return (w_i_all, b_i_all, w_hr_p, w_hz_p, w_hn_p, b_hn_p, w_head_p, b_head_p)


def gru_forward(x, packed, classes_num):
    """x: (B, T, 1) float32.  Returns (B, classes_num) float32."""
    (w_i_all, b_i_all, w_hr_p, w_hz_p, w_hn_p,
     b_hn_p, w_head_p, b_head_p) = packed
    B, T, _ = x.shape
    Hp = w_hr_p.shape[0]
    Cp = w_head_p.shape[1]
    Bp = _round_up(max(B, 8), 8)

    # batch-pad and lay out x as (T*Bp, 1): row t*Bp + b holds x[b, t, 0]
    x2d = jnp.pad(x[..., 0], ((0, Bp - B), (0, 0)))     # (Bp, T)
    x_col = x2d.T.reshape(T * Bp, 1)

    vmem = pl.BlockSpec(memory_space=pltpu.MemorySpace.VMEM)
    out = pl.pallas_call(
        gru_head_kernel,
        out_shape=jax.ShapeDtypeStruct((Bp, Cp), jnp.float32),
        in_specs=[vmem] * 9,
        out_specs=vmem,
        scratch_shapes=[pltpu.VMEM((T * Bp, 3 * Hp), jnp.float32)],
    )(x_col, w_i_all, b_i_all, w_hr_p, w_hz_p, w_hn_p, b_hn_p, w_head_p, b_head_p)
    return out[:B, :classes_num]


def gru_forward_ref(x, params):
    """Pure-JAX reference of the PyTorch GRU + head for a sanity check."""
    w_ih, w_hh, b_ih, b_hh, w_head, b_head = params
    B, T, _ = x.shape
    H = w_hh.shape[1]
    w_ir, w_iz, w_in = w_ih[0:H], w_ih[H:2 * H], w_ih[2 * H:3 * H]   # (H, 1)
    w_hr, w_hz, w_hn = w_hh[0:H], w_hh[H:2 * H], w_hh[2 * H:3 * H]   # (H, H)
    b_ir, b_iz, b_in = b_ih[0:H], b_ih[H:2 * H], b_ih[2 * H:3 * H]
    b_hr, b_hz, b_hn = b_hh[0:H], b_hh[H:2 * H], b_hh[2 * H:3 * H]
    h = jnp.zeros((B, H), jnp.float32)
    for t in range(T):
        x_t = x[:, t, :]                                   # (B, 1)
        r = jax.nn.sigmoid(x_t @ w_ir.T + b_ir + h @ w_hr.T + b_hr)
        z = jax.nn.sigmoid(x_t @ w_iz.T + b_iz + h @ w_hz.T + b_hz)
        n = jnp.tanh(x_t @ w_in.T + b_in + r * (h @ w_hn.T + b_hn))
        h = (1.0 - z) * n + z * h
    return h @ w_head.T + b_head


if __name__ == "__main__":
    key = jax.random.PRNGKey(0)
    k_x, k_p = jax.random.split(key)

    B, T, H, C = 4, 16, 64, 5
    x = jax.random.normal(k_x, (B, T, 1), dtype=jnp.float32)
    params = init_params(k_p, hidden_size=H, classes_num=C)
    packed = pack_params(params, hidden_size=H, classes_num=C)

    out = gru_forward(x, packed, classes_num=C)
    out = jax.block_until_ready(out)

    ref = gru_forward_ref(x, params)
    assert out.shape == (B, C)
    # bf16 MXU operands over a 16-step recurrence -> looser tolerance than
    # the pure-f32 version (gate math itself is still f32).
    err = float(jnp.max(jnp.abs(out - ref)))
    assert err < 3e-2, f"mismatch vs JAX reference: {err}"

    print("KERNEL_OK")
</pallas_src>

<mosaic_0001>
module attributes {stable_mosaic.version = 11 : i64} {
  func.func @gru_head_kernel(%arg0: memref<128x1xf32, #tpu.memory_space<vmem>>, %arg1: memref<1x384xf32, #tpu.memory_space<vmem>>, %arg2: memref<1x384xf32, #tpu.memory_space<vmem>>, %arg3: memref<128x128xbf16, #tpu.memory_space<vmem>>, %arg4: memref<128x128xbf16, #tpu.memory_space<vmem>>, %arg5: memref<128x128xbf16, #tpu.memory_space<vmem>>, %arg6: memref<1x128xf32, #tpu.memory_space<vmem>>, %arg7: memref<128x128xbf16, #tpu.memory_space<vmem>>, %arg8: memref<1x128xf32, #tpu.memory_space<vmem>>, %arg9: memref<8x128xf32, #tpu.memory_space<vmem>>, %arg10: memref<128x384xf32, #tpu.memory_space<vmem>>) attributes {dimension_semantics = [], scalar_prefetch = 0 : i64, scratch_operands = 1 : i64, tpu.core_type = #tpu.core_type<tc>} {
    %c0 = arith.constant 0 : index
    %c0_0 = arith.constant 0 : index
    %0 = vector.load %arg0[%c0, %c0_0] : memref<128x1xf32, #tpu.memory_space<vmem>>, vector<128x1xf32>
    %c0_1 = arith.constant 0 : index
    %c0_2 = arith.constant 0 : index
    %1 = vector.load %arg1[%c0_1, %c0_2] : memref<1x384xf32, #tpu.memory_space<vmem>>, vector<1x384xf32>
    %2 = vector.broadcast %0 : vector<128x1xf32> to vector<128x384xf32>
    %3 = vector.broadcast %1 : vector<1x384xf32> to vector<128x384xf32>
    %4 = arith.mulf %2, %3 : vector<128x384xf32>
    %c0_3 = arith.constant 0 : index
    %c0_4 = arith.constant 0 : index
    %5 = vector.load %arg2[%c0_3, %c0_4] : memref<1x384xf32, #tpu.memory_space<vmem>>, vector<1x384xf32>
    %6 = vector.broadcast %5 : vector<1x384xf32> to vector<128x384xf32>
    %7 = arith.addf %4, %6 : vector<128x384xf32>
    %c0_5 = arith.constant 0 : index
    %c0_6 = arith.constant 0 : index
    %8 = vector.load %arg10[%c0_5, %c0_6] : memref<128x384xf32, #tpu.memory_space<vmem>>, vector<128x384xf32>
    tpu.vector_store %arg10[%c0_5, %c0_6], %7 {strides = array<i32>} : memref<128x384xf32, #tpu.memory_space<vmem>>, vector<128x384xf32>,
    %c0_7 = arith.constant 0 : index
    %c0_8 = arith.constant 0 : index
    %9 = vector.load %arg6[%c0_7, %c0_8] : memref<1x128xf32, #tpu.memory_space<vmem>>, vector<1x128xf32>
    %10 = vector.shape_cast %9 : vector<1x128xf32> to vector<1x128xf32>
    %11 = vector.broadcast %10 : vector<1x128xf32> to vector<8x128xf32>
    %cst = arith.constant 0.000000e+00 : f32
    %12 = vector.broadcast %cst : f32 to vector<8x128xf32>
    %c0_9 = arith.constant 0 : index
    %c0_10 = arith.constant 0 : index
    %13 = vector.load %arg10[%c0_9, %c0_10] : memref<128x384xf32, #tpu.memory_space<vmem>>, vector<8x384xf32>
    %14 = arith.truncf %12 : vector<8x128xf32> to vector<8x128xbf16>
    %c0_11 = arith.constant 0 : index
    %c0_12 = arith.constant 0 : index
    %15 = vector.load %arg3[%c0_11, %c0_12] : memref<128x128xbf16, #tpu.memory_space<vmem>>, vector<128x128xbf16>
    %cst_13 = arith.constant dense<0.000000e+00> : vector<8x128xf32>
    %16 = tpu.matmul %14, %15, %cst_13 {dimension_numbers = #tpu.dot_dimension_numbers<[1], [0], [0], [1], [0, 0, 1, 1], [], []>} : vector<8x128xbf16>, vector<128x128xbf16>, vector<8x128xf32> -> vector<8x128xf32>
    %c0_14 = arith.constant 0 : index
    %c0_15 = arith.constant 0 : index
    %17 = vector.load %arg5[%c0_14, %c0_15] : memref<128x128xbf16, #tpu.memory_space<vmem>>, vector<128x128xbf16>
    %cst_16 = arith.constant dense<0.000000e+00> : vector<8x128xf32>
    %18 = tpu.matmul %14, %17, %cst_16 {dimension_numbers = #tpu.dot_dimension_numbers<[1], [0], [0], [1], [0, 0, 1, 1], [], []>} : vector<8x128xbf16>, vector<128x128xbf16>, vector<8x128xf32> -> vector<8x128xf32>
    %c0_17 = arith.constant 0 : index
    %c0_18 = arith.constant 0 : index
    %19 = vector.load %arg4[%c0_17, %c0_18] : memref<128x128xbf16, #tpu.memory_space<vmem>>, vector<128x128xbf16>
    %cst_19 = arith.constant dense<0.000000e+00> : vector<8x128xf32>
    %20 = tpu.matmul %14, %19, %cst_19 {dimension_numbers = #tpu.dot_dimension_numbers<[1], [0], [0], [1], [0, 0, 1, 1], [], []>} : vector<8x128xbf16>, vector<128x128xbf16>, vector<8x128xf32> -> vector<8x128xf32>
    %21 = vector.extract_strided_slice %13 {offsets = [0, 0], sizes = [8, 128], strides = [1, 1]} : vector<8x384xf32> to vector<8x128xf32>
    %22 = arith.addf %21, %16 : vector<8x128xf32>
    %23 = arith.negf %22 : vector<8x128xf32>
    %24 = math.exp %23 : vector<8x128xf32>
    %cst_20 = arith.constant 1.000000e+00 : f32
    %25 = vector.broadcast %cst_20 : f32 to vector<8x128xf32>
    %26 = arith.addf %25, %24 : vector<8x128xf32>
    %27 = arith.divf %25, %26 : vector<8x128xf32>
    %28 = vector.extract_strided_slice %13 {offsets = [0, 256], sizes = [8, 128], strides = [1, 1]} : vector<8x384xf32> to vector<8x128xf32>
    %29 = arith.addf %18, %11 : vector<8x128xf32>
    %30 = arith.mulf %27, %29 : vector<8x128xf32>
    %31 = arith.addf %28, %30 : vector<8x128xf32>
    %32 = math.tanh %31 : vector<8x128xf32>
    %33 = vector.extract_strided_slice %13 {offsets = [0, 128], sizes = [8, 128], strides = [1, 1]} : vector<8x384xf32> to vector<8x128xf32>
    %34 = arith.addf %33, %20 : vector<8x128xf32>
    %35 = arith.negf %34 : vector<8x128xf32>
    %36 = math.exp %35 : vector<8x128xf32>
    %cst_21 = arith.constant 1.000000e+00 : f32
    %37 = vector.broadcast %cst_21 : f32 to vector<8x128xf32>
    %38 = arith.addf %37, %36 : vector<8x128xf32>
    %39 = arith.divf %37, %38 : vector<8x128xf32>
    %cst_22 = arith.constant 1.000000e+00 : f32
    %40 = vector.broadcast %cst_22 : f32 to vector<8x128xf32>
    %41 = arith.subf %40, %39 : vector<8x128xf32>
    %42 = arith.mulf %41, %32 : vector<8x128xf32>
    %43 = arith.mulf %39, %12 : vector<8x128xf32>
    %44 = arith.addf %42, %43 : vector<8x128xf32>
    %c8 = arith.constant 8 : index
    %c0_23 = arith.constant 0 : index
    %45 = vector.load %arg10[%c8, %c0_23] : memref<128x384xf32, #tpu.memory_space<vmem>>, vector<8x384xf32>
    %46 = arith.truncf %44 : vector<8x128xf32> to vector<8x128xbf16>
    %c0_24 = arith.constant 0 : index
    %c0_25 = arith.constant 0 : index
    %47 = vector.load %arg3[%c0_24, %c0_25] : memref<128x128xbf16, #tpu.memory_space<vmem>>, vector<128x128xbf16>
    %cst_26 = arith.constant dense<0.000000e+00> : vector<8x128xf32>
    %48 = tpu.matmul %46, %47, %cst_26 {dimension_numbers = #tpu.dot_dimension_numbers<[1], [0], [0], [1], [0, 0, 1, 1], [], []>} : vector<8x128xbf16>, vector<128x128xbf16>, vector<8x128xf32> -> vector<8x128xf32>
    %c0_27 = arith.constant 0 : index
    %c0_28 = arith.constant 0 : index
    %49 = vector.load %arg5[%c0_27, %c0_28] : memref<128x128xbf16, #tpu.memory_space<vmem>>, vector<128x128xbf16>
    %cst_29 = arith.constant dense<0.000000e+00> : vector<8x128xf32>
    %50 = tpu.matmul %46, %49, %cst_29 {dimension_numbers = #tpu.dot_dimension_numbers<[1], [0], [0], [1], [0, 0, 1, 1], [], []>} : vector<8x128xbf16>, vector<128x128xbf16>, vector<8x128xf32> -> vector<8x128xf32>
    %c0_30 = arith.constant 0 : index
    %c0_31 = arith.constant 0 : index
    %51 = vector.load %arg4[%c0_30, %c0_31] : memref<128x128xbf16, #tpu.memory_space<vmem>>, vector<128x128xbf16>
    %cst_32 = arith.constant dense<0.000000e+00> : vector<8x128xf32>
    %52 = tpu.matmul %46, %51, %cst_32 {dimension_numbers = #tpu.dot_dimension_numbers<[1], [0], [0], [1], [0, 0, 1, 1], [], []>} : vector<8x128xbf16>, vector<128x128xbf16>, vector<8x128xf32> -> vector<8x128xf32>
    %53 = vector.extract_strided_slice %45 {offsets = [0, 0], sizes = [8, 128], strides = [1, 1]} : vector<8x384xf32> to vector<8x128xf32>
    %54 = arith.addf %53, %48 : vector<8x128xf32>
    %55 = arith.negf %54 : vector<8x128xf32>
    %56 = math.exp %55 : vector<8x128xf32>
    %cst_33 = arith.constant 1.000000e+00 : f32
    %57 = vector.broadcast %cst_33 : f32 to vector<8x128xf32>
    %58 = arith.addf %57, %56 : vector<8x128xf32>
    %59 = arith.divf %57, %58 : vector<8x128xf32>
    %60 = vector.extract_strided_slice %45 {offsets = [0, 256], sizes = [8, 128], strides = [1, 1]} : vector<8x384xf32> to vector<8x128xf32>
    %61 = arith.addf %50, %11 : vector<8x128xf32>
    %62 = arith.mulf %59, %61 : vector<8x128xf32>
    %63 = arith.addf %60, %62 : vector<8x128xf32>
    %64 = math.tanh %63 : vector<8x128xf32>
    %65 = vector.extract_strided_slice %45 {offsets = [0, 128], sizes = [8, 128], strides = [1, 1]} : vector<8x384xf32> to vector<8x128xf32>
    %66 = arith.addf %65, %52 : vector<8x128xf32>
    %67 = arith.negf %66 : vector<8x128xf32>
    %68 = math.exp %67 : vector<8x128xf32>
    %cst_34 = arith.constant 1.000000e+00 : f32
    %69 = vector.broadcast %cst_34 : f32 to vector<8x128xf32>
    %70 = arith.addf %69, %68 : vector<8x128xf32>
    %71 = arith.divf %69, %70 : vector<8x128xf32>
    %cst_35 = arith.constant 1.000000e+00 : f32
    %72 = vector.broadcast %cst_35 : f32 to vector<8x128xf32>
    %73 = arith.subf %72, %71 : vector<8x128xf32>
    %74 = arith.mulf %73, %64 : vector<8x128xf32>
    %75 = arith.mulf %71, %44 : vector<8x128xf32>
    %76 = arith.addf %74, %75 : vector<8x128xf32>
    %c16 = arith.constant 16 : index
    %c0_36 = arith.constant 0 : index
    %77 = vector.load %arg10[%c16, %c0_36] : memref<128x384xf32, #tpu.memory_space<vmem>>, vector<8x384xf32>
    %78 = arith.truncf %76 : vector<8x128xf32> to vector<8x128xbf16>
    %c0_37 = arith.constant 0 : index
    %c0_38 = arith.constant 0 : index
    %79 = vector.load %arg3[%c0_37, %c0_38] : memref<128x128xbf16, #tpu.memory_space<vmem>>, vector<128x128xbf16>
    %cst_39 = arith.constant dense<0.000000e+00> : vector<8x128xf32>
    %80 = tpu.matmul %78, %79, %cst_39 {dimension_numbers = #tpu.dot_dimension_numbers<[1], [0], [0], [1], [0, 0, 1, 1], [], []>} : vector<8x128xbf16>, vector<128x128xbf16>, vector<8x128xf32> -> vector<8x128xf32>
    %c0_40 = arith.constant 0 : index
    %c0_41 = arith.constant 0 : index
    %81 = vector.load %arg5[%c0_40, %c0_41] : memref<128x128xbf16, #tpu.memory_space<vmem>>, vector<128x128xbf16>
    %cst_42 = arith.constant dense<0.000000e+00> : vector<8x128xf32>
    %82 = tpu.matmul %78, %81, %cst_42 {dimension_numbers = #tpu.dot_dimension_numbers<[1], [0], [0], [1], [0, 0, 1, 1], [], []>} : vector<8x128xbf16>, vector<128x128xbf16>, vector<8x128xf32> -> vector<8x128xf32>
    %c0_43 = arith.constant 0 : index
    %c0_44 = arith.constant 0 : index
    %83 = vector.load %arg4[%c0_43, %c0_44] : memref<128x128xbf16, #tpu.memory_space<vmem>>, vector<128x128xbf16>
    %cst_45 = arith.constant dense<0.000000e+00> : vector<8x128xf32>
    %84 = tpu.matmul %78, %83, %cst_45 {dimension_numbers = #tpu.dot_dimension_numbers<[1], [0], [0], [1], [0, 0, 1, 1], [], []>} : vector<8x128xbf16>, vector<128x128xbf16>, vector<8x128xf32> -> vector<8x128xf32>
    %85 = vector.extract_strided_slice %77 {offsets = [0, 0], sizes = [8, 128], strides = [1, 1]} : vector<8x384xf32> to vector<8x128xf32>
    %86 = arith.addf %85, %80 : vector<8x128xf32>
    %87 = arith.negf %86 : vector<8x128xf32>
    %88 = math.exp %87 : vector<8x128xf32>
    %cst_46 = arith.constant 1.000000e+00 : f32
    %89 = vector.broadcast %cst_46 : f32 to vector<8x128xf32>
    %90 = arith.addf %89, %88 : vector<8x128xf32>
    %91 = arith.divf %89, %90 : vector<8x128xf32>
    %92 = vector.extract_strided_slice %77 {offsets = [0, 256], sizes = [8, 128], strides = [1, 1]} : vector<8x384xf32> to vector<8x128xf32>
    %93 = arith.addf %82, %11 : vector<8x128xf32>
    %94 = arith.mulf %91, %93 : vector<8x128xf32>
    %95 = arith.addf %92, %94 : vector<8x128xf32>
    %96 = math.tanh %95 : vector<8x128xf32>
    %97 = vector.extract_strided_slice %77 {offsets = [0, 128], sizes = [8, 128], strides = [1, 1]} : vector<8x384xf32> to vector<8x128xf32>
    %98 = arith.addf %97, %84 : vector<8x128xf32>
    %99 = arith.negf %98 : vector<8x128xf32>
    %100 = math.exp %99 : vector<8x128xf32>
    %cst_47 = arith.constant 1.000000e+00 : f32
    %101 = vector.broadcast %cst_47 : f32 to vector<8x128xf32>
    %102 = arith.addf %101, %100 : vector<8x128xf32>
    %103 = arith.divf %101, %102 : vector<8x128xf32>
    %cst_48 = arith.constant 1.000000e+00 : f32
    %104 = vector.broadcast %cst_48 : f32 to vector<8x128xf32>
    %105 = arith.subf %104, %103 : vector<8x128xf32>
    %106 = arith.mulf %105, %96 : vector<8x128xf32>
    %107 = arith.mulf %103, %76 : vector<8x128xf32>
    %108 = arith.addf %106, %107 : vector<8x128xf32>
    %c24 = arith.constant 24 : index
    %c0_49 = arith.constant 0 : index
    %109 = vector.load %arg10[%c24, %c0_49] : memref<128x384xf32, #tpu.memory_space<vmem>>, vector<8x384xf32>
    %110 = arith.truncf %108 : vector<8x128xf32> to vector<8x128xbf16>
    %c0_50 = arith.constant 0 : index
    %c0_51 = arith.constant 0 : index
    %111 = vector.load %arg3[%c0_50, %c0_51] : memref<128x128xbf16, #tpu.memory_space<vmem>>, vector<128x128xbf16>
    %cst_52 = arith.constant dense<0.000000e+00> : vector<8x128xf32>
    %112 = tpu.matmul %110, %111, %cst_52 {dimension_numbers = #tpu.dot_dimension_numbers<[1], [0], [0], [1], [0, 0, 1, 1], [], []>} : vector<8x128xbf16>, vector<128x128xbf16>, vector<8x128xf32> -> vector<8x128xf32>
    %c0_53 = arith.constant 0 : index
    %c0_54 = arith.constant 0 : index
    %113 = vector.load %arg5[%c0_53, %c0_54] : memref<128x128xbf16, #tpu.memory_space<vmem>>, vector<128x128xbf16>
    %cst_55 = arith.constant dense<0.000000e+00> : vector<8x128xf32>
    %114 = tpu.matmul %110, %113, %cst_55 {dimension_numbers = #tpu.dot_dimension_numbers<[1], [0], [0], [1], [0, 0, 1, 1], [], []>} : vector<8x128xbf16>, vector<128x128xbf16>, vector<8x128xf32> -> vector<8x128xf32>
    %c0_56 = arith.constant 0 : index
    %c0_57 = arith.constant 0 : index
    %115 = vector.load %arg4[%c0_56, %c0_57] : memref<128x128xbf16, #tpu.memory_space<vmem>>, vector<128x128xbf16>
    %cst_58 = arith.constant dense<0.000000e+00> : vector<8x128xf32>
    %116 = tpu.matmul %110, %115, %cst_58 {dimension_numbers = #tpu.dot_dimension_numbers<[1], [0], [0], [1], [0, 0, 1, 1], [], []>} : vector<8x128xbf16>, vector<128x128xbf16>, vector<8x128xf32> -> vector<8x128xf32>
    %117 = vector.extract_strided_slice %109 {offsets = [0, 0], sizes = [8, 128], strides = [1, 1]} : vector<8x384xf32> to vector<8x128xf32>
    %118 = arith.addf %117, %112 : vector<8x128xf32>
    %119 = arith.negf %118 : vector<8x128xf32>
    %120 = math.exp %119 : vector<8x128xf32>
    %cst_59 = arith.constant 1.000000e+00 : f32
    %121 = vector.broadcast %cst_59 : f32 to vector<8x128xf32>
    %122 = arith.addf %121, %120 : vector<8x128xf32>
    %123 = arith.divf %121, %122 : vector<8x128xf32>
    %124 = vector.extract_strided_slice %109 {offsets = [0, 256], sizes = [8, 128], strides = [1, 1]} : vector<8x384xf32> to vector<8x128xf32>
    %125 = arith.addf %114, %11 : vector<8x128xf32>
    %126 = arith.mulf %123, %125 : vector<8x128xf32>
    %127 = arith.addf %124, %126 : vector<8x128xf32>
    %128 = math.tanh %127 : vector<8x128xf32>
    %129 = vector.extract_strided_slice %109 {offsets = [0, 128], sizes = [8, 128], strides = [1, 1]} : vector<8x384xf32> to vector<8x128xf32>
    %130 = arith.addf %129, %116 : vector<8x128xf32>
    %131 = arith.negf %130 : vector<8x128xf32>
    %132 = math.exp %131 : vector<8x128xf32>
    %cst_60 = arith.constant 1.000000e+00 : f32
    %133 = vector.broadcast %cst_60 : f32 to vector<8x128xf32>
    %134 = arith.addf %133, %132 : vector<8x128xf32>
    %135 = arith.divf %133, %134 : vector<8x128xf32>
    %cst_61 = arith.constant 1.000000e+00 : f32
    %136 = vector.broadcast %cst_61 : f32 to vector<8x128xf32>
    %137 = arith.subf %136, %135 : vector<8x128xf32>
    %138 = arith.mulf %137, %128 : vector<8x128xf32>
    %139 = arith.mulf %135, %108 : vector<8x128xf32>
    %140 = arith.addf %138, %139 : vector<8x128xf32>
    %c32 = arith.constant 32 : index
    %c0_62 = arith.constant 0 : index
    %141 = vector.load %arg10[%c32, %c0_62] : memref<128x384xf32, #tpu.memory_space<vmem>>, vector<8x384xf32>
    %142 = arith.truncf %140 : vector<8x128xf32> to vector<8x128xbf16>
    %c0_63 = arith.constant 0 : index
    %c0_64 = arith.constant 0 : index
    %143 = vector.load %arg3[%c0_63, %c0_64] : memref<128x128xbf16, #tpu.memory_space<vmem>>, vector<128x128xbf16>
    %cst_65 = arith.constant dense<0.000000e+00> : vector<8x128xf32>
    %144 = tpu.matmul %142, %143, %cst_65 {dimension_numbers = #tpu.dot_dimension_numbers<[1], [0], [0], [1], [0, 0, 1, 1], [], []>} : vector<8x128xbf16>, vector<128x128xbf16>, vector<8x128xf32> -> vector<8x128xf32>
    %c0_66 = arith.constant 0 : index
    %c0_67 = arith.constant 0 : index
    %145 = vector.load %arg5[%c0_66, %c0_67] : memref<128x128xbf16, #tpu.memory_space<vmem>>, vector<128x128xbf16>
    %cst_68 = arith.constant dense<0.000000e+00> : vector<8x128xf32>
    %146 = tpu.matmul %142, %145, %cst_68 {dimension_numbers = #tpu.dot_dimension_numbers<[1], [0], [0], [1], [0, 0, 1, 1], [], []>} : vector<8x128xbf16>, vector<128x128xbf16>, vector<8x128xf32> -> vector<8x128xf32>
    %c0_69 = arith.constant 0 : index
    %c0_70 = arith.constant 0 : index
    %147 = vector.load %arg4[%c0_69, %c0_70] : memref<128x128xbf16, #tpu.memory_space<vmem>>, vector<128x128xbf16>
    %cst_71 = arith.constant dense<0.000000e+00> : vector<8x128xf32>
    %148 = tpu.matmul %142, %147, %cst_71 {dimension_numbers = #tpu.dot_dimension_numbers<[1], [0], [0], [1], [0, 0, 1, 1], [], []>} : vector<8x128xbf16>, vector<128x128xbf16>, vector<8x128xf32> -> vector<8x128xf32>
    %149 = vector.extract_strided_slice %141 {offsets = [0, 0], sizes = [8, 128], strides = [1, 1]} : vector<8x384xf32> to vector<8x128xf32>
    %150 = arith.addf %149, %144 : vector<8x128xf32>
    %151 = arith.negf %150 : vector<8x128xf32>
    %152 = math.exp %151 : vector<8x128xf32>
    %cst_72 = arith.constant 1.000000e+00 : f32
    %153 = vector.broadcast %cst_72 : f32 to vector<8x128xf32>
    %154 = arith.addf %153, %152 : vector<8x128xf32>
    %155 = arith.divf %153, %154 : vector<8x128xf32>
    %156 = vector.extract_strided_slice %141 {offsets = [0, 256], sizes = [8, 128], strides = [1, 1]} : vector<8x384xf32> to vector<8x128xf32>
    %157 = arith.addf %146, %11 : vector<8x128xf32>
    %158 = arith.mulf %155, %157 : vector<8x128xf32>
    %159 = arith.addf %156, %158 : vector<8x128xf32>
    %160 = math.tanh %159 : vector<8x128xf32>
    %161 = vector.extract_strided_slice %141 {offsets = [0, 128], sizes = [8, 128], strides = [1, 1]} : vector<8x384xf32> to vector<8x128xf32>
    %162 = arith.addf %161, %148 : vector<8x128xf32>
    %163 = arith.negf %162 : vector<8x128xf32>
    %164 = math.exp %163 : vector<8x128xf32>
    %cst_73 = arith.constant 1.000000e+00 : f32
    %165 = vector.broadcast %cst_73 : f32 to vector<8x128xf32>
    %166 = arith.addf %165, %164 : vector<8x128xf32>
    %167 = arith.divf %165, %166 : vector<8x128xf32>
    %cst_74 = arith.constant 1.000000e+00 : f32
    %168 = vector.broadcast %cst_74 : f32 to vector<8x128xf32>
    %169 = arith.subf %168, %167 : vector<8x128xf32>
    %170 = arith.mulf %169, %160 : vector<8x128xf32>
    %171 = arith.mulf %167, %140 : vector<8x128xf32>
    %172 = arith.addf %170, %171 : vector<8x128xf32>
    %c40 = arith.constant 40 : index
    %c0_75 = arith.constant 0 : index
    %173 = vector.load %arg10[%c40, %c0_75] : memref<128x384xf32, #tpu.memory_space<vmem>>, vector<8x384xf32>
    %174 = arith.truncf %172 : vector<8x128xf32> to vector<8x128xbf16>
    %c0_76 = arith.constant 0 : index
    %c0_77 = arith.constant 0 : index
    %175 = vector.load %arg3[%c0_76, %c0_77] : memref<128x128xbf16, #tpu.memory_space<vmem>>, vector<128x128xbf16>
    %cst_78 = arith.constant dense<0.000000e+00> : vector<8x128xf32>
    %176 = tpu.matmul %174, %175, %cst_78 {dimension_numbers = #tpu.dot_dimension_numbers<[1], [0], [0], [1], [0, 0, 1, 1], [], []>} : vector<8x128xbf16>, vector<128x128xbf16>, vector<8x128xf32> -> vector<8x128xf32>
    %c0_79 = arith.constant 0 : index
    %c0_80 = arith.constant 0 : index
    %177 = vector.load %arg5[%c0_79, %c0_80] : memref<128x128xbf16, #tpu.memory_space<vmem>>, vector<128x128xbf16>
    %cst_81 = arith.constant dense<0.000000e+00> : vector<8x128xf32>
    %178 = tpu.matmul %174, %177, %cst_81 {dimension_numbers = #tpu.dot_dimension_numbers<[1], [0], [0], [1], [0, 0, 1, 1], [], []>} : vector<8x128xbf16>, vector<128x128xbf16>, vector<8x128xf32> -> vector<8x128xf32>
    %c0_82 = arith.constant 0 : index
    %c0_83 = arith.constant 0 : index
    %179 = vector.load %arg4[%c0_82, %c0_83] : memref<128x128xbf16, #tpu.memory_space<vmem>>, vector<128x128xbf16>
    %cst_84 = arith.constant dense<0.000000e+00> : vector<8x128xf32>
    %180 = tpu.matmul %174, %179, %cst_84 {dimension_numbers = #tpu.dot_dimension_numbers<[1], [0], [0], [1], [0, 0, 1, 1], [], []>} : vector<8x128xbf16>, vector<128x128xbf16>, vector<8x128xf32> -> vector<8x128xf32>
    %181 = vector.extract_strided_slice %173 {offsets = [0, 0], sizes = [8, 128], strides = [1, 1]} : vector<8x384xf32> to vector<8x128xf32>
    %182 = arith.addf %181, %176 : vector<8x128xf32>
    %183 = arith.negf %182 : vector<8x128xf32>
    %184 = math.exp %183 : vector<8x128xf32>
    %cst_85 = arith.constant 1.000000e+00 : f32
    %185 = vector.broadcast %cst_85 : f32 to vector<8x128xf32>
    %186 = arith.addf %185, %184 : vector<8x128xf32>
    %187 = arith.divf %185, %186 : vector<8x128xf32>
    %188 = vector.extract_strided_slice %173 {offsets = [0, 256], sizes = [8, 128], strides = [1, 1]} : vector<8x384xf32> to vector<8x128xf32>
    %189 = arith.addf %178, %11 : vector<8x128xf32>
    %190 = arith.mulf %187, %189 : vector<8x128xf32>
    %191 = arith.addf %188, %190 : vector<8x128xf32>
    %192 = math.tanh %191 : vector<8x128xf32>
    %193 = vector.extract_strided_slice %173 {offsets = [0, 128], sizes = [8, 128], strides = [1, 1]} : vector<8x384xf32> to vector<8x128xf32>
    %194 = arith.addf %193, %180 : vector<8x128xf32>
    %195 = arith.negf %194 : vector<8x128xf32>
    %196 = math.exp %195 : vector<8x128xf32>
    %cst_86 = arith.constant 1.000000e+00 : f32
    %197 = vector.broadcast %cst_86 : f32 to vector<8x128xf32>
    %198 = arith.addf %197, %196 : vector<8x128xf32>
    %199 = arith.divf %197, %198 : vector<8x128xf32>
    %cst_87 = arith.constant 1.000000e+00 : f32
    %200 = vector.broadcast %cst_87 : f32 to vector<8x128xf32>
    %201 = arith.subf %200, %199 : vector<8x128xf32>
    %202 = arith.mulf %201, %192 : vector<8x128xf32>
    %203 = arith.mulf %199, %172 : vector<8x128xf32>
    %204 = arith.addf %202, %203 : vector<8x128xf32>
    %c48 = arith.constant 48 : index
    %c0_88 = arith.constant 0 : index
    %205 = vector.load %arg10[%c48, %c0_88] : memref<128x384xf32, #tpu.memory_space<vmem>>, vector<8x384xf32>
    %206 = arith.truncf %204 : vector<8x128xf32> to vector<8x128xbf16>
    %c0_89 = arith.constant 0 : index
    %c0_90 = arith.constant 0 : index
    %207 = vector.load %arg3[%c0_89, %c0_90] : memref<128x128xbf16, #tpu.memory_space<vmem>>, vector<128x128xbf16>
    %cst_91 = arith.constant dense<0.000000e+00> : vector<8x128xf32>
    %208 = tpu.matmul %206, %207, %cst_91 {dimension_numbers = #tpu.dot_dimension_numbers<[1], [0], [0], [1], [0, 0, 1, 1], [], []>} : vector<8x128xbf16>, vector<128x128xbf16>, vector<8x128xf32> -> vector<8x128xf32>
    %c0_92 = arith.constant 0 : index
    %c0_93 = arith.constant 0 : index
    %209 = vector.load %arg5[%c0_92, %c0_93] : memref<128x128xbf16, #tpu.memory_space<vmem>>, vector<128x128xbf16>
    %cst_94 = arith.constant dense<0.000000e+00> : vector<8x128xf32>
    %210 = tpu.matmul %206, %209, %cst_94 {dimension_numbers = #tpu.dot_dimension_numbers<[1], [0], [0], [1], [0, 0, 1, 1], [], []>} : vector<8x128xbf16>, vector<128x128xbf16>, vector<8x128xf32> -> vector<8x128xf32>
    %c0_95 = arith.constant 0 : index
    %c0_96 = arith.constant 0 : index
    %211 = vector.load %arg4[%c0_95, %c0_96] : memref<128x128xbf16, #tpu.memory_space<vmem>>, vector<128x128xbf16>
    %cst_97 = arith.constant dense<0.000000e+00> : vector<8x128xf32>
    %212 = tpu.matmul %206, %211, %cst_97 {dimension_numbers = #tpu.dot_dimension_numbers<[1], [0], [0], [1], [0, 0, 1, 1], [], []>} : vector<8x128xbf16>, vector<128x128xbf16>, vector<8x128xf32> -> vector<8x128xf32>
    %213 = vector.extract_strided_slice %205 {offsets = [0, 0], sizes = [8, 128], strides = [1, 1]} : vector<8x384xf32> to vector<8x128xf32>
    %214 = arith.addf %213, %208 : vector<8x128xf32>
    %215 = arith.negf %214 : vector<8x128xf32>
    %216 = math.exp %215 : vector<8x128xf32>
    %cst_98 = arith.constant 1.000000e+00 : f32
    %217 = vector.broadcast %cst_98 : f32 to vector<8x128xf32>
    %218 = arith.addf %217, %216 : vector<8x128xf32>
    %219 = arith.divf %217, %218 : vector<8x128xf32>
    %220 = vector.extract_strided_slice %205 {offsets = [0, 256], sizes = [8, 128], strides = [1, 1]} : vector<8x384xf32> to vector<8x128xf32>
    %221 = arith.addf %210, %11 : vector<8x128xf32>
    %222 = arith.mulf %219, %221 : vector<8x128xf32>
    %223 = arith.addf %220, %222 : vector<8x128xf32>
    %224 = math.tanh %223 : vector<8x128xf32>
    %225 = vector.extract_strided_slice %205 {offsets = [0, 128], sizes = [8, 128], strides = [1, 1]} : vector<8x384xf32> to vector<8x128xf32>
    %226 = arith.addf %225, %212 : vector<8x128xf32>
    %227 = arith.negf %226 : vector<8x128xf32>
    %228 = math.exp %227 : vector<8x128xf32>
    %cst_99 = arith.constant 1.000000e+00 : f32
    %229 = vector.broadcast %cst_99 : f32 to vector<8x128xf32>
    %230 = arith.addf %229, %228 : vector<8x128xf32>
    %231 = arith.divf %229, %230 : vector<8x128xf32>
    %cst_100 = arith.constant 1.000000e+00 : f32
    %232 = vector.broadcast %cst_100 : f32 to vector<8x128xf32>
    %233 = arith.subf %232, %231 : vector<8x128xf32>
    %234 = arith.mulf %233, %224 : vector<8x128xf32>
    %235 = arith.mulf %231, %204 : vector<8x128xf32>
    %236 = arith.addf %234, %235 : vector<8x128xf32>
    %c56 = arith.constant 56 : index
    %c0_101 = arith.constant 0 : index
    %237 = vector.load %arg10[%c56, %c0_101] : memref<128x384xf32, #tpu.memory_space<vmem>>, vector<8x384xf32>
    %238 = arith.truncf %236 : vector<8x128xf32> to vector<8x128xbf16>
    %c0_102 = arith.constant 0 : index
    %c0_103 = arith.constant 0 : index
    %239 = vector.load %arg3[%c0_102, %c0_103] : memref<128x128xbf16, #tpu.memory_space<vmem>>, vector<128x128xbf16>
    %cst_104 = arith.constant dense<0.000000e+00> : vector<8x128xf32>
    %240 = tpu.matmul %238, %239, %cst_104 {dimension_numbers = #tpu.dot_dimension_numbers<[1], [0], [0], [1], [0, 0, 1, 1], [], []>} : vector<8x128xbf16>, vector<128x128xbf16>, vector<8x128xf32> -> vector<8x128xf32>
    %c0_105 = arith.constant 0 : index
    %c0_106 = arith.constant 0 : index
    %241 = vector.load %arg5[%c0_105, %c0_106] : memref<128x128xbf16, #tpu.memory_space<vmem>>, vector<128x128xbf16>
    %cst_107 = arith.constant dense<0.000000e+00> : vector<8x128xf32>
    %242 = tpu.matmul %238, %241, %cst_107 {dimension_numbers = #tpu.dot_dimension_numbers<[1], [0], [0], [1], [0, 0, 1, 1], [], []>} : vector<8x128xbf16>, vector<128x128xbf16>, vector<8x128xf32> -> vector<8x128xf32>
    %c0_108 = arith.constant 0 : index
    %c0_109 = arith.constant 0 : index
    %243 = vector.load %arg4[%c0_108, %c0_109] : memref<128x128xbf16, #tpu.memory_space<vmem>>, vector<128x128xbf16>
    %cst_110 = arith.constant dense<0.000000e+00> : vector<8x128xf32>
    %244 = tpu.matmul %238, %243, %cst_110 {dimension_numbers = #tpu.dot_dimension_numbers<[1], [0], [0], [1], [0, 0, 1, 1], [], []>} : vector<8x128xbf16>, vector<128x128xbf16>, vector<8x128xf32> -> vector<8x128xf32>
    %245 = vector.extract_strided_slice %237 {offsets = [0, 0], sizes = [8, 128], strides = [1, 1]} : vector<8x384xf32> to vector<8x128xf32>
    %246 = arith.addf %245, %240 : vector<8x128xf32>
    %247 = arith.negf %246 : vector<8x128xf32>
    %248 = math.exp %247 : vector<8x128xf32>
    %cst_111 = arith.constant 1.000000e+00 : f32
    %249 = vector.broadcast %cst_111 : f32 to vector<8x128xf32>
    %250 = arith.addf %249, %248 : vector<8x128xf32>
    %251 = arith.divf %249, %250 : vector<8x128xf32>
    %252 = vector.extract_strided_slice %237 {offsets = [0, 256], sizes = [8, 128], strides = [1, 1]} : vector<8x384xf32> to vector<8x128xf32>
    %253 = arith.addf %242, %11 : vector<8x128xf32>
    %254 = arith.mulf %251, %253 : vector<8x128xf32>
    %255 = arith.addf %252, %254 : vector<8x128xf32>
    %256 = math.tanh %255 : vector<8x128xf32>
    %257 = vector.extract_strided_slice %237 {offsets = [0, 128], sizes = [8, 128], strides = [1, 1]} : vector<8x384xf32> to vector<8x128xf32>
    %258 = arith.addf %257, %244 : vector<8x128xf32>
    %259 = arith.negf %258 : vector<8x128xf32>
    %260 = math.exp %259 : vector<8x128xf32>
    %cst_112 = arith.constant 1.000000e+00 : f32
    %261 = vector.broadcast %cst_112 : f32 to vector<8x128xf32>
    %262 = arith.addf %261, %260 : vector<8x128xf32>
    %263 = arith.divf %261, %262 : vector<8x128xf32>
    %cst_113 = arith.constant 1.000000e+00 : f32
    %264 = vector.broadcast %cst_113 : f32 to vector<8x128xf32>
    %265 = arith.subf %264, %263 : vector<8x128xf32>
    %266 = arith.mulf %265, %256 : vector<8x128xf32>
    %267 = arith.mulf %263, %236 : vector<8x128xf32>
    %268 = arith.addf %266, %267 : vector<8x128xf32>
    %c64 = arith.constant 64 : index
    %c0_114 = arith.constant 0 : index
    %269 = vector.load %arg10[%c64, %c0_114] : memref<128x384xf32, #tpu.memory_space<vmem>>, vector<8x384xf32>
    %270 = arith.truncf %268 : vector<8x128xf32> to vector<8x128xbf16>
    %c0_115 = arith.constant 0 : index
    %c0_116 = arith.constant 0 : index
    %271 = vector.load %arg3[%c0_115, %c0_116] : memref<128x128xbf16, #tpu.memory_space<vmem>>, vector<128x128xbf16>
    %cst_117 = arith.constant dense<0.000000e+00> : vector<8x128xf32>
    %272 = tpu.matmul %270, %271, %cst_117 {dimension_numbers = #tpu.dot_dimension_numbers<[1], [0], [0], [1], [0, 0, 1, 1], [], []>} : vector<8x128xbf16>, vector<128x128xbf16>, vector<8x128xf32> -> vector<8x128xf32>
    %c0_118 = arith.constant 0 : index
    %c0_119 = arith.constant 0 : index
    %273 = vector.load %arg5[%c0_118, %c0_119] : memref<128x128xbf16, #tpu.memory_space<vmem>>, vector<128x128xbf16>
    %cst_120 = arith.constant dense<0.000000e+00> : vector<8x128xf32>
    %274 = tpu.matmul %270, %273, %cst_120 {dimension_numbers = #tpu.dot_dimension_numbers<[1], [0], [0], [1], [0, 0, 1, 1], [], []>} : vector<8x128xbf16>, vector<128x128xbf16>, vector<8x128xf32> -> vector<8x128xf32>
    %c0_121 = arith.constant 0 : index
    %c0_122 = arith.constant 0 : index
    %275 = vector.load %arg4[%c0_121, %c0_122] : memref<128x128xbf16, #tpu.memory_space<vmem>>, vector<128x128xbf16>
    %cst_123 = arith.constant dense<0.000000e+00> : vector<8x128xf32>
    %276 = tpu.matmul %270, %275, %cst_123 {dimension_numbers = #tpu.dot_dimension_numbers<[1], [0], [0], [1], [0, 0, 1, 1], [], []>} : vector<8x128xbf16>, vector<128x128xbf16>, vector<8x128xf32> -> vector<8x128xf32>
    %277 = vector.extract_strided_slice %269 {offsets = [0, 0], sizes = [8, 128], strides = [1, 1]} : vector<8x384xf32> to vector<8x128xf32>
    %278 = arith.addf %277, %272 : vector<8x128xf32>
    %279 = arith.negf %278 : vector<8x128xf32>
    %280 = math.exp %279 : vector<8x128xf32>
    %cst_124 = arith.constant 1.000000e+00 : f32
    %281 = vector.broadcast %cst_124 : f32 to vector<8x128xf32>
    %282 = arith.addf %281, %280 : vector<8x128xf32>
    %283 = arith.divf %281, %282 : vector<8x128xf32>
    %284 = vector.extract_strided_slice %269 {offsets = [0, 256], sizes = [8, 128], strides = [1, 1]} : vector<8x384xf32> to vector<8x128xf32>
    %285 = arith.addf %274, %11 : vector<8x128xf32>
    %286 = arith.mulf %283, %285 : vector<8x128xf32>
    %287 = arith.addf %284, %286 : vector<8x128xf32>
    %288 = math.tanh %287 : vector<8x128xf32>
    %289 = vector.extract_strided_slice %269 {offsets = [0, 128], sizes = [8, 128], strides = [1, 1]} : vector<8x384xf32> to vector<8x128xf32>
    %290 = arith.addf %289, %276 : vector<8x128xf32>
    %291 = arith.negf %290 : vector<8x128xf32>
    %292 = math.exp %291 : vector<8x128xf32>
    %cst_125 = arith.constant 1.000000e+00 : f32
    %293 = vector.broadcast %cst_125 : f32 to vector<8x128xf32>
    %294 = arith.addf %293, %292 : vector<8x128xf32>
    %295 = arith.divf %293, %294 : vector<8x128xf32>
    %cst_126 = arith.constant 1.000000e+00 : f32
    %296 = vector.broadcast %cst_126 : f32 to vector<8x128xf32>
    %297 = arith.subf %296, %295 : vector<8x128xf32>
    %298 = arith.mulf %297, %288 : vector<8x128xf32>
    %299 = arith.mulf %295, %268 : vector<8x128xf32>
    %300 = arith.addf %298, %299 : vector<8x128xf32>
    %c72 = arith.constant 72 : index
    %c0_127 = arith.constant 0 : index
    %301 = vector.load %arg10[%c72, %c0_127] : memref<128x384xf32, #tpu.memory_space<vmem>>, vector<8x384xf32>
    %302 = arith.truncf %300 : vector<8x128xf32> to vector<8x128xbf16>
    %c0_128 = arith.constant 0 : index
    %c0_129 = arith.constant 0 : index
    %303 = vector.load %arg3[%c0_128, %c0_129] : memref<128x128xbf16, #tpu.memory_space<vmem>>, vector<128x128xbf16>
    %cst_130 = arith.constant dense<0.000000e+00> : vector<8x128xf32>
    %304 = tpu.matmul %302, %303, %cst_130 {dimension_numbers = #tpu.dot_dimension_numbers<[1], [0], [0], [1], [0, 0, 1, 1], [], []>} : vector<8x128xbf16>, vector<128x128xbf16>, vector<8x128xf32> -> vector<8x128xf32>
    %c0_131 = arith.constant 0 : index
    %c0_132 = arith.constant 0 : index
    %305 = vector.load %arg5[%c0_131, %c0_132] : memref<128x128xbf16, #tpu.memory_space<vmem>>, vector<128x128xbf16>
    %cst_133 = arith.constant dense<0.000000e+00> : vector<8x128xf32>
    %306 = tpu.matmul %302, %305, %cst_133 {dimension_numbers = #tpu.dot_dimension_numbers<[1], [0], [0], [1], [0, 0, 1, 1], [], []>} : vector<8x128xbf16>, vector<128x128xbf16>, vector<8x128xf32> -> vector<8x128xf32>
    %c0_134 = arith.constant 0 : index
    %c0_135 = arith.constant 0 : index
    %307 = vector.load %arg4[%c0_134, %c0_135] : memref<128x128xbf16, #tpu.memory_space<vmem>>, vector<128x128xbf16>
    %cst_136 = arith.constant dense<0.000000e+00> : vector<8x128xf32>
    %308 = tpu.matmul %302, %307, %cst_136 {dimension_numbers = #tpu.dot_dimension_numbers<[1], [0], [0], [1], [0, 0, 1, 1], [], []>} : vector<8x128xbf16>, vector<128x128xbf16>, vector<8x128xf32> -> vector<8x128xf32>
    %309 = vector.extract_strided_slice %301 {offsets = [0, 0], sizes = [8, 128], strides = [1, 1]} : vector<8x384xf32> to vector<8x128xf32>
    %310 = arith.addf %309, %304 : vector<8x128xf32>
    %311 = arith.negf %310 : vector<8x128xf32>
    %312 = math.exp %311 : vector<8x128xf32>
    %cst_137 = arith.constant 1.000000e+00 : f32
    %313 = vector.broadcast %cst_137 : f32 to vector<8x128xf32>
    %314 = arith.addf %313, %312 : vector<8x128xf32>
    %315 = arith.divf %313, %314 : vector<8x128xf32>
    %316 = vector.extract_strided_slice %301 {offsets = [0, 256], sizes = [8, 128], strides = [1, 1]} : vector<8x384xf32> to vector<8x128xf32>
    %317 = arith.addf %306, %11 : vector<8x128xf32>
    %318 = arith.mulf %315, %317 : vector<8x128xf32>
    %319 = arith.addf %316, %318 : vector<8x128xf32>
    %320 = math.tanh %319 : vector<8x128xf32>
    %321 = vector.extract_strided_slice %301 {offsets = [0, 128], sizes = [8, 128], strides = [1, 1]} : vector<8x384xf32> to vector<8x128xf32>
    %322 = arith.addf %321, %308 : vector<8x128xf32>
    %323 = arith.negf %322 : vector<8x128xf32>
    %324 = math.exp %323 : vector<8x128xf32>
    %cst_138 = arith.constant 1.000000e+00 : f32
    %325 = vector.broadcast %cst_138 : f32 to vector<8x128xf32>
    %326 = arith.addf %325, %324 : vector<8x128xf32>
    %327 = arith.divf %325, %326 : vector<8x128xf32>
    %cst_139 = arith.constant 1.000000e+00 : f32
    %328 = vector.broadcast %cst_139 : f32 to vector<8x128xf32>
    %329 = arith.subf %328, %327 : vector<8x128xf32>
    %330 = arith.mulf %329, %320 : vector<8x128xf32>
    %331 = arith.mulf %327, %300 : vector<8x128xf32>
    %332 = arith.addf %330, %331 : vector<8x128xf32>
    %c80 = arith.constant 80 : index
    %c0_140 = arith.constant 0 : index
    %333 = vector.load %arg10[%c80, %c0_140] : memref<128x384xf32, #tpu.memory_space<vmem>>, vector<8x384xf32>
    %334 = arith.truncf %332 : vector<8x128xf32> to vector<8x128xbf16>
    %c0_141 = arith.constant 0 : index
    %c0_142 = arith.constant 0 : index
    %335 = vector.load %arg3[%c0_141, %c0_142] : memref<128x128xbf16, #tpu.memory_space<vmem>>, vector<128x128xbf16>
    %cst_143 = arith.constant dense<0.000000e+00> : vector<8x128xf32>
    %336 = tpu.matmul %334, %335, %cst_143 {dimension_numbers = #tpu.dot_dimension_numbers<[1], [0], [0], [1], [0, 0, 1, 1], [], []>} : vector<8x128xbf16>, vector<128x128xbf16>, vector<8x128xf32> -> vector<8x128xf32>
    %c0_144 = arith.constant 0 : index
    %c0_145 = arith.constant 0 : index
    %337 = vector.load %arg5[%c0_144, %c0_145] : memref<128x128xbf16, #tpu.memory_space<vmem>>, vector<128x128xbf16>
    %cst_146 = arith.constant dense<0.000000e+00> : vector<8x128xf32>
    %338 = tpu.matmul %334, %337, %cst_146 {dimension_numbers = #tpu.dot_dimension_numbers<[1], [0], [0], [1], [0, 0, 1, 1], [], []>} : vector<8x128xbf16>, vector<128x128xbf16>, vector<8x128xf32> -> vector<8x128xf32>
    %c0_147 = arith.constant 0 : index
    %c0_148 = arith.constant 0 : index
    %339 = vector.load %arg4[%c0_147, %c0_148] : memref<128x128xbf16, #tpu.memory_space<vmem>>, vector<128x128xbf16>
    %cst_149 = arith.constant dense<0.000000e+00> : vector<8x128xf32>
    %340 = tpu.matmul %334, %339, %cst_149 {dimension_numbers = #tpu.dot_dimension_numbers<[1], [0], [0], [1], [0, 0, 1, 1], [], []>} : vector<8x128xbf16>, vector<128x128xbf16>, vector<8x128xf32> -> vector<8x128xf32>
    %341 = vector.extract_strided_slice %333 {offsets = [0, 0], sizes = [8, 128], strides = [1, 1]} : vector<8x384xf32> to vector<8x128xf32>
    %342 = arith.addf %341, %336 : vector<8x128xf32>
    %343 = arith.negf %342 : vector<8x128xf32>
    %344 = math.exp %343 : vector<8x128xf32>
    %cst_150 = arith.constant 1.000000e+00 : f32
    %345 = vector.broadcast %cst_150 : f32 to vector<8x128xf32>
    %346 = arith.addf %345, %344 : vector<8x128xf32>
    %347 = arith.divf %345, %346 : vector<8x128xf32>
    %348 = vector.extract_strided_slice %333 {offsets = [0, 256], sizes = [8, 128], strides = [1, 1]} : vector<8x384xf32> to vector<8x128xf32>
    %349 = arith.addf %338, %11 : vector<8x128xf32>
    %350 = arith.mulf %347, %349 : vector<8x128xf32>
    %351 = arith.addf %348, %350 : vector<8x128xf32>
    %352 = math.tanh %351 : vector<8x128xf32>
    %353 = vector.extract_strided_slice %333 {offsets = [0, 128], sizes = [8, 128], strides = [1, 1]} : vector<8x384xf32> to vector<8x128xf32>
    %354 = arith.addf %353, %340 : vector<8x128xf32>
    %355 = arith.negf %354 : vector<8x128xf32>
    %356 = math.exp %355 : vector<8x128xf32>
    %cst_151 = arith.constant 1.000000e+00 : f32
    %357 = vector.broadcast %cst_151 : f32 to vector<8x128xf32>
    %358 = arith.addf %357, %356 : vector<8x128xf32>
    %359 = arith.divf %357, %358 : vector<8x128xf32>
    %cst_152 = arith.constant 1.000000e+00 : f32
    %360 = vector.broadcast %cst_152 : f32 to vector<8x128xf32>
    %361 = arith.subf %360, %359 : vector<8x128xf32>
    %362 = arith.mulf %361, %352 : vector<8x128xf32>
    %363 = arith.mulf %359, %332 : vector<8x128xf32>
    %364 = arith.addf %362, %363 : vector<8x128xf32>
    %c88 = arith.constant 88 : index
    %c0_153 = arith.constant 0 : index
    %365 = vector.load %arg10[%c88, %c0_153] : memref<128x384xf32, #tpu.memory_space<vmem>>, vector<8x384xf32>
    %366 = arith.truncf %364 : vector<8x128xf32> to vector<8x128xbf16>
    %c0_154 = arith.constant 0 : index
    %c0_155 = arith.constant 0 : index
    %367 = vector.load %arg3[%c0_154, %c0_155] : memref<128x128xbf16, #tpu.memory_space<vmem>>, vector<128x128xbf16>
    %cst_156 = arith.constant dense<0.000000e+00> : vector<8x128xf32>
    %368 = tpu.matmul %366, %367, %cst_156 {dimension_numbers = #tpu.dot_dimension_numbers<[1], [0], [0], [1], [0, 0, 1, 1], [], []>} : vector<8x128xbf16>, vector<128x128xbf16>, vector<8x128xf32> -> vector<8x128xf32>
    %c0_157 = arith.constant 0 : index
    %c0_158 = arith.constant 0 : index
    %369 = vector.load %arg5[%c0_157, %c0_158] : memref<128x128xbf16, #tpu.memory_space<vmem>>, vector<128x128xbf16>
    %cst_159 = arith.constant dense<0.000000e+00> : vector<8x128xf32>
    %370 = tpu.matmul %366, %369, %cst_159 {dimension_numbers = #tpu.dot_dimension_numbers<[1], [0], [0], [1], [0, 0, 1, 1], [], []>} : vector<8x128xbf16>, vector<128x128xbf16>, vector<8x128xf32> -> vector<8x128xf32>
    %c0_160 = arith.constant 0 : index
    %c0_161 = arith.constant 0 : index
    %371 = vector.load %arg4[%c0_160, %c0_161] : memref<128x128xbf16, #tpu.memory_space<vmem>>, vector<128x128xbf16>
    %cst_162 = arith.constant dense<0.000000e+00> : vector<8x128xf32>
    %372 = tpu.matmul %366, %371, %cst_162 {dimension_numbers = #tpu.dot_dimension_numbers<[1], [0], [0], [1], [0, 0, 1, 1], [], []>} : vector<8x128xbf16>, vector<128x128xbf16>, vector<8x128xf32> -> vector<8x128xf32>
    %373 = vector.extract_strided_slice %365 {offsets = [0, 0], sizes = [8, 128], strides = [1, 1]} : vector<8x384xf32> to vector<8x128xf32>
    %374 = arith.addf %373, %368 : vector<8x128xf32>
    %375 = arith.negf %374 : vector<8x128xf32>
    %376 = math.exp %375 : vector<8x128xf32>
    %cst_163 = arith.constant 1.000000e+00 : f32
    %377 = vector.broadcast %cst_163 : f32 to vector<8x128xf32>
    %378 = arith.addf %377, %376 : vector<8x128xf32>
    %379 = arith.divf %377, %378 : vector<8x128xf32>
    %380 = vector.extract_strided_slice %365 {offsets = [0, 256], sizes = [8, 128], strides = [1, 1]} : vector<8x384xf32> to vector<8x128xf32>
    %381 = arith.addf %370, %11 : vector<8x128xf32>
    %382 = arith.mulf %379, %381 : vector<8x128xf32>
    %383 = arith.addf %380, %382 : vector<8x128xf32>
    %384 = math.tanh %383 : vector<8x128xf32>
    %385 = vector.extract_strided_slice %365 {offsets = [0, 128], sizes = [8, 128], strides = [1, 1]} : vector<8x384xf32> to vector<8x128xf32>
    %386 = arith.addf %385, %372 : vector<8x128xf32>
    %387 = arith.negf %386 : vector<8x128xf32>
    %388 = math.exp %387 : vector<8x128xf32>
    %cst_164 = arith.constant 1.000000e+00 : f32
    %389 = vector.broadcast %cst_164 : f32 to vector<8x128xf32>
    %390 = arith.addf %389, %388 : vector<8x128xf32>
    %391 = arith.divf %389, %390 : vector<8x128xf32>
    %cst_165 = arith.constant 1.000000e+00 : f32
    %392 = vector.broadcast %cst_165 : f32 to vector<8x128xf32>
    %393 = arith.subf %392, %391 : vector<8x128xf32>
    %394 = arith.mulf %393, %384 : vector<8x128xf32>
    %395 = arith.mulf %391, %364 : vector<8x128xf32>
    %396 = arith.addf %394, %395 : vector<8x128xf32>
    %c96 = arith.constant 96 : index
    %c0_166 = arith.constant 0 : index
    %397 = vector.load %arg10[%c96, %c0_166] : memref<128x384xf32, #tpu.memory_space<vmem>>, vector<8x384xf32>
    %398 = arith.truncf %396 : vector<8x128xf32> to vector<8x128xbf16>
    %c0_167 = arith.constant 0 : index
    %c0_168 = arith.constant 0 : index
    %399 = vector.load %arg3[%c0_167, %c0_168] : memref<128x128xbf16, #tpu.memory_space<vmem>>, vector<128x128xbf16>
    %cst_169 = arith.constant dense<0.000000e+00> : vector<8x128xf32>
    %400 = tpu.matmul %398, %399, %cst_169 {dimension_numbers = #tpu.dot_dimension_numbers<[1], [0], [0], [1], [0, 0, 1, 1], [], []>} : vector<8x128xbf16>, vector<128x128xbf16>, vector<8x128xf32> -> vector<8x128xf32>
    %c0_170 = arith.constant 0 : index
    %c0_171 = arith.constant 0 : index
    %401 = vector.load %arg5[%c0_170, %c0_171] : memref<128x128xbf16, #tpu.memory_space<vmem>>, vector<128x128xbf16>
    %cst_172 = arith.constant dense<0.000000e+00> : vector<8x128xf32>
    %402 = tpu.matmul %398, %401, %cst_172 {dimension_numbers = #tpu.dot_dimension_numbers<[1], [0], [0], [1], [0, 0, 1, 1], [], []>} : vector<8x128xbf16>, vector<128x128xbf16>, vector<8x128xf32> -> vector<8x128xf32>
    %c0_173 = arith.constant 0 : index
    %c0_174 = arith.constant 0 : index
    %403 = vector.load %arg4[%c0_173, %c0_174] : memref<128x128xbf16, #tpu.memory_space<vmem>>, vector<128x128xbf16>
    %cst_175 = arith.constant dense<0.000000e+00> : vector<8x128xf32>
    %404 = tpu.matmul %398, %403, %cst_175 {dimension_numbers = #tpu.dot_dimension_numbers<[1], [0], [0], [1], [0, 0, 1, 1], [], []>} : vector<8x128xbf16>, vector<128x128xbf16>, vector<8x128xf32> -> vector<8x128xf32>
    %405 = vector.extract_strided_slice %397 {offsets = [0, 0], sizes = [8, 128], strides = [1, 1]} : vector<8x384xf32> to vector<8x128xf32>
    %406 = arith.addf %405, %400 : vector<8x128xf32>
    %407 = arith.negf %406 : vector<8x128xf32>
    %408 = math.exp %407 : vector<8x128xf32>
    %cst_176 = arith.constant 1.000000e+00 : f32
    %409 = vector.broadcast %cst_176 : f32 to vector<8x128xf32>
    %410 = arith.addf %409, %408 : vector<8x128xf32>
    %411 = arith.divf %409, %410 : vector<8x128xf32>
    %412 = vector.extract_strided_slice %397 {offsets = [0, 256], sizes = [8, 128], strides = [1, 1]} : vector<8x384xf32> to vector<8x128xf32>
    %413 = arith.addf %402, %11 : vector<8x128xf32>
    %414 = arith.mulf %411, %413 : vector<8x128xf32>
    %415 = arith.addf %412, %414 : vector<8x128xf32>
    %416 = math.tanh %415 : vector<8x128xf32>
    %417 = vector.extract_strided_slice %397 {offsets = [0, 128], sizes = [8, 128], strides = [1, 1]} : vector<8x384xf32> to vector<8x128xf32>
    %418 = arith.addf %417, %404 : vector<8x128xf32>
    %419 = arith.negf %418 : vector<8x128xf32>
    %420 = math.exp %419 : vector<8x128xf32>
    %cst_177 = arith.constant 1.000000e+00 : f32
    %421 = vector.broadcast %cst_177 : f32 to vector<8x128xf32>
    %422 = arith.addf %421, %420 : vector<8x128xf32>
    %423 = arith.divf %421, %422 : vector<8x128xf32>
    %cst_178 = arith.constant 1.000000e+00 : f32
    %424 = vector.broadcast %cst_178 : f32 to vector<8x128xf32>
    %425 = arith.subf %424, %423 : vector<8x128xf32>
    %426 = arith.mulf %425, %416 : vector<8x128xf32>
    %427 = arith.mulf %423, %396 : vector<8x128xf32>
    %428 = arith.addf %426, %427 : vector<8x128xf32>
    %c104 = arith.constant 104 : index
    %c0_179 = arith.constant 0 : index
    %429 = vector.load %arg10[%c104, %c0_179] : memref<128x384xf32, #tpu.memory_space<vmem>>, vector<8x384xf32>
    %430 = arith.truncf %428 : vector<8x128xf32> to vector<8x128xbf16>
    %c0_180 = arith.constant 0 : index
    %c0_181 = arith.constant 0 : index
    %431 = vector.load %arg3[%c0_180, %c0_181] : memref<128x128xbf16, #tpu.memory_space<vmem>>, vector<128x128xbf16>
    %cst_182 = arith.constant dense<0.000000e+00> : vector<8x128xf32>
    %432 = tpu.matmul %430, %431, %cst_182 {dimension_numbers = #tpu.dot_dimension_numbers<[1], [0], [0], [1], [0, 0, 1, 1], [], []>} : vector<8x128xbf16>, vector<128x128xbf16>, vector<8x128xf32> -> vector<8x128xf32>
    %c0_183 = arith.constant 0 : index
    %c0_184 = arith.constant 0 : index
    %433 = vector.load %arg5[%c0_183, %c0_184] : memref<128x128xbf16, #tpu.memory_space<vmem>>, vector<128x128xbf16>
    %cst_185 = arith.constant dense<0.000000e+00> : vector<8x128xf32>
    %434 = tpu.matmul %430, %433, %cst_185 {dimension_numbers = #tpu.dot_dimension_numbers<[1], [0], [0], [1], [0, 0, 1, 1], [], []>} : vector<8x128xbf16>, vector<128x128xbf16>, vector<8x128xf32> -> vector<8x128xf32>
    %c0_186 = arith.constant 0 : index
    %c0_187 = arith.constant 0 : index
    %435 = vector.load %arg4[%c0_186, %c0_187] : memref<128x128xbf16, #tpu.memory_space<vmem>>, vector<128x128xbf16>
    %cst_188 = arith.constant dense<0.000000e+00> : vector<8x128xf32>
    %436 = tpu.matmul %430, %435, %cst_188 {dimension_numbers = #tpu.dot_dimension_numbers<[1], [0], [0], [1], [0, 0, 1, 1], [], []>} : vector<8x128xbf16>, vector<128x128xbf16>, vector<8x128xf32> -> vector<8x128xf32>
    %437 = vector.extract_strided_slice %429 {offsets = [0, 0], sizes = [8, 128], strides = [1, 1]} : vector<8x384xf32> to vector<8x128xf32>
    %438 = arith.addf %437, %432 : vector<8x128xf32>
    %439 = arith.negf %438 : vector<8x128xf32>
    %440 = math.exp %439 : vector<8x128xf32>
    %cst_189 = arith.constant 1.000000e+00 : f32
    %441 = vector.broadcast %cst_189 : f32 to vector<8x128xf32>
    %442 = arith.addf %441, %440 : vector<8x128xf32>
    %443 = arith.divf %441, %442 : vector<8x128xf32>
    %444 = vector.extract_strided_slice %429 {offsets = [0, 256], sizes = [8, 128], strides = [1, 1]} : vector<8x384xf32> to vector<8x128xf32>
    %445 = arith.addf %434, %11 : vector<8x128xf32>
    %446 = arith.mulf %443, %445 : vector<8x128xf32>
    %447 = arith.addf %444, %446 : vector<8x128xf32>
    %448 = math.tanh %447 : vector<8x128xf32>
    %449 = vector.extract_strided_slice %429 {offsets = [0, 128], sizes = [8, 128], strides = [1, 1]} : vector<8x384xf32> to vector<8x128xf32>
    %450 = arith.addf %449, %436 : vector<8x128xf32>
    %451 = arith.negf %450 : vector<8x128xf32>
    %452 = math.exp %451 : vector<8x128xf32>
    %cst_190 = arith.constant 1.000000e+00 : f32
    %453 = vector.broadcast %cst_190 : f32 to vector<8x128xf32>
    %454 = arith.addf %453, %452 : vector<8x128xf32>
    %455 = arith.divf %453, %454 : vector<8x128xf32>
    %cst_191 = arith.constant 1.000000e+00 : f32
    %456 = vector.broadcast %cst_191 : f32 to vector<8x128xf32>
    %457 = arith.subf %456, %455 : vector<8x128xf32>
    %458 = arith.mulf %457, %448 : vector<8x128xf32>
    %459 = arith.mulf %455, %428 : vector<8x128xf32>
    %460 = arith.addf %458, %459 : vector<8x128xf32>
    %c112 = arith.constant 112 : index
    %c0_192 = arith.constant 0 : index
    %461 = vector.load %arg10[%c112, %c0_192] : memref<128x384xf32, #tpu.memory_space<vmem>>, vector<8x384xf32>
    %462 = arith.truncf %460 : vector<8x128xf32> to vector<8x128xbf16>
    %c0_193 = arith.constant 0 : index
    %c0_194 = arith.constant 0 : index
    %463 = vector.load %arg3[%c0_193, %c0_194] : memref<128x128xbf16, #tpu.memory_space<vmem>>, vector<128x128xbf16>
    %cst_195 = arith.constant dense<0.000000e+00> : vector<8x128xf32>
    %464 = tpu.matmul %462, %463, %cst_195 {dimension_numbers = #tpu.dot_dimension_numbers<[1], [0], [0], [1], [0, 0, 1, 1], [], []>} : vector<8x128xbf16>, vector<128x128xbf16>, vector<8x128xf32> -> vector<8x128xf32>
    %c0_196 = arith.constant 0 : index
    %c0_197 = arith.constant 0 : index
    %465 = vector.load %arg5[%c0_196, %c0_197] : memref<128x128xbf16, #tpu.memory_space<vmem>>, vector<128x128xbf16>
    %cst_198 = arith.constant dense<0.000000e+00> : vector<8x128xf32>
    %466 = tpu.matmul %462, %465, %cst_198 {dimension_numbers = #tpu.dot_dimension_numbers<[1], [0], [0], [1], [0, 0, 1, 1], [], []>} : vector<8x128xbf16>, vector<128x128xbf16>, vector<8x128xf32> -> vector<8x128xf32>
    %c0_199 = arith.constant 0 : index
    %c0_200 = arith.constant 0 : index
    %467 = vector.load %arg4[%c0_199, %c0_200] : memref<128x128xbf16, #tpu.memory_space<vmem>>, vector<128x128xbf16>
    %cst_201 = arith.constant dense<0.000000e+00> : vector<8x128xf32>
    %468 = tpu.matmul %462, %467, %cst_201 {dimension_numbers = #tpu.dot_dimension_numbers<[1], [0], [0], [1], [0, 0, 1, 1], [], []>} : vector<8x128xbf16>, vector<128x128xbf16>, vector<8x128xf32> -> vector<8x128xf32>
    %469 = vector.extract_strided_slice %461 {offsets = [0, 0], sizes = [8, 128], strides = [1, 1]} : vector<8x384xf32> to vector<8x128xf32>
    %470 = arith.addf %469, %464 : vector<8x128xf32>
    %471 = arith.negf %470 : vector<8x128xf32>
    %472 = math.exp %471 : vector<8x128xf32>
    %cst_202 = arith.constant 1.000000e+00 : f32
    %473 = vector.broadcast %cst_202 : f32 to vector<8x128xf32>
    %474 = arith.addf %473, %472 : vector<8x128xf32>
    %475 = arith.divf %473, %474 : vector<8x128xf32>
    %476 = vector.extract_strided_slice %461 {offsets = [0, 256], sizes = [8, 128], strides = [1, 1]} : vector<8x384xf32> to vector<8x128xf32>
    %477 = arith.addf %466, %11 : vector<8x128xf32>
    %478 = arith.mulf %475, %477 : vector<8x128xf32>
    %479 = arith.addf %476, %478 : vector<8x128xf32>
    %480 = math.tanh %479 : vector<8x128xf32>
    %481 = vector.extract_strided_slice %461 {offsets = [0, 128], sizes = [8, 128], strides = [1, 1]} : vector<8x384xf32> to vector<8x128xf32>
    %482 = arith.addf %481, %468 : vector<8x128xf32>
    %483 = arith.negf %482 : vector<8x128xf32>
    %484 = math.exp %483 : vector<8x128xf32>
    %cst_203 = arith.constant 1.000000e+00 : f32
    %485 = vector.broadcast %cst_203 : f32 to vector<8x128xf32>
    %486 = arith.addf %485, %484 : vector<8x128xf32>
    %487 = arith.divf %485, %486 : vector<8x128xf32>
    %cst_204 = arith.constant 1.000000e+00 : f32
    %488 = vector.broadcast %cst_204 : f32 to vector<8x128xf32>
    %489 = arith.subf %488, %487 : vector<8x128xf32>
    %490 = arith.mulf %489, %480 : vector<8x128xf32>
    %491 = arith.mulf %487, %460 : vector<8x128xf32>
    %492 = arith.addf %490, %491 : vector<8x128xf32>
    %c120 = arith.constant 120 : index
    %c0_205 = arith.constant 0 : index
    %493 = vector.load %arg10[%c120, %c0_205] : memref<128x384xf32, #tpu.memory_space<vmem>>, vector<8x384xf32>
    %494 = arith.truncf %492 : vector<8x128xf32> to vector<8x128xbf16>
    %c0_206 = arith.constant 0 : index
    %c0_207 = arith.constant 0 : index
    %495 = vector.load %arg3[%c0_206, %c0_207] : memref<128x128xbf16, #tpu.memory_space<vmem>>, vector<128x128xbf16>
    %cst_208 = arith.constant dense<0.000000e+00> : vector<8x128xf32>
    %496 = tpu.matmul %494, %495, %cst_208 {dimension_numbers = #tpu.dot_dimension_numbers<[1], [0], [0], [1], [0, 0, 1, 1], [], []>} : vector<8x128xbf16>, vector<128x128xbf16>, vector<8x128xf32> -> vector<8x128xf32>
    %c0_209 = arith.constant 0 : index
    %c0_210 = arith.constant 0 : index
    %497 = vector.load %arg5[%c0_209, %c0_210] : memref<128x128xbf16, #tpu.memory_space<vmem>>, vector<128x128xbf16>
    %cst_211 = arith.constant dense<0.000000e+00> : vector<8x128xf32>
    %498 = tpu.matmul %494, %497, %cst_211 {dimension_numbers = #tpu.dot_dimension_numbers<[1], [0], [0], [1], [0, 0, 1, 1], [], []>} : vector<8x128xbf16>, vector<128x128xbf16>, vector<8x128xf32> -> vector<8x128xf32>
    %c0_212 = arith.constant 0 : index
    %c0_213 = arith.constant 0 : index
    %499 = vector.load %arg4[%c0_212, %c0_213] : memref<128x128xbf16, #tpu.memory_space<vmem>>, vector<128x128xbf16>
    %cst_214 = arith.constant dense<0.000000e+00> : vector<8x128xf32>
    %500 = tpu.matmul %494, %499, %cst_214 {dimension_numbers = #tpu.dot_dimension_numbers<[1], [0], [0], [1], [0, 0, 1, 1], [], []>} : vector<8x128xbf16>, vector<128x128xbf16>, vector<8x128xf32> -> vector<8x128xf32>
    %501 = vector.extract_strided_slice %493 {offsets = [0, 0], sizes = [8, 128], strides = [1, 1]} : vector<8x384xf32> to vector<8x128xf32>
    %502 = arith.addf %501, %496 : vector<8x128xf32>
    %503 = arith.negf %502 : vector<8x128xf32>
    %504 = math.exp %503 : vector<8x128xf32>
    %cst_215 = arith.constant 1.000000e+00 : f32
    %505 = vector.broadcast %cst_215 : f32 to vector<8x128xf32>
    %506 = arith.addf %505, %504 : vector<8x128xf32>
    %507 = arith.divf %505, %506 : vector<8x128xf32>
    %508 = vector.extract_strided_slice %493 {offsets = [0, 256], sizes = [8, 128], strides = [1, 1]} : vector<8x384xf32> to vector<8x128xf32>
    %509 = arith.addf %498, %11 : vector<8x128xf32>
    %510 = arith.mulf %507, %509 : vector<8x128xf32>
    %511 = arith.addf %508, %510 : vector<8x128xf32>
    %512 = math.tanh %511 : vector<8x128xf32>
    %513 = vector.extract_strided_slice %493 {offsets = [0, 128], sizes = [8, 128], strides = [1, 1]} : vector<8x384xf32> to vector<8x128xf32>
    %514 = arith.addf %513, %500 : vector<8x128xf32>
    %515 = arith.negf %514 : vector<8x128xf32>
    %516 = math.exp %515 : vector<8x128xf32>
    %cst_216 = arith.constant 1.000000e+00 : f32
    %517 = vector.broadcast %cst_216 : f32 to vector<8x128xf32>
    %518 = arith.addf %517, %516 : vector<8x128xf32>
    %519 = arith.divf %517, %518 : vector<8x128xf32>
    %cst_217 = arith.constant 1.000000e+00 : f32
    %520 = vector.broadcast %cst_217 : f32 to vector<8x128xf32>
    %521 = arith.subf %520, %519 : vector<8x128xf32>
    %522 = arith.mulf %521, %512 : vector<8x128xf32>
    %523 = arith.mulf %519, %492 : vector<8x128xf32>
    %524 = arith.addf %522, %523 : vector<8x128xf32>
    %525 = arith.truncf %524 : vector<8x128xf32> to vector<8x128xbf16>
    %c0_218 = arith.constant 0 : index
    %c0_219 = arith.constant 0 : index
    %526 = vector.load %arg7[%c0_218, %c0_219] : memref<128x128xbf16, #tpu.memory_space<vmem>>, vector<128x128xbf16>
    %cst_220 = arith.constant dense<0.000000e+00> : vector<8x128xf32>
    %527 = tpu.matmul %525, %526, %cst_220 {dimension_numbers = #tpu.dot_dimension_numbers<[1], [0], [0], [1], [0, 0, 1, 1], [], []>} : vector<8x128xbf16>, vector<128x128xbf16>, vector<8x128xf32> -> vector<8x128xf32>
    %c0_221 = arith.constant 0 : index
    %c0_222 = arith.constant 0 : index
    %528 = vector.load %arg8[%c0_221, %c0_222] : memref<1x128xf32, #tpu.memory_space<vmem>>, vector<1x128xf32>
    %529 = vector.broadcast %528 : vector<1x128xf32> to vector<8x128xf32>
    %530 = arith.addf %527, %529 : vector<8x128xf32>
    %c0_223 = arith.constant 0 : index
    %c0_224 = arith.constant 0 : index
    %531 = vector.load %arg9[%c0_223, %c0_224] : memref<8x128xf32, #tpu.memory_space<vmem>>, vector<8x128xf32>
    tpu.vector_store %arg9[%c0_223, %c0_224], %530 {strides = array<i32>} : memref<8x128xf32, #tpu.memory_space<vmem>>, vector<8x128xf32>,
    return
  }
}

</mosaic_0001>

<bundles_post_ra>
// kernel: tpu_custom_call.1
= control target key start
LH: loop header
LB: loop body
LE: loop exit
PB: predicated region body
PF: predicated region fallthrough
CT: control target
= control target key end

     0   :  { %14 = vsyncpa [#allocation4], 0  ;;  %s6326_s0 = inlined_call_operand.vmem [shape: f32[128,1], index: 0, kind: input, shape index: {}]   ;;  %s6327_s1 = inlined_call_operand.vmem [shape: f32[1,384], index: 1, kind: input, shape index: {}]   ;;  %s6328_s2 = inlined_call_operand.vmem [shape: f32[1,384], index: 2, kind: input, shape index: {}]   ;;  %s6329_s3 = inlined_call_operand.vmem [shape: bf16[128,128], index: 3, kind: input, shape index: {}]   ;;  %s6330_s4 = inlined_call_operand.vmem [shape: bf16[128,128], index: 4, kind: input, shape index: {}]   ;;  %s6331_s5 = inlined_call_operand.hbm [shape: bf16[128,128], index: 5, kind: input, shape index: {}]   ;;  %s6332_s6 = inlined_call_operand.vmem [shape: f32[1,128], index: 6, kind: input, shape index: {}]   ;;  %s6333_s7 = inlined_call_operand.hbm [shape: bf16[128,128], index: 7, kind: input, shape index: {}]   ;;  %s6334_s8 = inlined_call_operand.vmem [shape: f32[1,128], index: 8, kind: input, shape index: {}]   ;;  %s6335_s9 = inlined_call_operand.hbm [shape: f32[8,128], index: 9, kind: output, shape index: {}]  }
   0x1   :  { %15 = vsyncpa [#allocation7], 0 }
   0x2   :  { %16 = vsyncpa [#allocation5], 0  ;;  %s4794_s30 = smov [#allocation3]   ;;  %s4722_s13 = scalar_lea.hbm %s6331_s5, 1024 }
   0x3   :  { %s32_s10 = sshll.u32 %s4794_s30, 4  ;;  %p4723_p0 = scmp.ne.s32.totalorder %s6331_s5, %s4722_s13  ;;  %s33_s10 = int_to_ptr.vmem [resolvable:$true] %s32_s10 }
   0x4   :  { %p4726_p1 = scmp.lt.u32.totalorder %s4722_s13, %s6331_s5 }
   0x6   :  { %p4728_p2 = pnand %p4726_p1, %p4723_p0 }
   0x8   :  { %4731 = shalt.err (!%p4728_p2)
}
   0x9   :  { %s4732_s18 = scalar_lea.vmem %s33_s10, 1024  ;;  %p4737_p4 = scmp.lt.s32.totalorder %s33_s10, %s33_s10 }
   0xa   :  { %p4733_p3 = scmp.ne.s32.totalorder %s33_s10, %s4732_s18  ;;  %p4738_p5 = scmp.lt.s32.totalorder %s4732_s18, %s4732_s18 }
   0xc   :  { %p4739_p6 = por %p4738_p5, %p4737_p4 }
   0xe   :  { %p4740_p7 = pnand %p4739_p6, %p4733_p3 }
  0x10   :  { %4743 = shalt.err (!%p4740_p7)
}
  0x11   :  { %s4795_s19 = smov 64   ;;  %s4796_s20 = smov 4  }
  0x12   :  { %38 = dma.hbm_to_vmem [thread:$0]  %s6331_s5, 1024, %s33_s10, [#allocation4], %s4795_s19, %s4795_s19, %s4796_s20  }
  0x13   :  { %s4797_s23 = smov [#allocation6]   ;;  %s4744_s27 = scalar_lea.hbm %s6333_s7, 1024 }
  0x14   :  { %s46_s24 = sshll.u32 %s4797_s23, 4  ;;  %p4745_p8 = scmp.ne.s32.totalorder %s6333_s7, %s4744_s27  ;;  %s47_s24 = int_to_ptr.vmem [resolvable:$true] %s46_s24 }
  0x15   :  { %p4748_p9 = scmp.lt.u32.totalorder %s4744_s27, %s6333_s7 }
  0x17   :  { %p4750_p10 = pnand %p4748_p9, %p4745_p8 }
  0x19   :  { %4753 = shalt.err (!%p4750_p10)
}
  0x1a   :  { %s4754_s12 = scalar_lea.vmem %s47_s24, 1024  ;;  %p4759_p12 = scmp.lt.s32.totalorder %s47_s24, %s47_s24 }
  0x1b   :  { %p4755_p11 = scmp.ne.s32.totalorder %s47_s24, %s4754_s12  ;;  %p4760_p13 = scmp.lt.s32.totalorder %s4754_s12, %s4754_s12 }
  0x1d   :  { %p4761_p0 = por %p4760_p13, %p4759_p12 }
  0x1f   :  { %p4762_p1 = pnand %p4761_p0, %p4755_p11 }
  0x21   :  { %4765 = shalt.err (!%p4762_p1)
}
  0x22   :  { %52 = dma.hbm_to_vmem [thread:$0]  %s6333_s7, 1024, %s47_s24, [#allocation7], %s4795_s19, %s4795_s19, %s4796_s20  }
  0x23   :  { %4788 = dma.done.wait [#allocation4], 1024  }
  0x24   :  { %4789 = vsyncadd [#allocation4], 4294966272 }
  0x25   :  { %4790 = dma.done.wait [#allocation7], 1024  }
  0x26   :  { %4791 = vsyncadd [#allocation7], 4294966272  ;;  %v4798_v0 = vmov 0.0   ;;  %vm4799_vm0 = vmmov 0   ;;  %v4800_v1 = vmov 0   ;;  %v4887_v2 = vld [vmem:[%s6329_s3] sm:$0xff]   ;;  %v160_v34 = vlaneseq }
  0x27   :  { %3490 = vmatprep.subr.bf16.mxu0 %v4798_v0  ;;  %3510 = vmatprep.subr.bf16.mxu1 %v4798_v0  ;;  %v4892_v3 = vld [vmem:[%s6329_s3 + $0x8] sm:$0xff]   ;;  %v4898_v4 = vld [vmem:[%s6330_s4] sm:$0xff]   ;;  %v4912_v6 = vld [vmem:[%s6329_s3 + $0x10] sm:$0xff]   ;;  %s4801_s23 = smov [#allocation8]  }
  0x28   :  { %3506 = vmatprep.mubr.msk.bf16.mxu0 %vm4799_vm0, %v4798_v0  ;;  %3526 = vmatprep.mubr.msk.bf16.mxu1 %vm4799_vm0, %v4798_v0  ;;  %v4905_v5 = vld [vmem:[%s6330_s4 + $0x8] sm:$0xff]   ;;  %v4919_v7 = vld [vmem:[%s6330_s4 + $0x10] sm:$0xff]   ;;  %v4926_v8 = vld [vmem:[%s6329_s3 + $0x18] sm:$0xff]   ;;  %v161_v35 = vshrl.u32 %v160_v34, 7  ;;  %s2973_s24 = sshll.u32 %s4801_s23, 4  ;;  %s2974_s24 = int_to_ptr.vmem [resolvable:$true] %s2973_s24 }
  0x29   :  { %4478 = vset.pattern.permute.xlu0 %v4800_v1  ;;  %4479 = vset.pattern.permute.xlu1 %v4800_v1  ;;  %v4933_v9 = vld [vmem:[%s6330_s4 + $0x18] sm:$0xff]   ;;  %v4940_v10 = vld [vmem:[%s6329_s3 + $0x20] sm:$0xff]   ;;  %v4954_v12 = vld [vmem:[%s6329_s3 + $0x28] sm:$0xff]   ;;  %s4766_s25 = scalar_lea.vmem %s2974_s24, 128  ;;  %p4771_p3 = scmp.lt.s32.totalorder %s2974_s24, %s2974_s24 }
  0x2a   :  { %3491 = vmatpush3.bf16.msra.mxu0 %v4887_v2  ;;  %3511 = vmatpush3.bf16.msra.mxu1 %v4898_v4  ;;  %v4947_v11 = vld [vmem:[%s6330_s4 + $0x20] sm:$0xff]   ;;  %v4961_v13 = vld [vmem:[%s6330_s4 + $0x28] sm:$0xff]   ;;  %v4968_v14 = vld [vmem:[%s6329_s3 + $0x30] sm:$0xff]   ;;  %v162_v36 = vsub.s32 0, %v161_v35  ;;  %v166_v43 = vsub.s32 1, %v161_v35  ;;  %v170_v63 = vsub.s32 2, %v161_v35  ;;  %p4767_p2 = scmp.ne.s32.totalorder %s2974_s24, %s4766_s25  ;;  %p4772_p4 = scmp.lt.s32.totalorder %s4766_s25, %s4766_s25 }
  0x2b   :  { %3492 = vmatprep.subr.bf16.mxu0 %v4798_v0  ;;  %3512 = vmatprep.subr.bf16.mxu1 %v4798_v0  ;;  %v4975_v15 = vld [vmem:[%s6330_s4 + $0x30] sm:$0xff]   ;;  %v62_v16 = vld [vmem:[%s6326_s0] sm:$0xff]  ;;  %v4985_v17 = vld [vmem:[%s6329_s3 + $0x38] sm:$0xff]  }
  0x2c   :  { %81 = vperm.xlu0 %4478, %v62_v16   ;;  %v63_v18 = vld [vmem:[%s6326_s0 + $0x8] sm:$0xff]  ;;  %v4994_v19 = vld [vmem:[%s6330_s4 + $0x38] sm:$0xff]   ;;  %v4997_v20 = vld [vmem:[#allocation3] sm:$0xff]   ;;  %p4773_p5 = por %p4772_p4, %p4771_p3 }
  0x2d   :  { %v66_v21 = vld [vmem:[%s6326_s0 + $0x20] sm:$0xff]  ;;  %v5008_v22 = vld [vmem:[#allocation3 + $0x8] sm:$0xff]   ;;  %v68_v23 = vld [vmem:[%s6326_s0 + $0x30] sm:$0xff] }
  0x2e   :  { %3493 = vmatpush3.bf16.msra.mxu0 %v4892_v3  ;;  %3513 = vmatpush3.bf16.msra.mxu1 %v4905_v5  ;;  %v5022_v24 = vld [vmem:[#allocation3 + $0x10] sm:$0xff]   ;;  %v5031_v26 = vld [vmem:[#allocation3 + $0x18] sm:$0xff]   ;;  %v72_v27 = vld [vmem:[%s6326_s0 + $0x50] sm:$0xff]  ;;  %p4774_p6 = pnand %p4773_p5, %p4767_p2 }
  0x2f   :  { %3494 = vmatprep.subr.bf16.mxu0 %v4798_v0  ;;  %3514 = vmatprep.subr.bf16.mxu1 %v4798_v0  ;;  %v70_v25 = vld [vmem:[%s6326_s0 + $0x40] sm:$0xff]  ;;  %v5040_v28 = vld [vmem:[#allocation3 + $0x20] sm:$0xff]   ;;  %v5049_v30 = vld [vmem:[#allocation3 + $0x28] sm:$0xff]  }
  0x30   :  { %86 = vperm.xlu0 %4478, %v63_v18   ;;  %v74_v29 = vld [vmem:[%s6326_s0 + $0x60] sm:$0xff]  ;;  %v76_v31 = vld [vmem:[%s6326_s0 + $0x70] sm:$0xff]  ;;  %v5064_v33 = vld [vmem:[#allocation3 + $0x38] sm:$0xff]  }
  0x31   :  { %v5058_v32 = vld [vmem:[#allocation3 + $0x30] sm:$0xff]  }
  0x32   :  { %3495 = vmatpush3.bf16.msra.mxu0 %v4912_v6  ;;  %3515 = vmatpush3.bf16.msra.mxu1 %v4919_v7  ;;  %v78_v37 = vld [vmem:[%s6327_s1] sm:$0x7] }
  0x33   :  { %3496 = vmatprep.subr.bf16.mxu0 %v4798_v0  ;;  %3516 = vmatprep.subr.bf16.mxu1 %v4798_v0  ;;  %v5096_v38 = vrot.slane %v78_v37, %v162_v36  ;;  %v223_v39 = vld [vmem:[%s6328_s2] sm:$0x7]  ;;  %v5105_v45 = vrot.slane %v78_v37, %v166_v43 }
  0x34   :  { %101 = vperm.xlu0 %4478, %v66_v21   ;;  %v5102_v42 = vrot.slane %v223_v39, %v162_v36  ;;  %v5108_v51 = vrot.slane %v223_v39, %v166_v43  ;;  %v5116_v18 = vld [vmem:[%s6332_s6] ss:$0 sm:$0xff]  ;;  %v5118_v21 = vrot.slane %v223_v39, %v170_v63 }
  0x36   :  { %3497 = vmatpush3.bf16.msra.mxu0 %v4926_v8  ;;  %3517 = vmatpush3.bf16.msra.mxu1 %v4933_v9 }
  0x37   :  { %3498 = vmatprep.subr.bf16.mxu0 %v4798_v0  ;;  %3518 = vmatprep.subr.bf16.mxu1 %v4798_v0 }
  0x38   :  { %111 = vperm.xlu0 %4478, %v68_v23  }
  0x3a   :  { %3499 = vmatpush3.bf16.msra.mxu0 %v4940_v10  ;;  %3519 = vmatpush3.bf16.msra.mxu1 %v4947_v11 }
  0x3b   :  { %3500 = vmatprep.subr.bf16.mxu0 %v4798_v0  ;;  %3520 = vmatprep.subr.bf16.mxu1 %v4798_v0 }
  0x3c   :  { %121 = vperm.xlu0 %4478, %v70_v25  }
  0x3e   :  { %3501 = vmatpush3.bf16.msra.mxu0 %v4954_v12  ;;  %3521 = vmatpush3.bf16.msra.mxu1 %v4961_v13 }
  0x3f   :  { %3502 = vmatprep.subr.bf16.mxu0 %v4798_v0  ;;  %3522 = vmatprep.subr.bf16.mxu1 %v4798_v0 }
  0x40   :  { %131 = vperm.xlu0 %4478, %v72_v27  }
  0x42   :  { %3503 = vmatpush3.bf16.msra.mxu0 %v4968_v14  ;;  %3523 = vmatpush3.bf16.msra.mxu1 %v4975_v15 }
  0x43   :  { %3504 = vmatprep.subr.bf16.mxu0 %v4798_v0  ;;  %3524 = vmatprep.subr.bf16.mxu1 %v4798_v0 }
  0x44   :  { %141 = vperm.xlu0 %4478, %v74_v29  }
  0x46   :  { %3505 = vmatpush3.bf16.msra.mxu0 %v4985_v17  ;;  %3525 = vmatpush3.bf16.msra.mxu1 %v4994_v19 }
  0x47   :  { %3530 = vmatprep.subr.bf16.mxu0 %v4798_v0  ;;  %3550 = vmatprep.subr.bf16.mxu1 %v4798_v0 }
  0x48   :  { %151 = vperm.xlu0 %4478, %v76_v31  }
  0x49   :  { %3507 = vmatmul.mubr.bf16.vlgmr.msra.gmra.mrb[0].mxu0 %v4800_v1  ;;  %3527 = vmatmul.mubr.bf16.vlgmr.msra.gmra.mrb[0].mxu1 %v4800_v1 }
  0x4a   :  { %3531 = vmatpush3.bf16.msra.mxu0 %v4997_v20  ;;  %3546 = vmatprep.mubr.msk.bf16.mxu0 %vm4799_vm0, %v4798_v0 }
  0x4b   :  { %3532 = vmatprep.subr.bf16.mxu0 %v4798_v0  ;;  %3566 = vmatprep.mubr.msk.bf16.mxu1 %vm4799_vm0, %v4798_v0 }
  0x4c   :  { %3551 = vmatpush3.bf16.msra.mxu1 %v4887_v2 }
  0x4d   :  { %3552 = vmatprep.subr.bf16.mxu1 %v4798_v0 }
  0x4e   :  { %3533 = vmatpush3.bf16.msra.mxu0 %v5008_v22 }
  0x4f   :  { %3534 = vmatprep.subr.bf16.mxu0 %v4798_v0 }
  0x50   :  { %3553 = vmatpush3.bf16.msra.mxu1 %v4892_v3 }
  0x51   :  { %3554 = vmatprep.subr.bf16.mxu1 %v4798_v0 }
  0x52   :  { %3535 = vmatpush3.bf16.msra.mxu0 %v5022_v24 }
  0x53   :  { %3536 = vmatprep.subr.bf16.mxu0 %v4798_v0 }
  0x54   :  { %3555 = vmatpush3.bf16.msra.mxu1 %v4912_v6 }
  0x55   :  { %3556 = vmatprep.subr.bf16.mxu1 %v4798_v0 }
  0x56   :  { %3537 = vmatpush3.bf16.msra.mxu0 %v5031_v26 }
  0x57   :  { %3538 = vmatprep.subr.bf16.mxu0 %v4798_v0 }
  0x58   :  { %3557 = vmatpush3.bf16.msra.mxu1 %v4926_v8 }
  0x59   :  { %3558 = vmatprep.subr.bf16.mxu1 %v4798_v0 }
  0x5a   :  { %3539 = vmatpush3.bf16.msra.mxu0 %v5040_v28 }
  0x5b   :  { %3540 = vmatprep.subr.bf16.mxu0 %v4798_v0 }
  0x5c   :  { %3559 = vmatpush3.bf16.msra.mxu1 %v4940_v10 }
  0x5d   :  { %3560 = vmatprep.subr.bf16.mxu1 %v4798_v0 }
  0x5e   :  { %3541 = vmatpush3.bf16.msra.mxu0 %v5049_v30 }
  0x5f   :  { %3542 = vmatprep.subr.bf16.mxu0 %v4798_v0 }
  0x60   :  { %3561 = vmatpush3.bf16.msra.mxu1 %v4954_v12 }
  0x61   :  { %3562 = vmatprep.subr.bf16.mxu1 %v4798_v0 }
  0x62   :  { %3543 = vmatpush3.bf16.msra.mxu0 %v5058_v32 }
  0x63   :  { %3544 = vmatprep.subr.bf16.mxu0 %v4798_v0 }
  0x64   :  { %3563 = vmatpush3.bf16.msra.mxu1 %v4968_v14 }
  0x65   :  { %3564 = vmatprep.subr.bf16.mxu1 %v4798_v0 }
  0x66   :  { %3545 = vmatpush3.bf16.msra.mxu0 %v5064_v33 }
  0x67   :  { %3570 = vmatprep.subr.bf16.mxu0 %v4798_v0 }
  0x68   :  { %3565 = vmatpush3.bf16.msra.mxu1 %v4985_v17 }
  0x69   :  { %3547 = vmatmul.mubr.bf16.vlgmr.msra.gmra.mrb[4].mxu0 %v4800_v1  ;;  %3590 = vmatprep.subr.bf16.mxu1 %v4798_v0  ;;  %v5111_v1 = vrot.slane %v78_v37, %v170_v63 }
  0x6a   :  { %3571 = vmatpush3.bf16.msra.mxu0 %v4898_v4  ;;  %3586 = vmatprep.mubr.msk.bf16.mxu0 %vm4799_vm0, %v4798_v0 }
  0x6b   :  { %3572 = vmatprep.subr.bf16.mxu0 %v4798_v0 }
  0x6e   :  { %3573 = vmatpush3.bf16.msra.mxu0 %v4905_v5 }
  0x6f   :  { %3574 = vmatprep.subr.bf16.mxu0 %v4798_v0 }
  0x72   :  { %3575 = vmatpush3.bf16.msra.mxu0 %v4919_v7 }
  0x73   :  { %3576 = vmatprep.subr.bf16.mxu0 %v4798_v0 }
  0x76   :  { %3577 = vmatpush3.bf16.msra.mxu0 %v4933_v9 }
  0x77   :  { %3578 = vmatprep.subr.bf16.mxu0 %v4798_v0 }
  0x7a   :  { %3579 = vmatpush3.bf16.msra.mxu0 %v4947_v11 }
  0x7b   :  { %3580 = vmatprep.subr.bf16.mxu0 %v4798_v0 }
  0x7e   :  { %3581 = vmatpush3.bf16.msra.mxu0 %v4961_v13 }
  0x7f   :  { %3582 = vmatprep.subr.bf16.mxu0 %v4798_v0 }
  0x82   :  { %3583 = vmatpush3.bf16.msra.mxu0 %v4975_v15 }
  0x83   :  { %3584 = vmatprep.subr.bf16.mxu0 %v4798_v0 }
  0x86   :  { %3585 = vmatpush3.bf16.msra.mxu0 %v4994_v19 }
  0x87   :  { %3610 = vmatprep.subr.bf16.mxu0 %v4798_v0 }
  0xab   :  { %v82_v40 = vpop.permute.xlu0 %81 }
  0xac   :  { %v175_v41 = vmul.f32 %v5096_v38, %v82_v40  ;;  %v176_v49 = vmul.f32 %v5105_v45, %v82_v40  ;;  %v177_v23 = vmul.f32 %v5111_v1, %v82_v40 }
  0xae   :  { %v240_v44 = vadd.f32 %v5102_v42, %v175_v41  ;;  %v241_v58 = vadd.f32 %v5108_v51, %v176_v49  ;;  %v242_v36 = vadd.f32 %v5118_v21, %v177_v23 }
 0x11c   :  { %v444_v46 = vpop.f32.mrb[0].mxu0  ;;  %v564_v52 = vpop.f32.mrb[0].mxu1 }
 0x11d   :  { %v570_v47 = vadd.f32 %v444_v46, %v240_v44  ;;  %v3508_v48 = vpop.f32.mrb[1].mxu0  ;;  %v3528_v55 = vpop.f32.mrb[1].mxu1  ;;  %v668_v59 = vadd.f32 %v564_v52, %v241_v58  ;;  %v65_v52 = vld [vmem:[%s6326_s0 + $0x18] sm:$0xff] }
 0x11e   :  { %v447_v50 = vpop.f32.mrb[2].mxu0  ;;  %v567_v56 = vpop.f32.mrb[2].mxu1  ;;  %v71_v55 = vld [vmem:[%s6326_s0 + $0x48] sm:$0xff]  ;;  %v77_v58 = vld [vmem:[%s6326_s0 + $0x78] sm:$0xff] }
 0x11f   :  { %v3000_v53 = vmul.f32 -1.442695, %v570_v47  ;;  %v3509_v54 = vpop.f32.mrb[3].mxu0  ;;  %v3529_v57 = vpop.f32.mrb[3].mxu1  ;;  %v3009_v60 = vmul.f32 -1.442695, %v668_v59 }
 0x120   :  { %v64_v50 = vld [vmem:[%s6326_s0 + $0x10] sm:$0xff]  ;;  %v69_v54 = vld [vmem:[%s6326_s0 + $0x38] sm:$0xff]  ;;  %v75_v57 = vld [vmem:[%s6326_s0 + $0x68] sm:$0xff]  ;;  %v87_v59 = vpop.permute.xlu0 %86 }
 0x121   :  { %4512 = vpow2.f32 %v3000_v53  ;;  %91 = vperm.xlu1 %4479, %v64_v50   ;;  %v67_v53 = vld [vmem:[%s6326_s0 + $0x28] sm:$0xff]  ;;  %v73_v56 = vld [vmem:[%s6326_s0 + $0x58] sm:$0xff] }
 0x122   :  { %4514 = vpow2.f32 %v3009_v60  ;;  %v178_v60 = vmul.f32 %v5096_v38, %v87_v59 }
 0x125   :  { %96 = vperm.xlu1 %4479, %v65_v52  }
 0x129   :  { %106 = vperm.xlu1 %4479, %v67_v53  }
 0x12b   :  { %v4513_v61 = vpop.eup %4512 }
 0x12c   :  { %v574_v62 = vadd.f32 1.0, %v4513_v61  ;;  %v4515_v16 = vpop.eup %4514  ;;  %v243_v61 = vadd.f32 %v5102_v42, %v178_v60 }
 0x12d   :  { %v672_v25 = vadd.f32 1.0, %v4515_v16  ;;  %116 = vperm.xlu1 %4479, %v69_v54  }
 0x12e   :  { %4516 = vrcp.f32 %v574_v62 }
 0x12f   :  { %4518 = vrcp.f32 %v672_v25 }
 0x131   :  { %126 = vperm.xlu1 %4479, %v71_v55  }
 0x135   :  { %136 = vperm.xlu1 %4479, %v73_v56  }
 0x138   :  { %v4517_v34 = vpop.eup %4516 }
 0x139   :  { %v4519_v44 = vpop.eup %4518  ;;  %146 = vperm.xlu1 %4479, %v75_v57  }
 0x13a   :  { %v675_v46 = vsub.f32 1.0, %v4519_v44  ;;  %v677_v48 = vmul.f32 0.0, %v4519_v44 }
 0x13c   :  { %v659_v27 = vpop.f32.mrb[4].mxu0 }
 0x13d   :  { %v660_v29 = vadd.f32 %v5116_v18, %v659_v27  ;;  %v3548_v31 = vpop.f32.mrb[5].mxu0  ;;  %156 = vperm.xlu1 %4479, %v77_v58  }
 0x13e   :  { %v662_v35 = vpop.f32.mrb[6].mxu0 }
 0x13f   :  { %v665_v37 = vmul.f32 %v4517_v34, %v660_v29  ;;  %v3549_v41 = vpop.f32.mrb[7].mxu0 }
 0x141   :  { %v666_v43 = vadd.f32 %v665_v37, %v242_v36  ;;  %v179_v36 = vmul.f32 %v5105_v45, %v87_v59 }
 0x143   :  { %4520 = vtanh.f32 %v666_v43  ;;  %v244_v37 = vadd.f32 %v5108_v51, %v179_v36 }
 0x14d   :  { %v4521_v39 = vpop.eup %4520 }
 0x14e   :  { %v676_v47 = vmul.f32 %v4521_v39, %v675_v46 }
 0x150   :  { %v5123_v40 = vadd.f32 %v677_v48, %v676_v47  ;;  %v180_v47 = vmul.f32 %v5111_v1, %v87_v59 }
 0x152   :  { %v682_v49 = vpack.c.bf16 %v5123_v40, %v5123_v40  ;;  %v245_v55 = vadd.f32 %v5118_v21, %v180_v47 }
 0x154   :  { %3567 = vmatmul.mubr.bf16.vlgmr.msra.gmra.mrb[4].mxu1 %v682_v49  ;;  %3587 = vmatmul.mubr.bf16.vlgmr.msra.gmra.mrb[8].mxu0 %v682_v49 }
 0x155   :  { %3591 = vmatpush3.bf16.msra.mxu1 %v4997_v20  ;;  %3606 = vmatprep.mubr.msk.bf16.mxu1 %vm4799_vm0, %v4798_v0 }
 0x156   :  { %3592 = vmatprep.subr.bf16.mxu1 %v4798_v0  ;;  %3611 = vmatpush3.bf16.msra.mxu0 %v4887_v2 }
 0x157   :  { %3612 = vmatprep.subr.bf16.mxu0 %v4798_v0  ;;  %3626 = vmatprep.mubr.msk.bf16.mxu0 %vm4799_vm0, %v4798_v0 }
 0x159   :  { %3593 = vmatpush3.bf16.msra.mxu1 %v5008_v22 }
 0x15a   :  { %3594 = vmatprep.subr.bf16.mxu1 %v4798_v0  ;;  %3613 = vmatpush3.bf16.msra.mxu0 %v4892_v3 }
 0x15b   :  { %3614 = vmatprep.subr.bf16.mxu0 %v4798_v0 }
 0x15d   :  { %3595 = vmatpush3.bf16.msra.mxu1 %v5022_v24 }
 0x15e   :  { %3596 = vmatprep.subr.bf16.mxu1 %v4798_v0  ;;  %3615 = vmatpush3.bf16.msra.mxu0 %v4912_v6 }
 0x15f   :  { %3616 = vmatprep.subr.bf16.mxu0 %v4798_v0 }
 0x161   :  { %3597 = vmatpush3.bf16.msra.mxu1 %v5031_v26 }
 0x162   :  { %3598 = vmatprep.subr.bf16.mxu1 %v4798_v0  ;;  %3617 = vmatpush3.bf16.msra.mxu0 %v4926_v8 }
 0x163   :  { %3618 = vmatprep.subr.bf16.mxu0 %v4798_v0 }
 0x165   :  { %3599 = vmatpush3.bf16.msra.mxu1 %v5040_v28 }
 0x166   :  { %3600 = vmatprep.subr.bf16.mxu1 %v4798_v0  ;;  %3619 = vmatpush3.bf16.msra.mxu0 %v4940_v10 }
 0x167   :  { %3620 = vmatprep.subr.bf16.mxu0 %v4798_v0 }
 0x169   :  { %3601 = vmatpush3.bf16.msra.mxu1 %v5049_v30 }
 0x16a   :  { %3602 = vmatprep.subr.bf16.mxu1 %v4798_v0  ;;  %3621 = vmatpush3.bf16.msra.mxu0 %v4954_v12 }
 0x16b   :  { %3622 = vmatprep.subr.bf16.mxu0 %v4798_v0 }
 0x16d   :  { %3603 = vmatpush3.bf16.msra.mxu1 %v5058_v32 }
 0x16e   :  { %3604 = vmatprep.subr.bf16.mxu1 %v4798_v0  ;;  %3623 = vmatpush3.bf16.msra.mxu0 %v4968_v14 }
 0x16f   :  { %3624 = vmatprep.subr.bf16.mxu0 %v4798_v0 }
 0x171   :  { %3605 = vmatpush3.bf16.msra.mxu1 %v5064_v33 }
 0x172   :  { %3630 = vmatprep.subr.bf16.mxu1 %v4798_v0  ;;  %3625 = vmatpush3.bf16.msra.mxu0 %v4985_v17 }
 0x173   :  { %3650 = vmatprep.subr.bf16.mxu0 %v4798_v0 }
 0x174   :  { %3607 = vmatmul.mubr.bf16.vlgmr.msra.gmra.mrb[8].mxu1 %v682_v49 }
 0x175   :  { %3631 = vmatpush3.bf16.msra.mxu1 %v4898_v4  ;;  %3646 = vmatprep.mubr.msk.bf16.mxu1 %vm4799_vm0, %v4798_v0 }
 0x176   :  { %3632 = vmatprep.subr.bf16.mxu1 %v4798_v0 }
 0x179   :  { %3633 = vmatpush3.bf16.msra.mxu1 %v4905_v5 }
 0x17a   :  { %3634 = vmatprep.subr.bf16.mxu1 %v4798_v0 }
 0x17d   :  { %3635 = vmatpush3.bf16.msra.mxu1 %v4919_v7 }
 0x17e   :  { %3636 = vmatprep.subr.bf16.mxu1 %v4798_v0 }
 0x181   :  { %3637 = vmatpush3.bf16.msra.mxu1 %v4933_v9 }
 0x182   :  { %3638 = vmatprep.subr.bf16.mxu1 %v4798_v0 }
 0x185   :  { %3639 = vmatpush3.bf16.msra.mxu1 %v4947_v11 }
 0x186   :  { %3640 = vmatprep.subr.bf16.mxu1 %v4798_v0 }
 0x189   :  { %3641 = vmatpush3.bf16.msra.mxu1 %v4961_v13 }
 0x18a   :  { %3642 = vmatprep.subr.bf16.mxu1 %v4798_v0 }
 0x18d   :  { %3643 = vmatpush3.bf16.msra.mxu1 %v4975_v15 }
 0x18e   :  { %3644 = vmatprep.subr.bf16.mxu1 %v4798_v0 }
 0x191   :  { %3645 = vmatpush3.bf16.msra.mxu1 %v4994_v19 }
 0x192   :  { %3670 = vmatprep.subr.bf16.mxu1 %v4798_v0 }
 0x227   :  { %v717_v62 = vpop.f32.mrb[4].mxu1  ;;  %v757_v63 = vpop.f32.mrb[8].mxu0 }
 0x228   :  { %v763_v16 = vadd.f32 %v717_v62, %v243_v61  ;;  %v3568_v23 = vpop.f32.mrb[5].mxu1  ;;  %v3588_v25 = vpop.f32.mrb[9].mxu0  ;;  %v813_v41 = vadd.f32 %v757_v63, %v244_v37 }
 0x229   :  { %v720_v27 = vpop.f32.mrb[6].mxu1  ;;  %v760_v29 = vpop.f32.mrb[10].mxu0 }
 0x22a   :  { %v3010_v31 = vmul.f32 -1.442695, %v763_v16  ;;  %v3569_v34 = vpop.f32.mrb[7].mxu1  ;;  %v3589_v35 = vpop.f32.mrb[11].mxu0  ;;  %v3011_v43 = vmul.f32 -1.442695, %v813_v41 }
 0x22c   :  { %4522 = vpow2.f32 %v3010_v31 }
 0x22d   :  { %4524 = vpow2.f32 %v3011_v43 }
 0x236   :  { %v4523_v44 = vpop.eup %4522 }
 0x237   :  { %v767_v46 = vadd.f32 1.0, %v4523_v44  ;;  %v4525_v39 = vpop.eup %4524 }
 0x238   :  { %v817_v48 = vadd.f32 1.0, %v4525_v39 }
 0x239   :  { %4526 = vrcp.f32 %v767_v46 }
 0x23a   :  { %4528 = vrcp.f32 %v817_v48 }
 0x243   :  { %v4527_v53 = vpop.eup %4526 }
 0x244   :  { %v4529_v60 = vpop.eup %4528 }
 0x245   :  { %v820_v61 = vsub.f32 1.0, %v4529_v60  ;;  %v822_v59 = vmul.f32 %v4529_v60, %v5123_v40  ;;  %v92_v40 = vpop.permute.xlu1 %91 }
 0x246   :  { %v181_v25 = vmul.f32 %v5096_v38, %v92_v40  ;;  %v182_v37 = vmul.f32 %v5105_v45, %v92_v40 }
 0x247   :  { %v804_v49 = vpop.f32.mrb[8].mxu1 }
 0x248   :  { %v805_v50 = vadd.f32 %v5116_v18, %v804_v49  ;;  %v3608_v52 = vpop.f32.mrb[9].mxu1  ;;  %v246_v27 = vadd.f32 %v5102_v42, %v181_v25  ;;  %v247_v47 = vadd.f32 %v5108_v51, %v182_v37 }
 0x249   :  { %v807_v54 = vpop.f32.mrb[10].mxu1 }
 0x24a   :  { %v810_v56 = vmul.f32 %v4527_v53, %v805_v50  ;;  %v3609_v57 = vpop.f32.mrb[11].mxu1  ;;  %v183_v54 = vmul.f32 %v5111_v1, %v92_v40 }
 0x24c   :  { %v811_v58 = vadd.f32 %v810_v56, %v245_v55 }
 0x24e   :  { %4530 = vtanh.f32 %v811_v58 }
 0x258   :  { %v4531_v62 = vpop.eup %4530 }
 0x259   :  { %v821_v63 = vmul.f32 %v4531_v62, %v820_v61  ;;  %v248_v62 = vadd.f32 %v5118_v21, %v183_v54 }
 0x25b   :  { %v5213_v16 = vadd.f32 %v822_v59, %v821_v63 }
 0x25d   :  { %v827_v23 = vpack.c.bf16 %v5213_v16, %v5213_v16 }
 0x25f   :  { %3627 = vmatmul.mubr.bf16.vlgmr.msra.gmra.mrb[12].mxu0 %v827_v23  ;;  %3647 = vmatmul.mubr.bf16.vlgmr.msra.gmra.mrb[12].mxu1 %v827_v23 }
 0x260   :  { %3651 = vmatpush3.bf16.msra.mxu0 %v4997_v20  ;;  %3666 = vmatprep.mubr.msk.bf16.mxu0 %vm4799_vm0, %v4798_v0 }
 0x261   :  { %3652 = vmatprep.subr.bf16.mxu0 %v4798_v0  ;;  %3671 = vmatpush3.bf16.msra.mxu1 %v4887_v2 }
 0x262   :  { %3672 = vmatprep.subr.bf16.mxu1 %v4798_v0  ;;  %3686 = vmatprep.mubr.msk.bf16.mxu1 %vm4799_vm0, %v4798_v0 }
 0x264   :  { %3653 = vmatpush3.bf16.msra.mxu0 %v5008_v22 }
 0x265   :  { %3654 = vmatprep.subr.bf16.mxu0 %v4798_v0  ;;  %3673 = vmatpush3.bf16.msra.mxu1 %v4892_v3 }
 0x266   :  { %3674 = vmatprep.subr.bf16.mxu1 %v4798_v0 }
 0x268   :  { %3655 = vmatpush3.bf16.msra.mxu0 %v5022_v24 }
 0x269   :  { %3656 = vmatprep.subr.bf16.mxu0 %v4798_v0  ;;  %3675 = vmatpush3.bf16.msra.mxu1 %v4912_v6 }
 0x26a   :  { %3676 = vmatprep.subr.bf16.mxu1 %v4798_v0 }
 0x26c   :  { %3657 = vmatpush3.bf16.msra.mxu0 %v5031_v26 }
 0x26d   :  { %3658 = vmatprep.subr.bf16.mxu0 %v4798_v0  ;;  %3677 = vmatpush3.bf16.msra.mxu1 %v4926_v8 }
 0x26e   :  { %3678 = vmatprep.subr.bf16.mxu1 %v4798_v0 }
 0x270   :  { %3659 = vmatpush3.bf16.msra.mxu0 %v5040_v28 }
 0x271   :  { %3660 = vmatprep.subr.bf16.mxu0 %v4798_v0  ;;  %3679 = vmatpush3.bf16.msra.mxu1 %v4940_v10 }
 0x272   :  { %3680 = vmatprep.subr.bf16.mxu1 %v4798_v0 }
 0x274   :  { %3661 = vmatpush3.bf16.msra.mxu0 %v5049_v30 }
 0x275   :  { %3662 = vmatprep.subr.bf16.mxu0 %v4798_v0  ;;  %3681 = vmatpush3.bf16.msra.mxu1 %v4954_v12 }
 0x276   :  { %3682 = vmatprep.subr.bf16.mxu1 %v4798_v0 }
 0x278   :  { %3663 = vmatpush3.bf16.msra.mxu0 %v5058_v32 }
 0x279   :  { %3664 = vmatprep.subr.bf16.mxu0 %v4798_v0  ;;  %3683 = vmatpush3.bf16.msra.mxu1 %v4968_v14 }
 0x27a   :  { %3684 = vmatprep.subr.bf16.mxu1 %v4798_v0 }
 0x27c   :  { %3665 = vmatpush3.bf16.msra.mxu0 %v5064_v33 }
 0x27d   :  { %3690 = vmatprep.subr.bf16.mxu0 %v4798_v0  ;;  %3685 = vmatpush3.bf16.msra.mxu1 %v4985_v17 }
 0x27e   :  { %3710 = vmatprep.subr.bf16.mxu1 %v4798_v0 }
 0x27f   :  { %3667 = vmatmul.mubr.bf16.vlgmr.msra.gmra.mrb[16].mxu0 %v827_v23 }
 0x280   :  { %3691 = vmatpush3.bf16.msra.mxu0 %v4898_v4  ;;  %3706 = vmatprep.mubr.msk.bf16.mxu0 %vm4799_vm0, %v4798_v0 }
 0x281   :  { %3692 = vmatprep.subr.bf16.mxu0 %v4798_v0 }
 0x284   :  { %3693 = vmatpush3.bf16.msra.mxu0 %v4905_v5 }
 0x285   :  { %3694 = vmatprep.subr.bf16.mxu0 %v4798_v0 }
 0x288   :  { %3695 = vmatpush3.bf16.msra.mxu0 %v4919_v7 }
 0x289   :  { %3696 = vmatprep.subr.bf16.mxu0 %v4798_v0 }
 0x28c   :  { %3697 = vmatpush3.bf16.msra.mxu0 %v4933_v9 }
 0x28d   :  { %3698 = vmatprep.subr.bf16.mxu0 %v4798_v0 }
 0x290   :  { %3699 = vmatpush3.bf16.msra.mxu0 %v4947_v11 }
 0x291   :  { %3700 = vmatprep.subr.bf16.mxu0 %v4798_v0 }
 0x294   :  { %3701 = vmatpush3.bf16.msra.mxu0 %v4961_v13 }
 0x295   :  { %3702 = vmatprep.subr.bf16.mxu0 %v4798_v0 }
 0x298   :  { %3703 = vmatpush3.bf16.msra.mxu0 %v4975_v15 }
 0x299   :  { %3704 = vmatprep.subr.bf16.mxu0 %v4798_v0 }
 0x29c   :  { %3705 = vmatpush3.bf16.msra.mxu0 %v4994_v19 }
 0x29d   :  { %3730 = vmatprep.subr.bf16.mxu0 %v4798_v0 }
 0x332   :  { %v862_v29 = vpop.f32.mrb[12].mxu0  ;;  %v902_v31 = vpop.f32.mrb[12].mxu1 }
 0x333   :  { %v908_v34 = vadd.f32 %v862_v29, %v246_v27  ;;  %v3628_v35 = vpop.f32.mrb[13].mxu0  ;;  %v3648_v36 = vpop.f32.mrb[13].mxu1  ;;  %v958_v48 = vadd.f32 %v902_v31, %v247_v47 }
 0x334   :  { %v865_v41 = vpop.f32.mrb[14].mxu0  ;;  %v905_v43 = vpop.f32.mrb[14].mxu1 }
 0x335   :  { %v3012_v44 = vmul.f32 -1.442695, %v908_v34  ;;  %v3629_v46 = vpop.f32.mrb[15].mxu0  ;;  %v3649_v39 = vpop.f32.mrb[15].mxu1  ;;  %v3013_v49 = vmul.f32 -1.442695, %v958_v48 }
 0x337   :  { %4532 = vpow2.f32 %v3012_v44 }
 0x338   :  { %4534 = vpow2.f32 %v3013_v49 }
 0x341   :  { %v4533_v50 = vpop.eup %4532 }
 0x342   :  { %v912_v52 = vadd.f32 1.0, %v4533_v50  ;;  %v4535_v53 = vpop.eup %4534 }
 0x343   :  { %v962_v55 = vadd.f32 1.0, %v4535_v53 }
 0x344   :  { %4536 = vrcp.f32 %v912_v52 }
 0x345   :  { %4538 = vrcp.f32 %v962_v55 }
 0x34e   :  { %v4537_v60 = vpop.eup %4536 }
 0x34f   :  { %v4539_v25 = vpop.eup %4538 }
 0x350   :  { %v965_v27 = vsub.f32 1.0, %v4539_v25  ;;  %v967_v40 = vmul.f32 %v4539_v25, %v5213_v16  ;;  %v5376_v25 = vld [vmem:[%s6329_s3 + $0x10] sm:$0xff]  }
 0x352   :  { %v949_v56 = vpop.f32.mrb[16].mxu0 }
 0x353   :  { %v950_v57 = vadd.f32 %v5116_v18, %v949_v56  ;;  %v3668_v58 = vpop.f32.mrb[17].mxu0 }
 0x354   :  { %v952_v61 = vpop.f32.mrb[18].mxu0 }
 0x355   :  { %v955_v63 = vmul.f32 %v4537_v60, %v950_v57  ;;  %v3669_v59 = vpop.f32.mrb[19].mxu0 }
 0x357   :  { %v956_v23 = vadd.f32 %v955_v63, %v248_v62 }
 0x359   :  { %4540 = vtanh.f32 %v956_v23  ;;  %v5356_v23 = vld [vmem:[%s6329_s3] sm:$0xff]  }
 0x363   :  { %v4541_v29 = vpop.eup %4540 }
 0x364   :  { %v966_v31 = vmul.f32 %v4541_v29, %v965_v27  ;;  %v5462_v27 = vld [vmem:[%s6330_s4 + $0x30] sm:$0xff]   ;;  %v5469_v29 = vld [vmem:[%s6330_s4 + $0x38] sm:$0xff]  }
 0x366   :  { %v5279_v34 = vadd.f32 %v967_v40, %v966_v31  ;;  %v102_v31 = vpop.permute.xlu0 %101 }
 0x367   :  { %v187_v40 = vmul.f32 %v5096_v38, %v102_v31 }
 0x368   :  { %v972_v35 = vpack.c.bf16 %v5279_v34, %v5279_v34 }
 0x36a   :  { %3687 = vmatmul.mubr.bf16.vlgmr.msra.gmra.mrb[16].mxu1 %v972_v35  ;;  %3707 = vmatmul.mubr.bf16.vlgmr.msra.gmra.mrb[20].mxu0 %v972_v35 }
 0x36b   :  { %3711 = vmatpush3.bf16.msra.mxu1 %v4997_v20  ;;  %3726 = vmatprep.mubr.msk.bf16.mxu1 %vm4799_vm0, %v4798_v0 }
 0x36c   :  { %3712 = vmatprep.subr.bf16.mxu1 %v4798_v0  ;;  %3731 = vmatpush3.bf16.msra.mxu0 %v4887_v2  ;;  %v97_v2 = vpop.permute.xlu1 %96 }
 0x36d   :  { %3732 = vmatprep.subr.bf16.mxu0 %v4798_v0  ;;  %3746 = vmatprep.mubr.msk.bf16.mxu0 %vm4799_vm0, %v4798_v0  ;;  %v185_v16 = vmul.f32 %v5105_v45, %v97_v2  ;;  %v186_v46 = vmul.f32 %v5111_v1, %v97_v2 }
 0x36f   :  { %3713 = vmatpush3.bf16.msra.mxu1 %v5008_v22  ;;  %v251_v53 = vadd.f32 %v5118_v21, %v186_v46 }
 0x370   :  { %3714 = vmatprep.subr.bf16.mxu1 %v4798_v0  ;;  %3733 = vmatpush3.bf16.msra.mxu0 %v4892_v3  ;;  %v184_v3 = vmul.f32 %v5096_v38, %v97_v2 }
 0x371   :  { %3734 = vmatprep.subr.bf16.mxu0 %v4798_v0 }
 0x373   :  { %3715 = vmatpush3.bf16.msra.mxu1 %v5022_v24 }
 0x374   :  { %3716 = vmatprep.subr.bf16.mxu1 %v4798_v0  ;;  %3735 = vmatpush3.bf16.msra.mxu0 %v4912_v6 }
 0x375   :  { %3736 = vmatprep.subr.bf16.mxu0 %v4798_v0 }
 0x377   :  { %3717 = vmatpush3.bf16.msra.mxu1 %v5031_v26 }
 0x378   :  { %3718 = vmatprep.subr.bf16.mxu1 %v4798_v0  ;;  %3737 = vmatpush3.bf16.msra.mxu0 %v4926_v8 }
 0x379   :  { %3738 = vmatprep.subr.bf16.mxu0 %v4798_v0 }
 0x37b   :  { %3719 = vmatpush3.bf16.msra.mxu1 %v5040_v28 }
 0x37c   :  { %3720 = vmatprep.subr.bf16.mxu1 %v4798_v0  ;;  %3739 = vmatpush3.bf16.msra.mxu0 %v4940_v10 }
 0x37d   :  { %3740 = vmatprep.subr.bf16.mxu0 %v4798_v0 }
 0x37f   :  { %3721 = vmatpush3.bf16.msra.mxu1 %v5049_v30 }
 0x380   :  { %3722 = vmatprep.subr.bf16.mxu1 %v4798_v0  ;;  %3741 = vmatpush3.bf16.msra.mxu0 %v4954_v12 }
 0x381   :  { %3742 = vmatprep.subr.bf16.mxu0 %v4798_v0 }
 0x383   :  { %3723 = vmatpush3.bf16.msra.mxu1 %v5058_v32 }
 0x384   :  { %3724 = vmatprep.subr.bf16.mxu1 %v4798_v0  ;;  %3743 = vmatpush3.bf16.msra.mxu0 %v4968_v14 }
 0x385   :  { %3744 = vmatprep.subr.bf16.mxu0 %v4798_v0 }
 0x387   :  { %3725 = vmatpush3.bf16.msra.mxu1 %v5064_v33 }
 0x388   :  { %3750 = vmatprep.subr.bf16.mxu1 %v4798_v0  ;;  %3745 = vmatpush3.bf16.msra.mxu0 %v4985_v17 }
 0x389   :  { %3770 = vmatprep.subr.bf16.mxu0 %v4798_v0 }
 0x38a   :  { %3727 = vmatmul.mubr.bf16.vlgmr.msra.gmra.mrb[20].mxu1 %v972_v35 }
 0x38b   :  { %3751 = vmatpush3.bf16.msra.mxu1 %v4898_v4  ;;  %3766 = vmatprep.mubr.msk.bf16.mxu1 %vm4799_vm0, %v4798_v0  ;;  %v249_v4 = vadd.f32 %v5102_v42, %v184_v3 }
 0x38c   :  { %3752 = vmatprep.subr.bf16.mxu1 %v4798_v0 }
 0x38f   :  { %3753 = vmatpush3.bf16.msra.mxu1 %v4905_v5 }
 0x390   :  { %3754 = vmatprep.subr.bf16.mxu1 %v4798_v0 }
 0x393   :  { %3755 = vmatpush3.bf16.msra.mxu1 %v4919_v7 }
 0x394   :  { %3756 = vmatprep.subr.bf16.mxu1 %v4798_v0 }
 0x397   :  { %3757 = vmatpush3.bf16.msra.mxu1 %v4933_v9 }
 0x398   :  { %3758 = vmatprep.subr.bf16.mxu1 %v4798_v0 }
 0x39b   :  { %3759 = vmatpush3.bf16.msra.mxu1 %v4947_v11 }
 0x39c   :  { %3760 = vmatprep.subr.bf16.mxu1 %v4798_v0 }
 0x39f   :  { %3761 = vmatpush3.bf16.msra.mxu1 %v4961_v13 }
 0x3a0   :  { %3762 = vmatprep.subr.bf16.mxu1 %v4798_v0 }
 0x3a3   :  { %3763 = vmatpush3.bf16.msra.mxu1 %v4975_v15 }
 0x3a4   :  { %3764 = vmatprep.subr.bf16.mxu1 %v4798_v0 }
 0x3a7   :  { %3765 = vmatpush3.bf16.msra.mxu1 %v4994_v19  ;;  %v250_v19 = vadd.f32 %v5108_v51, %v185_v16 }
 0x3a8   :  { %3790 = vmatprep.subr.bf16.mxu1 %v4798_v0 }
 0x43d   :  { %v1007_v5 = vpop.f32.mrb[16].mxu1  ;;  %v1047_v6 = vpop.f32.mrb[20].mxu0 }
 0x43e   :  { %v1053_v7 = vadd.f32 %v1007_v5, %v249_v4  ;;  %v3688_v8 = vpop.f32.mrb[17].mxu1  ;;  %v3708_v9 = vpop.f32.mrb[21].mxu0  ;;  %v1103_v36 = vadd.f32 %v1047_v6, %v250_v19 }
 0x43f   :  { %v1010_v10 = vpop.f32.mrb[18].mxu1  ;;  %v1050_v11 = vpop.f32.mrb[22].mxu0 }
 0x440   :  { %v3014_v12 = vmul.f32 -1.442695, %v1053_v7  ;;  %v3689_v13 = vpop.f32.mrb[19].mxu1  ;;  %v3709_v15 = vpop.f32.mrb[23].mxu0  ;;  %v3015_v37 = vmul.f32 -1.442695, %v1103_v36  ;;  %v188_v11 = vmul.f32 %v5105_v45, %v102_v31 }
 0x442   :  { %4542 = vpow2.f32 %v3014_v12  ;;  %v253_v12 = vadd.f32 %v5108_v51, %v188_v11 }
 0x443   :  { %4544 = vpow2.f32 %v3015_v37  ;;  %v189_v37 = vmul.f32 %v5111_v1, %v102_v31  ;;  %v5513_v31 = vld [vmem:[#allocation3 + $0x20] sm:$0xff]  }
 0x44c   :  { %v4543_v41 = vpop.eup %4542 }
 0x44d   :  { %v1057_v43 = vadd.f32 1.0, %v4543_v41  ;;  %v4545_v44 = vpop.eup %4544 }
 0x44e   :  { %v1107_v39 = vadd.f32 1.0, %v4545_v44 }
 0x44f   :  { %4546 = vrcp.f32 %v1057_v43 }
 0x450   :  { %4548 = vrcp.f32 %v1107_v39 }
 0x459   :  { %v4547_v50 = vpop.eup %4546 }
 0x45a   :  { %v4549_v57 = vpop.eup %4548 }
 0x45b   :  { %v1110_v58 = vsub.f32 1.0, %v4549_v57  ;;  %v1112_v62 = vmul.f32 %v4549_v57, %v5279_v34  ;;  %v252_v34 = vadd.f32 %v5102_v42, %v187_v40  ;;  %v5519_v40 = vld [vmem:[#allocation3 + $0x28] sm:$0xff]  }
 0x45d   :  { %v1094_v47 = vpop.f32.mrb[20].mxu1 }
 0x45e   :  { %v1095_v48 = vadd.f32 %v5116_v18, %v1094_v47  ;;  %v3728_v49 = vpop.f32.mrb[21].mxu1 }
 0x45f   :  { %v1097_v52 = vpop.f32.mrb[22].mxu1 }
 0x460   :  { %v1100_v54 = vmul.f32 %v4547_v50, %v1095_v48  ;;  %v3729_v55 = vpop.f32.mrb[23].mxu1  ;;  %v254_v48 = vadd.f32 %v5118_v21, %v189_v37 }
 0x462   :  { %v1101_v56 = vadd.f32 %v1100_v54, %v251_v53 }
 0x464   :  { %4550 = vtanh.f32 %v1101_v56 }
 0x46e   :  { %v4551_v60 = vpop.eup %4550 }
 0x46f   :  { %v1111_v61 = vmul.f32 %v4551_v60, %v1110_v58 }
 0x471   :  { %v5345_v63 = vadd.f32 %v1112_v62, %v1111_v61  ;;  %v5485_v61 = vld [vmem:[#allocation3] sm:$0xff]   ;;  %v5495_v62 = vld [vmem:[#allocation3 + $0x8] sm:$0xff]  }
 0x473   :  { %v1117_v59 = vpack.c.bf16 %v5345_v63, %v5345_v63 }
 0x475   :  { %3747 = vmatmul.mubr.bf16.vlgmr.msra.gmra.mrb[24].mxu0 %v1117_v59  ;;  %3767 = vmatmul.mubr.bf16.vlgmr.msra.gmra.mrb[24].mxu1 %v1117_v59 }
 0x476   :  { %3771 = vmatpush3.bf16.msra.mxu0 %v4997_v20  ;;  %3786 = vmatprep.mubr.msk.bf16.mxu0 %vm4799_vm0, %v4798_v0  ;;  %v5367_v20 = vld [vmem:[%s6329_s3 + $0x8] sm:$0xff]  }
 0x477   :  { %3772 = vmatprep.subr.bf16.mxu0 %v4798_v0  ;;  %3791 = vmatpush3.bf16.msra.mxu1 %v5356_v23 }
 0x478   :  { %3792 = vmatprep.subr.bf16.mxu1 %v4798_v0  ;;  %3806 = vmatprep.mubr.msk.bf16.mxu1 %vm4799_vm0, %v4798_v0 }
 0x47a   :  { %3773 = vmatpush3.bf16.msra.mxu0 %v5008_v22  ;;  %v5385_v22 = vld [vmem:[%s6329_s3 + $0x18] sm:$0xff]  }
 0x47b   :  { %3774 = vmatprep.subr.bf16.mxu0 %v4798_v0  ;;  %3793 = vmatpush3.bf16.msra.mxu1 %v5367_v20 }
 0x47c   :  { %3794 = vmatprep.subr.bf16.mxu1 %v4798_v0 }
 0x47e   :  { %3775 = vmatpush3.bf16.msra.mxu0 %v5022_v24  ;;  %v5394_v24 = vld [vmem:[%s6329_s3 + $0x20] sm:$0xff]  }
 0x47f   :  { %3776 = vmatprep.subr.bf16.mxu0 %v4798_v0  ;;  %3795 = vmatpush3.bf16.msra.mxu1 %v5376_v25 }
 0x480   :  { %3796 = vmatprep.subr.bf16.mxu1 %v4798_v0 }
 0x482   :  { %3777 = vmatpush3.bf16.msra.mxu0 %v5031_v26  ;;  %v5403_v26 = vld [vmem:[%s6329_s3 + $0x28] sm:$0xff]  }
 0x483   :  { %3778 = vmatprep.subr.bf16.mxu0 %v4798_v0  ;;  %3797 = vmatpush3.bf16.msra.mxu1 %v5385_v22 }
 0x484   :  { %3798 = vmatprep.subr.bf16.mxu1 %v4798_v0 }
 0x486   :  { %3779 = vmatpush3.bf16.msra.mxu0 %v5040_v28  ;;  %v5418_v28 = vld [vmem:[%s6330_s4] sm:$0xff]  }
 0x487   :  { %3780 = vmatprep.subr.bf16.mxu0 %v4798_v0  ;;  %3799 = vmatpush3.bf16.msra.mxu1 %v5394_v24 }
 0x488   :  { %3800 = vmatprep.subr.bf16.mxu1 %v4798_v0 }
 0x48a   :  { %3781 = vmatpush3.bf16.msra.mxu0 %v5049_v30  ;;  %v5441_v30 = vld [vmem:[%s6330_s4 + $0x18] sm:$0xff]  }
 0x48b   :  { %3782 = vmatprep.subr.bf16.mxu0 %v4798_v0  ;;  %3801 = vmatpush3.bf16.msra.mxu1 %v5403_v26 }
 0x48c   :  { %3802 = vmatprep.subr.bf16.mxu1 %v4798_v0 }
 0x48e   :  { %3783 = vmatpush3.bf16.msra.mxu0 %v5058_v32  ;;  %v5448_v32 = vld [vmem:[%s6330_s4 + $0x20] sm:$0xff]  }
 0x48f   :  { %3784 = vmatprep.subr.bf16.mxu0 %v4798_v0  ;;  %3803 = vmatpush3.bf16.msra.mxu1 %v4968_v14  ;;  %v5427_v14 = vld [vmem:[%s6330_s4 + $0x8] sm:$0xff]  }
 0x490   :  { %3804 = vmatprep.subr.bf16.mxu1 %v4798_v0 }
 0x492   :  { %3785 = vmatpush3.bf16.msra.mxu0 %v5064_v33  ;;  %v5455_v33 = vld [vmem:[%s6330_s4 + $0x28] sm:$0xff]  }
 0x493   :  { %3810 = vmatprep.subr.bf16.mxu0 %v4798_v0  ;;  %3805 = vmatpush3.bf16.msra.mxu1 %v4985_v17  ;;  %v5434_v17 = vld [vmem:[%s6330_s4 + $0x10] sm:$0xff]  }
 0x494   :  { %3830 = vmatprep.subr.bf16.mxu1 %v4798_v0 }
 0x495   :  { %3787 = vmatmul.mubr.bf16.vlgmr.msra.gmra.mrb[28].mxu0 %v1117_v59  ;;  %v5507_v59 = vld [vmem:[#allocation3 + $0x18] sm:$0xff]  }
 0x496   :  { %3811 = vmatpush3.bf16.msra.mxu0 %v5418_v28  ;;  %3826 = vmatprep.mubr.msk.bf16.mxu0 %vm4799_vm0, %v4798_v0 }
 0x497   :  { %3812 = vmatprep.subr.bf16.mxu0 %v4798_v0 }
 0x49a   :  { %3813 = vmatpush3.bf16.msra.mxu0 %v5427_v14 }
 0x49b   :  { %3814 = vmatprep.subr.bf16.mxu0 %v4798_v0 }
 0x49e   :  { %3815 = vmatpush3.bf16.msra.mxu0 %v5434_v17 }
 0x49f   :  { %3816 = vmatprep.subr.bf16.mxu0 %v4798_v0 }
 0x4a2   :  { %3817 = vmatpush3.bf16.msra.mxu0 %v5441_v30 }
 0x4a3   :  { %3818 = vmatprep.subr.bf16.mxu0 %v4798_v0 }
 0x4a6   :  { %3819 = vmatpush3.bf16.msra.mxu0 %v5448_v32 }
 0x4a7   :  { %3820 = vmatprep.subr.bf16.mxu0 %v4798_v0 }
 0x4aa   :  { %3821 = vmatpush3.bf16.msra.mxu0 %v5455_v33 }
 0x4ab   :  { %3822 = vmatprep.subr.bf16.mxu0 %v4798_v0 }
 0x4ae   :  { %3823 = vmatpush3.bf16.msra.mxu0 %v5462_v27 }
 0x4af   :  { %3824 = vmatprep.subr.bf16.mxu0 %v4798_v0 }
 0x4b2   :  { %3825 = vmatpush3.bf16.msra.mxu0 %v5469_v29 }
 0x4b3   :  { %3850 = vmatprep.subr.bf16.mxu0 %v4798_v0 }
 0x548   :  { %v1152_v35 = vpop.f32.mrb[24].mxu0  ;;  %v1192_v2 = vpop.f32.mrb[24].mxu1 }
 0x549   :  { %v1198_v3 = vadd.f32 %v1152_v35, %v252_v34  ;;  %v3748_v4 = vpop.f32.mrb[25].mxu0  ;;  %v3768_v5 = vpop.f32.mrb[25].mxu1  ;;  %v1248_v13 = vadd.f32 %v1192_v2, %v253_v12  ;;  %v5525_v34 = vld [vmem:[#allocation3 + $0x30] sm:$0xff]   ;;  %v5532_v35 = vld [vmem:[%s6329_s3 + $0x30] sm:$0xff]   ;;  %v5536_v2 = vld [vmem:[#allocation3 + $0x38] sm:$0xff]  }
 0x54a   :  { %v1155_v6 = vpop.f32.mrb[26].mxu0  ;;  %v1195_v7 = vpop.f32.mrb[26].mxu1 }
 0x54b   :  { %v3016_v8 = vmul.f32 -1.442695, %v1198_v3  ;;  %v3749_v9 = vpop.f32.mrb[27].mxu0  ;;  %v3769_v10 = vpop.f32.mrb[27].mxu1  ;;  %v3017_v15 = vmul.f32 -1.442695, %v1248_v13 }
 0x54c   :  { %v5543_v3 = vld [vmem:[%s6329_s3 + $0x38] sm:$0xff]   ;;  %v107_v4 = vpop.permute.xlu1 %106 }
 0x54d   :  { %4552 = vpow2.f32 %v3016_v8  ;;  %v190_v5 = vmul.f32 %v5096_v38, %v107_v4 }
 0x54e   :  { %4554 = vpow2.f32 %v3017_v15 }
 0x54f   :  { %v255_v6 = vadd.f32 %v5102_v42, %v190_v5 }
 0x557   :  { %v4553_v16 = vpop.eup %4552 }
 0x558   :  { %v1202_v19 = vadd.f32 1.0, %v4553_v16  ;;  %v4555_v36 = vpop.eup %4554 }
 0x559   :  { %v1252_v41 = vadd.f32 1.0, %v4555_v36  ;;  %v191_v36 = vmul.f32 %v5105_v45, %v107_v4 }
 0x55a   :  { %4556 = vrcp.f32 %v1202_v19 }
 0x55b   :  { %4558 = vrcp.f32 %v1252_v41  ;;  %v256_v37 = vadd.f32 %v5108_v51, %v191_v36 }
 0x564   :  { %v4557_v39 = vpop.eup %4556 }
 0x565   :  { %v4559_v53 = vpop.eup %4558 }
 0x566   :  { %v1255_v54 = vsub.f32 1.0, %v4559_v53  ;;  %v1257_v57 = vmul.f32 %v4559_v53, %v5345_v63  ;;  %v5501_v63 = vld [vmem:[#allocation3 + $0x10] sm:$0xff]  }
 0x568   :  { %v1239_v43 = vpop.f32.mrb[28].mxu0 }
 0x569   :  { %v1240_v44 = vadd.f32 %v5116_v18, %v1239_v43  ;;  %v3788_v46 = vpop.f32.mrb[29].mxu0 }
 0x56a   :  { %v1242_v47 = vpop.f32.mrb[30].mxu0 }
 0x56b   :  { %v1245_v49 = vmul.f32 %v4557_v39, %v1240_v44  ;;  %v3789_v50 = vpop.f32.mrb[31].mxu0  ;;  %v192_v47 = vmul.f32 %v5111_v1, %v107_v4 }
 0x56d   :  { %v1246_v52 = vadd.f32 %v1245_v49, %v254_v48 }
 0x56f   :  { %4560 = vtanh.f32 %v1246_v52 }
 0x579   :  { %v4561_v55 = vpop.eup %4560 }
 0x57a   :  { %v1256_v56 = vmul.f32 %v4561_v55, %v1255_v54  ;;  %v257_v55 = vadd.f32 %v5118_v21, %v192_v47 }
 0x57c   :  { %v5481_v58 = vadd.f32 %v1257_v57, %v1256_v56 }
 0x57e   :  { %v1262_v60 = vpack.c.bf16 %v5481_v58, %v5481_v58 }
 0x580   :  { %3807 = vmatmul.mubr.bf16.vlgmr.msra.gmra.mrb[28].mxu1 %v1262_v60  ;;  %3827 = vmatmul.mubr.bf16.vlgmr.msra.gmra.mrb[32].mxu0 %v1262_v60 }
 0x581   :  { %3831 = vmatpush3.bf16.msra.mxu1 %v5485_v61  ;;  %3846 = vmatprep.mubr.msk.bf16.mxu1 %vm4799_vm0, %v4798_v0 }
 0x582   :  { %3832 = vmatprep.subr.bf16.mxu1 %v4798_v0  ;;  %3851 = vmatpush3.bf16.msra.mxu0 %v5356_v23 }
 0x583   :  { %3852 = vmatprep.subr.bf16.mxu0 %v4798_v0  ;;  %3866 = vmatprep.mubr.msk.bf16.mxu0 %vm4799_vm0, %v4798_v0 }
 0x585   :  { %3833 = vmatpush3.bf16.msra.mxu1 %v5495_v62 }
 0x586   :  { %3834 = vmatprep.subr.bf16.mxu1 %v4798_v0  ;;  %3853 = vmatpush3.bf16.msra.mxu0 %v5367_v20 }
 0x587   :  { %3854 = vmatprep.subr.bf16.mxu0 %v4798_v0 }
 0x589   :  { %3835 = vmatpush3.bf16.msra.mxu1 %v5501_v63 }
 0x58a   :  { %3836 = vmatprep.subr.bf16.mxu1 %v4798_v0  ;;  %3855 = vmatpush3.bf16.msra.mxu0 %v5376_v25 }
 0x58b   :  { %3856 = vmatprep.subr.bf16.mxu0 %v4798_v0 }
 0x58d   :  { %3837 = vmatpush3.bf16.msra.mxu1 %v5507_v59 }
 0x58e   :  { %3838 = vmatprep.subr.bf16.mxu1 %v4798_v0  ;;  %3857 = vmatpush3.bf16.msra.mxu0 %v5385_v22 }
 0x58f   :  { %3858 = vmatprep.subr.bf16.mxu0 %v4798_v0 }
 0x591   :  { %3839 = vmatpush3.bf16.msra.mxu1 %v5513_v31 }
 0x592   :  { %3840 = vmatprep.subr.bf16.mxu1 %v4798_v0  ;;  %3859 = vmatpush3.bf16.msra.mxu0 %v5394_v24 }
 0x593   :  { %3860 = vmatprep.subr.bf16.mxu0 %v4798_v0 }
 0x595   :  { %3841 = vmatpush3.bf16.msra.mxu1 %v5519_v40 }
 0x596   :  { %3842 = vmatprep.subr.bf16.mxu1 %v4798_v0  ;;  %3861 = vmatpush3.bf16.msra.mxu0 %v5403_v26 }
 0x597   :  { %3862 = vmatprep.subr.bf16.mxu0 %v4798_v0 }
 0x599   :  { %3843 = vmatpush3.bf16.msra.mxu1 %v5525_v34 }
 0x59a   :  { %3844 = vmatprep.subr.bf16.mxu1 %v4798_v0  ;;  %3863 = vmatpush3.bf16.msra.mxu0 %v5532_v35 }
 0x59b   :  { %3864 = vmatprep.subr.bf16.mxu0 %v4798_v0 }
 0x59d   :  { %3845 = vmatpush3.bf16.msra.mxu1 %v5536_v2 }
 0x59e   :  { %3870 = vmatprep.subr.bf16.mxu1 %v4798_v0  ;;  %3865 = vmatpush3.bf16.msra.mxu0 %v5543_v3 }
 0x59f   :  { %3890 = vmatprep.subr.bf16.mxu0 %v4798_v0 }
 0x5a0   :  { %3847 = vmatmul.mubr.bf16.vlgmr.msra.gmra.mrb[32].mxu1 %v1262_v60 }
 0x5a1   :  { %3871 = vmatpush3.bf16.msra.mxu1 %v5418_v28  ;;  %3886 = vmatprep.mubr.msk.bf16.mxu1 %vm4799_vm0, %v4798_v0 }
 0x5a2   :  { %3872 = vmatprep.subr.bf16.mxu1 %v4798_v0 }
 0x5a5   :  { %3873 = vmatpush3.bf16.msra.mxu1 %v5427_v14 }
 0x5a6   :  { %3874 = vmatprep.subr.bf16.mxu1 %v4798_v0 }
 0x5a9   :  { %3875 = vmatpush3.bf16.msra.mxu1 %v5434_v17 }
 0x5aa   :  { %3876 = vmatprep.subr.bf16.mxu1 %v4798_v0 }
 0x5ad   :  { %3877 = vmatpush3.bf16.msra.mxu1 %v5441_v30 }
 0x5ae   :  { %3878 = vmatprep.subr.bf16.mxu1 %v4798_v0 }
 0x5b1   :  { %3879 = vmatpush3.bf16.msra.mxu1 %v5448_v32 }
 0x5b2   :  { %3880 = vmatprep.subr.bf16.mxu1 %v4798_v0 }
 0x5b5   :  { %3881 = vmatpush3.bf16.msra.mxu1 %v5455_v33 }
 0x5b6   :  { %3882 = vmatprep.subr.bf16.mxu1 %v4798_v0 }
 0x5b9   :  { %3883 = vmatpush3.bf16.msra.mxu1 %v5462_v27 }
 0x5ba   :  { %3884 = vmatprep.subr.bf16.mxu1 %v4798_v0 }
 0x5bd   :  { %3885 = vmatpush3.bf16.msra.mxu1 %v5469_v29 }
 0x5be   :  { %3910 = vmatprep.subr.bf16.mxu1 %v4798_v0 }
 0x653   :  { %v1297_v7 = vpop.f32.mrb[28].mxu1  ;;  %v1337_v8 = vpop.f32.mrb[32].mxu0 }
 0x654   :  { %v1343_v9 = vadd.f32 %v1297_v7, %v255_v6  ;;  %v3808_v10 = vpop.f32.mrb[29].mxu1  ;;  %v3828_v11 = vpop.f32.mrb[33].mxu0  ;;  %v1393_v41 = vadd.f32 %v1337_v8, %v256_v37 }
 0x655   :  { %v1300_v12 = vpop.f32.mrb[30].mxu1  ;;  %v1340_v13 = vpop.f32.mrb[34].mxu0 }
 0x656   :  { %v3018_v15 = vmul.f32 -1.442695, %v1343_v9  ;;  %v3809_v16 = vpop.f32.mrb[31].mxu1  ;;  %v3829_v19 = vpop.f32.mrb[35].mxu0  ;;  %v3019_v43 = vmul.f32 -1.442695, %v1393_v41 }
 0x658   :  { %4562 = vpow2.f32 %v3018_v15 }
 0x659   :  { %4564 = vpow2.f32 %v3019_v43 }
 0x662   :  { %v4563_v44 = vpop.eup %4562 }
 0x663   :  { %v1347_v46 = vadd.f32 1.0, %v4563_v44  ;;  %v4565_v39 = vpop.eup %4564 }
 0x664   :  { %v1397_v48 = vadd.f32 1.0, %v4565_v39 }
 0x665   :  { %4566 = vrcp.f32 %v1347_v46 }
 0x666   :  { %4568 = vrcp.f32 %v1397_v48 }
 0x66f   :  { %v4567_v53 = vpop.eup %4566 }
 0x670   :  { %v4569_v5 = vpop.eup %4568 }
 0x671   :  { %v1400_v6 = vsub.f32 1.0, %v4569_v5  ;;  %v1402_v4 = vmul.f32 %v4569_v5, %v5481_v58  ;;  %v112_v58 = vpop.permute.xlu0 %111 }
 0x672   :  { %v193_v10 = vmul.f32 %v5096_v38, %v112_v58  ;;  %v194_v46 = vmul.f32 %v5105_v45, %v112_v58 }
 0x673   :  { %v1384_v49 = vpop.f32.mrb[32].mxu1 }
 0x674   :  { %v1385_v50 = vadd.f32 %v5116_v18, %v1384_v49  ;;  %v3848_v52 = vpop.f32.mrb[33].mxu1  ;;  %v258_v11 = vadd.f32 %v5102_v42, %v193_v10  ;;  %v259_v39 = vadd.f32 %v5108_v51, %v194_v46 }
 0x675   :  { %v1387_v54 = vpop.f32.mrb[34].mxu1 }
 0x676   :  { %v1390_v56 = vmul.f32 %v4567_v53, %v1385_v50  ;;  %v3849_v57 = vpop.f32.mrb[35].mxu1  ;;  %v195_v53 = vmul.f32 %v5111_v1, %v112_v58 }
 0x678   :  { %v1391_v60 = vadd.f32 %v1390_v56, %v257_v55  ;;  %v5639_v56 = vld [vmem:[%s6332_s6] ss:$0 sm:$0xff] }
 0x67a   :  { %4570 = vtanh.f32 %v1391_v60 }
 0x684   :  { %v4571_v7 = vpop.eup %4570 }
 0x685   :  { %v1401_v8 = vmul.f32 %v4571_v7, %v1400_v6  ;;  %v260_v7 = vadd.f32 %v5118_v21, %v195_v53 }
 0x687   :  { %v5573_v9 = vadd.f32 %v1402_v4, %v1401_v8 }
 0x689   :  { %v1407_v18 = vpack.c.bf16 %v5573_v9, %v5573_v9 }
 0x68b   :  { %3867 = vmatmul.mubr.bf16.vlgmr.msra.gmra.mrb[36].mxu0 %v1407_v18  ;;  %3887 = vmatmul.mubr.bf16.vlgmr.msra.gmra.mrb[36].mxu1 %v1407_v18 }
 0x68c   :  { %3891 = vmatpush3.bf16.msra.mxu0 %v5485_v61  ;;  %3906 = vmatprep.mubr.msk.bf16.mxu0 %vm4799_vm0, %v4798_v0 }
 0x68d   :  { %3892 = vmatprep.subr.bf16.mxu0 %v4798_v0  ;;  %3911 = vmatpush3.bf16.msra.mxu1 %v5356_v23 }
 0x68e   :  { %3912 = vmatprep.subr.bf16.mxu1 %v4798_v0  ;;  %3926 = vmatprep.mubr.msk.bf16.mxu1 %vm4799_vm0, %v4798_v0 }
 0x690   :  { %3893 = vmatpush3.bf16.msra.mxu0 %v5495_v62 }
 0x691   :  { %3894 = vmatprep.subr.bf16.mxu0 %v4798_v0  ;;  %3913 = vmatpush3.bf16.msra.mxu1 %v5367_v20 }
 0x692   :  { %3914 = vmatprep.subr.bf16.mxu1 %v4798_v0 }
 0x694   :  { %3895 = vmatpush3.bf16.msra.mxu0 %v5501_v63 }
 0x695   :  { %3896 = vmatprep.subr.bf16.mxu0 %v4798_v0  ;;  %3915 = vmatpush3.bf16.msra.mxu1 %v5376_v25 }
 0x696   :  { %3916 = vmatprep.subr.bf16.mxu1 %v4798_v0 }
 0x698   :  { %3897 = vmatpush3.bf16.msra.mxu0 %v5507_v59 }
 0x699   :  { %3898 = vmatprep.subr.bf16.mxu0 %v4798_v0  ;;  %3917 = vmatpush3.bf16.msra.mxu1 %v5385_v22 }
 0x69a   :  { %3918 = vmatprep.subr.bf16.mxu1 %v4798_v0 }
 0x69c   :  { %3899 = vmatpush3.bf16.msra.mxu0 %v5513_v31 }
 0x69d   :  { %3900 = vmatprep.subr.bf16.mxu0 %v4798_v0  ;;  %3919 = vmatpush3.bf16.msra.mxu1 %v5394_v24 }
 0x69e   :  { %3920 = vmatprep.subr.bf16.mxu1 %v4798_v0 }
 0x6a0   :  { %3901 = vmatpush3.bf16.msra.mxu0 %v5519_v40 }
 0x6a1   :  { %3902 = vmatprep.subr.bf16.mxu0 %v4798_v0  ;;  %3921 = vmatpush3.bf16.msra.mxu1 %v5403_v26 }
 0x6a2   :  { %3922 = vmatprep.subr.bf16.mxu1 %v4798_v0 }
 0x6a4   :  { %3903 = vmatpush3.bf16.msra.mxu0 %v5525_v34 }
 0x6a5   :  { %3904 = vmatprep.subr.bf16.mxu0 %v4798_v0  ;;  %3923 = vmatpush3.bf16.msra.mxu1 %v5532_v35 }
 0x6a6   :  { %3924 = vmatprep.subr.bf16.mxu1 %v4798_v0 }
 0x6a8   :  { %3905 = vmatpush3.bf16.msra.mxu0 %v5536_v2 }
 0x6a9   :  { %3930 = vmatprep.subr.bf16.mxu0 %v4798_v0  ;;  %3925 = vmatpush3.bf16.msra.mxu1 %v5543_v3 }
 0x6aa   :  { %3950 = vmatprep.subr.bf16.mxu1 %v4798_v0 }
 0x6ab   :  { %3907 = vmatmul.mubr.bf16.vlgmr.msra.gmra.mrb[40].mxu0 %v1407_v18 }
 0x6ac   :  { %3931 = vmatpush3.bf16.msra.mxu0 %v5418_v28  ;;  %3946 = vmatprep.mubr.msk.bf16.mxu0 %vm4799_vm0, %v4798_v0 }
 0x6ad   :  { %3932 = vmatprep.subr.bf16.mxu0 %v4798_v0 }
 0x6b0   :  { %3933 = vmatpush3.bf16.msra.mxu0 %v5427_v14 }
 0x6b1   :  { %3934 = vmatprep.subr.bf16.mxu0 %v4798_v0 }
 0x6b4   :  { %3935 = vmatpush3.bf16.msra.mxu0 %v5434_v17 }
 0x6b5   :  { %3936 = vmatprep.subr.bf16.mxu0 %v4798_v0 }
 0x6b8   :  { %3937 = vmatpush3.bf16.msra.mxu0 %v5441_v30 }
 0x6b9   :  { %3938 = vmatprep.subr.bf16.mxu0 %v4798_v0 }
 0x6bc   :  { %3939 = vmatpush3.bf16.msra.mxu0 %v5448_v32 }
 0x6bd   :  { %3940 = vmatprep.subr.bf16.mxu0 %v4798_v0 }
 0x6c0   :  { %3941 = vmatpush3.bf16.msra.mxu0 %v5455_v33 }
 0x6c1   :  { %3942 = vmatprep.subr.bf16.mxu0 %v4798_v0 }
 0x6c4   :  { %3943 = vmatpush3.bf16.msra.mxu0 %v5462_v27 }
 0x6c5   :  { %3944 = vmatprep.subr.bf16.mxu0 %v4798_v0 }
 0x6c8   :  { %3945 = vmatpush3.bf16.msra.mxu0 %v5469_v29 }
 0x6c9   :  { %3970 = vmatprep.subr.bf16.mxu0 %v4798_v0 }
 0x75e   :  { %v1442_v12 = vpop.f32.mrb[36].mxu0  ;;  %v1482_v13 = vpop.f32.mrb[36].mxu1 }
 0x75f   :  { %v1488_v15 = vadd.f32 %v1442_v12, %v258_v11  ;;  %v3868_v16 = vpop.f32.mrb[37].mxu0  ;;  %v3888_v19 = vpop.f32.mrb[37].mxu1  ;;  %v1538_v47 = vadd.f32 %v1482_v13, %v259_v39 }
 0x760   :  { %v1445_v36 = vpop.f32.mrb[38].mxu0  ;;  %v1485_v37 = vpop.f32.mrb[38].mxu1 }
 0x761   :  { %v3020_v41 = vmul.f32 -1.442695, %v1488_v15  ;;  %v3869_v43 = vpop.f32.mrb[39].mxu0  ;;  %v3889_v44 = vpop.f32.mrb[39].mxu1  ;;  %v3021_v48 = vmul.f32 -1.442695, %v1538_v47 }
 0x763   :  { %4572 = vpow2.f32 %v3020_v41 }
 0x764   :  { %4574 = vpow2.f32 %v3021_v48 }
 0x76d   :  { %v4573_v49 = vpop.eup %4572 }
 0x76e   :  { %v1492_v50 = vadd.f32 1.0, %v4573_v49  ;;  %v4575_v52 = vpop.eup %4574 }
 0x76f   :  { %v1542_v54 = vadd.f32 1.0, %v4575_v52 }
 0x770   :  { %4576 = vrcp.f32 %v1492_v50 }
 0x771   :  { %4578 = vrcp.f32 %v1542_v54 }
 0x77a   :  { %v4577_v5 = vpop.eup %4576 }
 0x77b   :  { %v4579_v58 = vpop.eup %4578 }
 0x77c   :  { %v1545_v10 = vsub.f32 1.0, %v4579_v58  ;;  %v1547_v13 = vmul.f32 %v4579_v58, %v5573_v9  ;;  %v117_v9 = vpop.permute.xlu1 %116 }
 0x77d   :  { %v196_v19 = vmul.f32 %v5096_v38, %v117_v9  ;;  %v197_v52 = vmul.f32 %v5105_v45, %v117_v9 }
 0x77e   :  { %v1529_v55 = vpop.f32.mrb[40].mxu0 }
 0x77f   :  { %v1530_v57 = vadd.f32 %v5639_v56, %v1529_v55  ;;  %v3908_v60 = vpop.f32.mrb[41].mxu0  ;;  %v261_v36 = vadd.f32 %v5102_v42, %v196_v19  ;;  %v262_v53 = vadd.f32 %v5108_v51, %v197_v52 }
 0x780   :  { %v1532_v6 = vpop.f32.mrb[42].mxu0 }
 0x781   :  { %v1535_v8 = vmul.f32 %v4577_v5, %v1530_v57  ;;  %v3909_v4 = vpop.f32.mrb[43].mxu0  ;;  %v198_v6 = vmul.f32 %v5111_v1, %v117_v9 }
 0x783   :  { %v1536_v18 = vadd.f32 %v1535_v8, %v260_v7 }
 0x785   :  { %4580 = vtanh.f32 %v1536_v18 }
 0x78f   :  { %v4581_v11 = vpop.eup %4580 }
 0x790   :  { %v1546_v12 = vmul.f32 %v4581_v11, %v1545_v10  ;;  %v263_v11 = vadd.f32 %v5118_v21, %v198_v6 }
 0x792   :  { %v5644_v15 = vadd.f32 %v1547_v13, %v1546_v12 }
 0x794   :  { %v1552_v16 = vpack.c.bf16 %v5644_v15, %v5644_v15 }
 0x796   :  { %3927 = vmatmul.mubr.bf16.vlgmr.msra.gmra.mrb[40].mxu1 %v1552_v16  ;;  %3947 = vmatmul.mubr.bf16.vlgmr.msra.gmra.mrb[44].mxu0 %v1552_v16 }
 0x797   :  { %3951 = vmatpush3.bf16.msra.mxu1 %v5485_v61  ;;  %3966 = vmatprep.mubr.msk.bf16.mxu1 %vm4799_vm0, %v4798_v0 }
 0x798   :  { %3952 = vmatprep.subr.bf16.mxu1 %v4798_v0  ;;  %3971 = vmatpush3.bf16.msra.mxu0 %v5356_v23 }
 0x799   :  { %3972 = vmatprep.subr.bf16.mxu0 %v4798_v0  ;;  %3986 = vmatprep.mubr.msk.bf16.mxu0 %vm4799_vm0, %v4798_v0 }
 0x79b   :  { %3953 = vmatpush3.bf16.msra.mxu1 %v5495_v62 }
 0x79c   :  { %3954 = vmatprep.subr.bf16.mxu1 %v4798_v0  ;;  %3973 = vmatpush3.bf16.msra.mxu0 %v5367_v20 }
 0x79d   :  { %3974 = vmatprep.subr.bf16.mxu0 %v4798_v0 }
 0x79f   :  { %3955 = vmatpush3.bf16.msra.mxu1 %v5501_v63 }
 0x7a0   :  { %3956 = vmatprep.subr.bf16.mxu1 %v4798_v0  ;;  %3975 = vmatpush3.bf16.msra.mxu0 %v5376_v25 }
 0x7a1   :  { %3976 = vmatprep.subr.bf16.mxu0 %v4798_v0 }
 0x7a3   :  { %3957 = vmatpush3.bf16.msra.mxu1 %v5507_v59 }
 0x7a4   :  { %3958 = vmatprep.subr.bf16.mxu1 %v4798_v0  ;;  %3977 = vmatpush3.bf16.msra.mxu0 %v5385_v22 }
 0x7a5   :  { %3978 = vmatprep.subr.bf16.mxu0 %v4798_v0 }
 0x7a7   :  { %3959 = vmatpush3.bf16.msra.mxu1 %v5513_v31 }
 0x7a8   :  { %3960 = vmatprep.subr.bf16.mxu1 %v4798_v0  ;;  %3979 = vmatpush3.bf16.msra.mxu0 %v5394_v24 }
 0x7a9   :  { %3980 = vmatprep.subr.bf16.mxu0 %v4798_v0 }
 0x7ab   :  { %3961 = vmatpush3.bf16.msra.mxu1 %v5519_v40 }
 0x7ac   :  { %3962 = vmatprep.subr.bf16.mxu1 %v4798_v0  ;;  %3981 = vmatpush3.bf16.msra.mxu0 %v5403_v26 }
 0x7ad   :  { %3982 = vmatprep.subr.bf16.mxu0 %v4798_v0 }
 0x7af   :  { %3963 = vmatpush3.bf16.msra.mxu1 %v5525_v34 }
 0x7b0   :  { %3964 = vmatprep.subr.bf16.mxu1 %v4798_v0  ;;  %3983 = vmatpush3.bf16.msra.mxu0 %v5532_v35 }
 0x7b1   :  { %3984 = vmatprep.subr.bf16.mxu0 %v4798_v0 }
 0x7b3   :  { %3965 = vmatpush3.bf16.msra.mxu1 %v5536_v2 }
 0x7b4   :  { %3990 = vmatprep.subr.bf16.mxu1 %v4798_v0  ;;  %3985 = vmatpush3.bf16.msra.mxu0 %v5543_v3 }
 0x7b5   :  { %4010 = vmatprep.subr.bf16.mxu0 %v4798_v0 }
 0x7b6   :  { %3967 = vmatmul.mubr.bf16.vlgmr.msra.gmra.mrb[44].mxu1 %v1552_v16 }
 0x7b7   :  { %3991 = vmatpush3.bf16.msra.mxu1 %v5418_v28  ;;  %4006 = vmatprep.mubr.msk.bf16.mxu1 %vm4799_vm0, %v4798_v0 }
 0x7b8   :  { %3992 = vmatprep.subr.bf16.mxu1 %v4798_v0 }
 0x7bb   :  { %3993 = vmatpush3.bf16.msra.mxu1 %v5427_v14 }
 0x7bc   :  { %3994 = vmatprep.subr.bf16.mxu1 %v4798_v0 }
 0x7bf   :  { %3995 = vmatpush3.bf16.msra.mxu1 %v5434_v17 }
 0x7c0   :  { %3996 = vmatprep.subr.bf16.mxu1 %v4798_v0 }
 0x7c3   :  { %3997 = vmatpush3.bf16.msra.mxu1 %v5441_v30 }
 0x7c4   :  { %3998 = vmatprep.subr.bf16.mxu1 %v4798_v0 }
 0x7c7   :  { %3999 = vmatpush3.bf16.msra.mxu1 %v5448_v32 }
 0x7c8   :  { %4000 = vmatprep.subr.bf16.mxu1 %v4798_v0 }
 0x7cb   :  { %4001 = vmatpush3.bf16.msra.mxu1 %v5455_v33 }
 0x7cc   :  { %4002 = vmatprep.subr.bf16.mxu1 %v4798_v0 }
 0x7cf   :  { %4003 = vmatpush3.bf16.msra.mxu1 %v5462_v27 }
 0x7d0   :  { %4004 = vmatprep.subr.bf16.mxu1 %v4798_v0 }
 0x7d3   :  { %4005 = vmatpush3.bf16.msra.mxu1 %v5469_v29 }
 0x7d4   :  { %4030 = vmatprep.subr.bf16.mxu1 %v4798_v0 }
 0x869   :  { %v1587_v37 = vpop.f32.mrb[40].mxu1  ;;  %v1627_v41 = vpop.f32.mrb[44].mxu0 }
 0x86a   :  { %v1633_v43 = vadd.f32 %v1587_v37, %v261_v36  ;;  %v3928_v44 = vpop.f32.mrb[41].mxu1  ;;  %v3948_v46 = vpop.f32.mrb[45].mxu0  ;;  %v1683_v54 = vadd.f32 %v1627_v41, %v262_v53 }
 0x86b   :  { %v1590_v39 = vpop.f32.mrb[42].mxu1  ;;  %v1630_v47 = vpop.f32.mrb[46].mxu0 }
 0x86c   :  { %v3022_v48 = vmul.f32 -1.442695, %v1633_v43  ;;  %v3929_v49 = vpop.f32.mrb[43].mxu1  ;;  %v3949_v50 = vpop.f32.mrb[47].mxu0  ;;  %v3023_v55 = vmul.f32 -1.442695, %v1683_v54 }
 0x86e   :  { %4582 = vpow2.f32 %v3022_v48 }
 0x86f   :  { %4584 = vpow2.f32 %v3023_v55 }
 0x878   :  { %v4583_v57 = vpop.eup %4582 }
 0x879   :  { %v1637_v60 = vadd.f32 1.0, %v4583_v57  ;;  %v4585_v5 = vpop.eup %4584 }
 0x87a   :  { %v1687_v7 = vadd.f32 1.0, %v4585_v5 }
 0x87b   :  { %4586 = vrcp.f32 %v1637_v60 }
 0x87c   :  { %4588 = vrcp.f32 %v1687_v7 }
 0x885   :  { %v4587_v58 = vpop.eup %4586 }
 0x886   :  { %v4589_v19 = vpop.eup %4588 }
 0x887   :  { %v1690_v36 = vsub.f32 1.0, %v4589_v19  ;;  %v1692_v9 = vmul.f32 %v4589_v19, %v5644_v15  ;;  %v122_v15 = vpop.permute.xlu0 %121 }
 0x888   :  { %v199_v46 = vmul.f32 %v5096_v38, %v122_v15  ;;  %v200_v5 = vmul.f32 %v5105_v45, %v122_v15 }
 0x889   :  { %v1674_v8 = vpop.f32.mrb[44].mxu1 }
 0x88a   :  { %v1675_v4 = vadd.f32 %v5639_v56, %v1674_v8  ;;  %v3968_v18 = vpop.f32.mrb[45].mxu1  ;;  %v264_v39 = vadd.f32 %v5102_v42, %v199_v46  ;;  %v265_v6 = vadd.f32 %v5108_v51, %v200_v5 }
 0x88b   :  { %v1677_v10 = vpop.f32.mrb[46].mxu1 }
 0x88c   :  { %v1680_v12 = vmul.f32 %v4587_v58, %v1675_v4  ;;  %v3969_v13 = vpop.f32.mrb[47].mxu1  ;;  %v201_v10 = vmul.f32 %v5111_v1, %v122_v15 }
 0x88e   :  { %v1681_v16 = vadd.f32 %v1680_v12, %v263_v11 }
 0x890   :  { %4590 = vtanh.f32 %v1681_v16 }
 0x89a   :  { %v4591_v37 = vpop.eup %4590 }
 0x89b   :  { %v1691_v41 = vmul.f32 %v4591_v37, %v1690_v36  ;;  %v266_v37 = vadd.f32 %v5118_v21, %v201_v10 }
 0x89d   :  { %v5710_v43 = vadd.f32 %v1692_v9, %v1691_v41 }
 0x89f   :  { %v1697_v44 = vpack.c.bf16 %v5710_v43, %v5710_v43 }
 0x8a1   :  { %3987 = vmatmul.mubr.bf16.vlgmr.msra.gmra.mrb[48].mxu0 %v1697_v44  ;;  %4007 = vmatmul.mubr.bf16.vlgmr.msra.gmra.mrb[48].mxu1 %v1697_v44 }
 0x8a2   :  { %4011 = vmatpush3.bf16.msra.mxu0 %v5485_v61  ;;  %4026 = vmatprep.mubr.msk.bf16.mxu0 %vm4799_vm0, %v4798_v0 }
 0x8a3   :  { %4012 = vmatprep.subr.bf16.mxu0 %v4798_v0  ;;  %4031 = vmatpush3.bf16.msra.mxu1 %v5356_v23 }
 0x8a4   :  { %4032 = vmatprep.subr.bf16.mxu1 %v4798_v0  ;;  %4046 = vmatprep.mubr.msk.bf16.mxu1 %vm4799_vm0, %v4798_v0 }
 0x8a6   :  { %4013 = vmatpush3.bf16.msra.mxu0 %v5495_v62 }
 0x8a7   :  { %4014 = vmatprep.subr.bf16.mxu0 %v4798_v0  ;;  %4033 = vmatpush3.bf16.msra.mxu1 %v5367_v20 }
 0x8a8   :  { %4034 = vmatprep.subr.bf16.mxu1 %v4798_v0 }
 0x8aa   :  { %4015 = vmatpush3.bf16.msra.mxu0 %v5501_v63 }
 0x8ab   :  { %4016 = vmatprep.subr.bf16.mxu0 %v4798_v0  ;;  %4035 = vmatpush3.bf16.msra.mxu1 %v5376_v25 }
 0x8ac   :  { %4036 = vmatprep.subr.bf16.mxu1 %v4798_v0 }
 0x8ae   :  { %4017 = vmatpush3.bf16.msra.mxu0 %v5507_v59 }
 0x8af   :  { %4018 = vmatprep.subr.bf16.mxu0 %v4798_v0  ;;  %4037 = vmatpush3.bf16.msra.mxu1 %v5385_v22 }
 0x8b0   :  { %4038 = vmatprep.subr.bf16.mxu1 %v4798_v0 }
 0x8b2   :  { %4019 = vmatpush3.bf16.msra.mxu0 %v5513_v31 }
 0x8b3   :  { %4020 = vmatprep.subr.bf16.mxu0 %v4798_v0  ;;  %4039 = vmatpush3.bf16.msra.mxu1 %v5394_v24 }
 0x8b4   :  { %4040 = vmatprep.subr.bf16.mxu1 %v4798_v0 }
 0x8b6   :  { %4021 = vmatpush3.bf16.msra.mxu0 %v5519_v40 }
 0x8b7   :  { %4022 = vmatprep.subr.bf16.mxu0 %v4798_v0  ;;  %4041 = vmatpush3.bf16.msra.mxu1 %v5403_v26 }
 0x8b8   :  { %4042 = vmatprep.subr.bf16.mxu1 %v4798_v0 }
 0x8ba   :  { %4023 = vmatpush3.bf16.msra.mxu0 %v5525_v34 }
 0x8bb   :  { %4024 = vmatprep.subr.bf16.mxu0 %v4798_v0  ;;  %4043 = vmatpush3.bf16.msra.mxu1 %v5532_v35 }
 0x8bc   :  { %4044 = vmatprep.subr.bf16.mxu1 %v4798_v0 }
 0x8be   :  { %4025 = vmatpush3.bf16.msra.mxu0 %v5536_v2 }
 0x8bf   :  { %4050 = vmatprep.subr.bf16.mxu0 %v4798_v0  ;;  %4045 = vmatpush3.bf16.msra.mxu1 %v5543_v3 }
 0x8c0   :  { %4070 = vmatprep.subr.bf16.mxu1 %v4798_v0 }
 0x8c1   :  { %4027 = vmatmul.mubr.bf16.vlgmr.msra.gmra.mrb[52].mxu0 %v1697_v44 }
 0x8c2   :  { %4051 = vmatpush3.bf16.msra.mxu0 %v5418_v28  ;;  %4066 = vmatprep.mubr.msk.bf16.mxu0 %vm4799_vm0, %v4798_v0 }
 0x8c3   :  { %4052 = vmatprep.subr.bf16.mxu0 %v4798_v0 }
 0x8c6   :  { %4053 = vmatpush3.bf16.msra.mxu0 %v5427_v14 }
 0x8c7   :  { %4054 = vmatprep.subr.bf16.mxu0 %v4798_v0 }
 0x8ca   :  { %4055 = vmatpush3.bf16.msra.mxu0 %v5434_v17 }
 0x8cb   :  { %4056 = vmatprep.subr.bf16.mxu0 %v4798_v0 }
 0x8ce   :  { %4057 = vmatpush3.bf16.msra.mxu0 %v5441_v30 }
 0x8cf   :  { %4058 = vmatprep.subr.bf16.mxu0 %v4798_v0 }
 0x8d2   :  { %4059 = vmatpush3.bf16.msra.mxu0 %v5448_v32 }
 0x8d3   :  { %4060 = vmatprep.subr.bf16.mxu0 %v4798_v0 }
 0x8d6   :  { %4061 = vmatpush3.bf16.msra.mxu0 %v5455_v33 }
 0x8d7   :  { %4062 = vmatprep.subr.bf16.mxu0 %v4798_v0 }
 0x8da   :  { %4063 = vmatpush3.bf16.msra.mxu0 %v5462_v27 }
 0x8db   :  { %4064 = vmatprep.subr.bf16.mxu0 %v4798_v0 }
 0x8de   :  { %4065 = vmatpush3.bf16.msra.mxu0 %v5469_v29 }
 0x8df   :  { %4090 = vmatprep.subr.bf16.mxu0 %v4798_v0 }
 0x974   :  { %v1732_v47 = vpop.f32.mrb[48].mxu0  ;;  %v1772_v48 = vpop.f32.mrb[48].mxu1 }
 0x975   :  { %v1778_v49 = vadd.f32 %v1732_v47, %v264_v39  ;;  %v3988_v50 = vpop.f32.mrb[49].mxu0  ;;  %v4008_v52 = vpop.f32.mrb[49].mxu1  ;;  %v1828_v7 = vadd.f32 %v1772_v48, %v265_v6 }
 0x976   :  { %v1735_v53 = vpop.f32.mrb[50].mxu0  ;;  %v1775_v54 = vpop.f32.mrb[50].mxu1 }
 0x977   :  { %v3024_v55 = vmul.f32 -1.442695, %v1778_v49  ;;  %v3989_v57 = vpop.f32.mrb[51].mxu0  ;;  %v4009_v60 = vpop.f32.mrb[51].mxu1  ;;  %v3025_v8 = vmul.f32 -1.442695, %v1828_v7 }
 0x979   :  { %4592 = vpow2.f32 %v3024_v55 }
 0x97a   :  { %4594 = vpow2.f32 %v3025_v8 }
 0x983   :  { %v4593_v4 = vpop.eup %4592 }
 0x984   :  { %v1782_v18 = vadd.f32 1.0, %v4593_v4  ;;  %v4595_v58 = vpop.eup %4594 }
 0x985   :  { %v1832_v11 = vadd.f32 1.0, %v4595_v58 }
 0x986   :  { %4596 = vrcp.f32 %v1782_v18 }
 0x987   :  { %4598 = vrcp.f32 %v1832_v11 }
 0x990   :  { %v4597_v19 = vpop.eup %4596 }
 0x991   :  { %v4599_v46 = vpop.eup %4598 }
 0x992   :  { %v1835_v39 = vsub.f32 1.0, %v4599_v46  ;;  %v1837_v15 = vmul.f32 %v4599_v46, %v5710_v43  ;;  %v5873_v46 = vld [vmem:[%s6329_s3 + $0x10] sm:$0xff]  }
 0x994   :  { %v1819_v12 = vpop.f32.mrb[52].mxu0 }
 0x995   :  { %v1820_v13 = vadd.f32 %v5639_v56, %v1819_v12  ;;  %v4028_v16 = vpop.f32.mrb[53].mxu0 }
 0x996   :  { %v1822_v36 = vpop.f32.mrb[54].mxu0 }
 0x997   :  { %v1825_v41 = vmul.f32 %v4597_v19, %v1820_v13  ;;  %v4029_v9 = vpop.f32.mrb[55].mxu0 }
 0x999   :  { %v1826_v44 = vadd.f32 %v1825_v41, %v266_v37 }
 0x99b   :  { %4600 = vtanh.f32 %v1826_v44  ;;  %v5853_v44 = vld [vmem:[%s6329_s3] sm:$0xff]  }
 0x9a5   :  { %v4601_v47 = vpop.eup %4600 }
 0x9a6   :  { %v1836_v48 = vmul.f32 %v4601_v47, %v1835_v39  ;;  %v5959_v39 = vld [vmem:[%s6330_s4 + $0x30] sm:$0xff]   ;;  %v5966_v47 = vld [vmem:[%s6330_s4 + $0x38] sm:$0xff]  }
 0x9a8   :  { %v5776_v49 = vadd.f32 %v1837_v15, %v1836_v48  ;;  %v132_v48 = vpop.permute.xlu0 %131 }
 0x9a9   :  { %v205_v15 = vmul.f32 %v5096_v38, %v132_v48 }
 0x9aa   :  { %v1842_v50 = vpack.c.bf16 %v5776_v49, %v5776_v49 }
 0x9ac   :  { %4047 = vmatmul.mubr.bf16.vlgmr.msra.gmra.mrb[52].mxu1 %v1842_v50  ;;  %4067 = vmatmul.mubr.bf16.vlgmr.msra.gmra.mrb[56].mxu0 %v1842_v50 }
 0x9ad   :  { %4071 = vmatpush3.bf16.msra.mxu1 %v5485_v61  ;;  %4086 = vmatprep.mubr.msk.bf16.mxu1 %vm4799_vm0, %v4798_v0 }
 0x9ae   :  { %4072 = vmatprep.subr.bf16.mxu1 %v4798_v0  ;;  %4091 = vmatpush3.bf16.msra.mxu0 %v5356_v23  ;;  %v127_v23 = vpop.permute.xlu1 %126 }
 0x9af   :  { %4092 = vmatprep.subr.bf16.mxu0 %v4798_v0  ;;  %4106 = vmatprep.mubr.msk.bf16.mxu0 %vm4799_vm0, %v4798_v0  ;;  %v203_v43 = vmul.f32 %v5105_v45, %v127_v23  ;;  %v204_v60 = vmul.f32 %v5111_v1, %v127_v23 }
 0x9b1   :  { %4073 = vmatpush3.bf16.msra.mxu1 %v5495_v62  ;;  %v269_v58 = vadd.f32 %v5118_v21, %v204_v60 }
 0x9b2   :  { %4074 = vmatprep.subr.bf16.mxu1 %v4798_v0  ;;  %4093 = vmatpush3.bf16.msra.mxu0 %v5367_v20  ;;  %v202_v20 = vmul.f32 %v5096_v38, %v127_v23 }
 0x9b3   :  { %4094 = vmatprep.subr.bf16.mxu0 %v4798_v0 }
 0x9b5   :  { %4075 = vmatpush3.bf16.msra.mxu1 %v5501_v63 }
 0x9b6   :  { %4076 = vmatprep.subr.bf16.mxu1 %v4798_v0  ;;  %4095 = vmatpush3.bf16.msra.mxu0 %v5376_v25  ;;  %v267_v25 = vadd.f32 %v5102_v42, %v202_v20 }
 0x9b7   :  { %4096 = vmatprep.subr.bf16.mxu0 %v4798_v0 }
 0x9b9   :  { %4077 = vmatpush3.bf16.msra.mxu1 %v5507_v59 }
 0x9ba   :  { %4078 = vmatprep.subr.bf16.mxu1 %v4798_v0  ;;  %4097 = vmatpush3.bf16.msra.mxu0 %v5385_v22 }
 0x9bb   :  { %4098 = vmatprep.subr.bf16.mxu0 %v4798_v0 }
 0x9bd   :  { %4079 = vmatpush3.bf16.msra.mxu1 %v5513_v31 }
 0x9be   :  { %4080 = vmatprep.subr.bf16.mxu1 %v4798_v0  ;;  %4099 = vmatpush3.bf16.msra.mxu0 %v5394_v24 }
 0x9bf   :  { %4100 = vmatprep.subr.bf16.mxu0 %v4798_v0 }
 0x9c1   :  { %4081 = vmatpush3.bf16.msra.mxu1 %v5519_v40 }
 0x9c2   :  { %4082 = vmatprep.subr.bf16.mxu1 %v4798_v0  ;;  %4101 = vmatpush3.bf16.msra.mxu0 %v5403_v26 }
 0x9c3   :  { %4102 = vmatprep.subr.bf16.mxu0 %v4798_v0 }
 0x9c5   :  { %4083 = vmatpush3.bf16.msra.mxu1 %v5525_v34 }
 0x9c6   :  { %4084 = vmatprep.subr.bf16.mxu1 %v4798_v0  ;;  %4103 = vmatpush3.bf16.msra.mxu0 %v5532_v35 }
 0x9c7   :  { %4104 = vmatprep.subr.bf16.mxu0 %v4798_v0 }
 0x9c9   :  { %4085 = vmatpush3.bf16.msra.mxu1 %v5536_v2 }
 0x9ca   :  { %4110 = vmatprep.subr.bf16.mxu1 %v4798_v0  ;;  %4105 = vmatpush3.bf16.msra.mxu0 %v5543_v3 }
 0x9cb   :  { %4130 = vmatprep.subr.bf16.mxu0 %v4798_v0 }
 0x9cc   :  { %4087 = vmatmul.mubr.bf16.vlgmr.msra.gmra.mrb[56].mxu1 %v1842_v50 }
 0x9cd   :  { %4111 = vmatpush3.bf16.msra.mxu1 %v5418_v28  ;;  %4126 = vmatprep.mubr.msk.bf16.mxu1 %vm4799_vm0, %v4798_v0 }
 0x9ce   :  { %4112 = vmatprep.subr.bf16.mxu1 %v4798_v0 }
 0x9d1   :  { %4113 = vmatpush3.bf16.msra.mxu1 %v5427_v14 }
 0x9d2   :  { %4114 = vmatprep.subr.bf16.mxu1 %v4798_v0 }
 0x9d5   :  { %4115 = vmatpush3.bf16.msra.mxu1 %v5434_v17 }
 0x9d6   :  { %4116 = vmatprep.subr.bf16.mxu1 %v4798_v0 }
 0x9d9   :  { %4117 = vmatpush3.bf16.msra.mxu1 %v5441_v30 }
 0x9da   :  { %4118 = vmatprep.subr.bf16.mxu1 %v4798_v0 }
 0x9dd   :  { %4119 = vmatpush3.bf16.msra.mxu1 %v5448_v32 }
 0x9de   :  { %4120 = vmatprep.subr.bf16.mxu1 %v4798_v0 }
 0x9e1   :  { %4121 = vmatpush3.bf16.msra.mxu1 %v5455_v33 }
 0x9e2   :  { %4122 = vmatprep.subr.bf16.mxu1 %v4798_v0 }
 0x9e5   :  { %4123 = vmatpush3.bf16.msra.mxu1 %v5462_v27 }
 0x9e6   :  { %4124 = vmatprep.subr.bf16.mxu1 %v4798_v0 }
 0x9e9   :  { %4125 = vmatpush3.bf16.msra.mxu1 %v5469_v29  ;;  %v268_v29 = vadd.f32 %v5108_v51, %v203_v43 }
 0x9ea   :  { %4150 = vmatprep.subr.bf16.mxu1 %v4798_v0 }
 0xa7f   :  { %v1877_v22 = vpop.f32.mrb[52].mxu1  ;;  %v1917_v24 = vpop.f32.mrb[56].mxu0 }
 0xa80   :  { %v1923_v26 = vadd.f32 %v1877_v22, %v267_v25  ;;  %v4048_v28 = vpop.f32.mrb[53].mxu1  ;;  %v4068_v14 = vpop.f32.mrb[57].mxu0  ;;  %v1973_v52 = vadd.f32 %v1917_v24, %v268_v29 }
 0xa81   :  { %v1880_v17 = vpop.f32.mrb[54].mxu1  ;;  %v1920_v30 = vpop.f32.mrb[58].mxu0 }
 0xa82   :  { %v3026_v32 = vmul.f32 -1.442695, %v1923_v26  ;;  %v4049_v33 = vpop.f32.mrb[55].mxu1  ;;  %v4069_v27 = vpop.f32.mrb[59].mxu0  ;;  %v3027_v53 = vmul.f32 -1.442695, %v1973_v52  ;;  %v206_v30 = vmul.f32 %v5105_v45, %v132_v48 }
 0xa84   :  { %4602 = vpow2.f32 %v3026_v32  ;;  %v271_v32 = vadd.f32 %v5108_v51, %v206_v30 }
 0xa85   :  { %4604 = vpow2.f32 %v3027_v53  ;;  %v207_v53 = vmul.f32 %v5111_v1, %v132_v48  ;;  %v6010_v48 = vld [vmem:[#allocation3 + $0x20] sm:$0xff]  }
 0xa8e   :  { %v4603_v54 = vpop.eup %4602 }
 0xa8f   :  { %v1927_v55 = vadd.f32 1.0, %v4603_v54  ;;  %v4605_v57 = vpop.eup %4604 }
 0xa90   :  { %v1977_v5 = vadd.f32 1.0, %v4605_v57 }
 0xa91   :  { %4606 = vrcp.f32 %v1927_v55 }
 0xa92   :  { %4608 = vrcp.f32 %v1977_v5 }
 0xa9b   :  { %v4607_v4 = vpop.eup %4606 }
 0xa9c   :  { %v4609_v13 = vpop.eup %4608 }
 0xa9d   :  { %v1980_v16 = vsub.f32 1.0, %v4609_v13  ;;  %v1982_v37 = vmul.f32 %v4609_v13, %v5776_v49  ;;  %v270_v49 = vadd.f32 %v5102_v42, %v205_v15  ;;  %v6016_v15 = vld [vmem:[#allocation3 + $0x28] sm:$0xff]  }
 0xa9f   :  { %v1964_v6 = vpop.f32.mrb[56].mxu1 }
 0xaa0   :  { %v1965_v7 = vadd.f32 %v5639_v56, %v1964_v6  ;;  %v4088_v8 = vpop.f32.mrb[57].mxu1 }
 0xaa1   :  { %v1967_v18 = vpop.f32.mrb[58].mxu1 }
 0xaa2   :  { %v1970_v10 = vmul.f32 %v4607_v4, %v1965_v7  ;;  %v4089_v11 = vpop.f32.mrb[59].mxu1  ;;  %v272_v7 = vadd.f32 %v5118_v21, %v207_v53 }
 0xaa4   :  { %v1971_v12 = vadd.f32 %v1970_v10, %v269_v58 }
 0xaa6   :  { %4610 = vtanh.f32 %v1971_v12 }
 0xab0   :  { %v4611_v19 = vpop.eup %4610 }
 0xab1   :  { %v1981_v36 = vmul.f32 %v4611_v19, %v1980_v16 }
 0xab3   :  { %v5842_v41 = vadd.f32 %v1982_v37, %v1981_v36  ;;  %v5982_v36 = vld [vmem:[#allocation3] sm:$0xff]   ;;  %v5992_v37 = vld [vmem:[#allocation3 + $0x8] sm:$0xff]  }
 0xab5   :  { %v1987_v9 = vpack.c.bf16 %v5842_v41, %v5842_v41 }
 0xab7   :  { %4107 = vmatmul.mubr.bf16.vlgmr.msra.gmra.mrb[60].mxu0 %v1987_v9  ;;  %4127 = vmatmul.mubr.bf16.vlgmr.msra.gmra.mrb[60].mxu1 %v1987_v9 }
 0xab8   :  { %4131 = vmatpush3.bf16.msra.mxu0 %v5485_v61  ;;  %4146 = vmatprep.mubr.msk.bf16.mxu0 %vm4799_vm0, %v4798_v0  ;;  %v5864_v61 = vld [vmem:[%s6329_s3 + $0x8] sm:$0xff]  }
 0xab9   :  { %4132 = vmatprep.subr.bf16.mxu0 %v4798_v0  ;;  %4151 = vmatpush3.bf16.msra.mxu1 %v5853_v44 }
 0xaba   :  { %4152 = vmatprep.subr.bf16.mxu1 %v4798_v0  ;;  %4166 = vmatprep.mubr.msk.bf16.mxu1 %vm4799_vm0, %v4798_v0 }
 0xabc   :  { %4133 = vmatpush3.bf16.msra.mxu0 %v5495_v62  ;;  %v5882_v62 = vld [vmem:[%s6329_s3 + $0x18] sm:$0xff]  }
 0xabd   :  { %4134 = vmatprep.subr.bf16.mxu0 %v4798_v0  ;;  %4153 = vmatpush3.bf16.msra.mxu1 %v5864_v61 }
 0xabe   :  { %4154 = vmatprep.subr.bf16.mxu1 %v4798_v0 }
 0xac0   :  { %4135 = vmatpush3.bf16.msra.mxu0 %v5501_v63  ;;  %v5891_v63 = vld [vmem:[%s6329_s3 + $0x20] sm:$0xff]  }
 0xac1   :  { %4136 = vmatprep.subr.bf16.mxu0 %v4798_v0  ;;  %4155 = vmatpush3.bf16.msra.mxu1 %v5873_v46 }
 0xac2   :  { %4156 = vmatprep.subr.bf16.mxu1 %v4798_v0 }
 0xac4   :  { %4137 = vmatpush3.bf16.msra.mxu0 %v5507_v59  ;;  %v5900_v59 = vld [vmem:[%s6329_s3 + $0x28] sm:$0xff]  }
 0xac5   :  { %4138 = vmatprep.subr.bf16.mxu0 %v4798_v0  ;;  %4157 = vmatpush3.bf16.msra.mxu1 %v5882_v62 }
 0xac6   :  { %4158 = vmatprep.subr.bf16.mxu1 %v4798_v0 }
 0xac8   :  { %4139 = vmatpush3.bf16.msra.mxu0 %v5513_v31  ;;  %v5915_v31 = vld [vmem:[%s6330_s4] sm:$0xff]  }
 0xac9   :  { %4140 = vmatprep.subr.bf16.mxu0 %v4798_v0  ;;  %4159 = vmatpush3.bf16.msra.mxu1 %v5891_v63 }
 0xaca   :  { %4160 = vmatprep.subr.bf16.mxu1 %v4798_v0 }
 0xacc   :  { %4141 = vmatpush3.bf16.msra.mxu0 %v5519_v40  ;;  %v5924_v40 = vld [vmem:[%s6330_s4 + $0x8] sm:$0xff]  }
 0xacd   :  { %4142 = vmatprep.subr.bf16.mxu0 %v4798_v0  ;;  %4161 = vmatpush3.bf16.msra.mxu1 %v5900_v59 }
 0xace   :  { %4162 = vmatprep.subr.bf16.mxu1 %v4798_v0 }
 0xad0   :  { %4143 = vmatpush3.bf16.msra.mxu0 %v5525_v34  ;;  %v5931_v34 = vld [vmem:[%s6330_s4 + $0x10] sm:$0xff]  }
 0xad1   :  { %4144 = vmatprep.subr.bf16.mxu0 %v4798_v0  ;;  %4163 = vmatpush3.bf16.msra.mxu1 %v5532_v35  ;;  %v5938_v35 = vld [vmem:[%s6330_s4 + $0x18] sm:$0xff]  }
 0xad2   :  { %4164 = vmatprep.subr.bf16.mxu1 %v4798_v0 }
 0xad4   :  { %4145 = vmatpush3.bf16.msra.mxu0 %v5536_v2  ;;  %v5945_v2 = vld [vmem:[%s6330_s4 + $0x20] sm:$0xff]  }
 0xad5   :  { %4170 = vmatprep.subr.bf16.mxu0 %v4798_v0  ;;  %4165 = vmatpush3.bf16.msra.mxu1 %v5543_v3  ;;  %v5952_v3 = vld [vmem:[%s6330_s4 + $0x28] sm:$0xff]  }
 0xad6   :  { %4190 = vmatprep.subr.bf16.mxu1 %v4798_v0 }
 0xad7   :  { %4147 = vmatmul.mubr.bf16.vlgmr.msra.gmra.mrb[64].mxu0 %v1987_v9  ;;  %v6004_v9 = vld [vmem:[#allocation3 + $0x18] sm:$0xff]  }
 0xad8   :  { %4171 = vmatpush3.bf16.msra.mxu0 %v5915_v31  ;;  %4186 = vmatprep.mubr.msk.bf16.mxu0 %vm4799_vm0, %v4798_v0 }
 0xad9   :  { %4172 = vmatprep.subr.bf16.mxu0 %v4798_v0 }
 0xadc   :  { %4173 = vmatpush3.bf16.msra.mxu0 %v5924_v40 }
 0xadd   :  { %4174 = vmatprep.subr.bf16.mxu0 %v4798_v0 }
 0xae0   :  { %4175 = vmatpush3.bf16.msra.mxu0 %v5931_v34 }
 0xae1   :  { %4176 = vmatprep.subr.bf16.mxu0 %v4798_v0 }
 0xae4   :  { %4177 = vmatpush3.bf16.msra.mxu0 %v5938_v35 }
 0xae5   :  { %4178 = vmatprep.subr.bf16.mxu0 %v4798_v0 }
 0xae8   :  { %4179 = vmatpush3.bf16.msra.mxu0 %v5945_v2 }
 0xae9   :  { %4180 = vmatprep.subr.bf16.mxu0 %v4798_v0 }
 0xaec   :  { %4181 = vmatpush3.bf16.msra.mxu0 %v5952_v3 }
 0xaed   :  { %4182 = vmatprep.subr.bf16.mxu0 %v4798_v0 }
 0xaf0   :  { %4183 = vmatpush3.bf16.msra.mxu0 %v5959_v39 }
 0xaf1   :  { %4184 = vmatprep.subr.bf16.mxu0 %v4798_v0 }
 0xaf4   :  { %4185 = vmatpush3.bf16.msra.mxu0 %v5966_v47 }
 0xaf5   :  { %4210 = vmatprep.subr.bf16.mxu0 %v4798_v0 }
 0xb8a   :  { %v2022_v50 = vpop.f32.mrb[60].mxu0  ;;  %v2062_v23 = vpop.f32.mrb[60].mxu1 }
 0xb8b   :  { %v2068_v20 = vadd.f32 %v2022_v50, %v270_v49  ;;  %v4108_v25 = vpop.f32.mrb[61].mxu0  ;;  %v4128_v22 = vpop.f32.mrb[61].mxu1  ;;  %v2118_v33 = vadd.f32 %v2062_v23, %v271_v32  ;;  %v6022_v49 = vld [vmem:[#allocation3 + $0x30] sm:$0xff]   ;;  %v6029_v50 = vld [vmem:[%s6329_s3 + $0x30] sm:$0xff]   ;;  %v6033_v23 = vld [vmem:[#allocation3 + $0x38] sm:$0xff]  }
 0xb8c   :  { %v2025_v24 = vpop.f32.mrb[62].mxu0  ;;  %v2065_v26 = vpop.f32.mrb[62].mxu1 }
 0xb8d   :  { %v3028_v28 = vmul.f32 -1.442695, %v2068_v20  ;;  %v4109_v14 = vpop.f32.mrb[63].mxu0  ;;  %v4129_v17 = vpop.f32.mrb[63].mxu1  ;;  %v3029_v27 = vmul.f32 -1.442695, %v2118_v33 }
 0xb8e   :  { %v6040_v20 = vld [vmem:[%s6329_s3 + $0x38] sm:$0xff]   ;;  %v137_v25 = vpop.permute.xlu1 %136 }
 0xb8f   :  { %4612 = vpow2.f32 %v3028_v28  ;;  %v208_v22 = vmul.f32 %v5096_v38, %v137_v25 }
 0xb90   :  { %4614 = vpow2.f32 %v3029_v27 }
 0xb91   :  { %v273_v24 = vadd.f32 %v5102_v42, %v208_v22 }
 0xb99   :  { %v4613_v43 = vpop.eup %4612 }
 0xb9a   :  { %v2072_v29 = vadd.f32 1.0, %v4613_v43  ;;  %v4615_v52 = vpop.eup %4614 }
 0xb9b   :  { %v2122_v54 = vadd.f32 1.0, %v4615_v52  ;;  %v209_v52 = vmul.f32 %v5105_v45, %v137_v25 }
 0xb9c   :  { %4616 = vrcp.f32 %v2072_v29 }
 0xb9d   :  { %4618 = vrcp.f32 %v2122_v54  ;;  %v274_v53 = vadd.f32 %v5108_v51, %v209_v52 }
 0xba6   :  { %v4617_v5 = vpop.eup %4616 }
 0xba7   :  { %v4619_v58 = vpop.eup %4618 }
 0xba8   :  { %v2125_v10 = vsub.f32 1.0, %v4619_v58  ;;  %v2127_v13 = vmul.f32 %v4619_v58, %v5842_v41  ;;  %v5998_v41 = vld [vmem:[#allocation3 + $0x10] sm:$0xff]  }
 0xbaa   :  { %v2109_v55 = vpop.f32.mrb[64].mxu0 }
 0xbab   :  { %v2110_v57 = vadd.f32 %v5639_v56, %v2109_v55  ;;  %v4148_v60 = vpop.f32.mrb[65].mxu0 }
 0xbac   :  { %v2112_v6 = vpop.f32.mrb[66].mxu0 }
 0xbad   :  { %v2115_v8 = vmul.f32 %v4617_v5, %v2110_v57  ;;  %v4149_v4 = vpop.f32.mrb[67].mxu0  ;;  %v210_v6 = vmul.f32 %v5111_v1, %v137_v25 }
 0xbaf   :  { %v2116_v18 = vadd.f32 %v2115_v8, %v272_v7 }
 0xbb1   :  { %4620 = vtanh.f32 %v2116_v18 }
 0xbbb   :  { %v4621_v11 = vpop.eup %4620 }
 0xbbc   :  { %v2126_v12 = vmul.f32 %v4621_v11, %v2125_v10  ;;  %v275_v11 = vadd.f32 %v5118_v21, %v210_v6 }
 0xbbe   :  { %v5978_v16 = vadd.f32 %v2127_v13, %v2126_v12 }
 0xbc0   :  { %v2132_v19 = vpack.c.bf16 %v5978_v16, %v5978_v16 }
 0xbc2   :  { %4167 = vmatmul.mubr.bf16.vlgmr.msra.gmra.mrb[64].mxu1 %v2132_v19  ;;  %4187 = vmatmul.mubr.bf16.vlgmr.msra.gmra.mrb[68].mxu0 %v2132_v19 }
 0xbc3   :  { %4191 = vmatpush3.bf16.msra.mxu1 %v5982_v36  ;;  %4206 = vmatprep.mubr.msk.bf16.mxu1 %vm4799_vm0, %v4798_v0 }
 0xbc4   :  { %4192 = vmatprep.subr.bf16.mxu1 %v4798_v0  ;;  %4211 = vmatpush3.bf16.msra.mxu0 %v5853_v44 }
 0xbc5   :  { %4212 = vmatprep.subr.bf16.mxu0 %v4798_v0  ;;  %4226 = vmatprep.mubr.msk.bf16.mxu0 %vm4799_vm0, %v4798_v0 }
 0xbc7   :  { %4193 = vmatpush3.bf16.msra.mxu1 %v5992_v37 }
 0xbc8   :  { %4194 = vmatprep.subr.bf16.mxu1 %v4798_v0  ;;  %4213 = vmatpush3.bf16.msra.mxu0 %v5864_v61 }
 0xbc9   :  { %4214 = vmatprep.subr.bf16.mxu0 %v4798_v0 }
 0xbcb   :  { %4195 = vmatpush3.bf16.msra.mxu1 %v5998_v41 }
 0xbcc   :  { %4196 = vmatprep.subr.bf16.mxu1 %v4798_v0  ;;  %4215 = vmatpush3.bf16.msra.mxu0 %v5873_v46 }
 0xbcd   :  { %4216 = vmatprep.subr.bf16.mxu0 %v4798_v0 }
 0xbcf   :  { %4197 = vmatpush3.bf16.msra.mxu1 %v6004_v9 }
 0xbd0   :  { %4198 = vmatprep.subr.bf16.mxu1 %v4798_v0  ;;  %4217 = vmatpush3.bf16.msra.mxu0 %v5882_v62 }
 0xbd1   :  { %4218 = vmatprep.subr.bf16.mxu0 %v4798_v0 }
 0xbd3   :  { %4199 = vmatpush3.bf16.msra.mxu1 %v6010_v48 }
 0xbd4   :  { %4200 = vmatprep.subr.bf16.mxu1 %v4798_v0  ;;  %4219 = vmatpush3.bf16.msra.mxu0 %v5891_v63 }
 0xbd5   :  { %4220 = vmatprep.subr.bf16.mxu0 %v4798_v0 }
 0xbd7   :  { %4201 = vmatpush3.bf16.msra.mxu1 %v6016_v15 }
 0xbd8   :  { %4202 = vmatprep.subr.bf16.mxu1 %v4798_v0  ;;  %4221 = vmatpush3.bf16.msra.mxu0 %v5900_v59 }
 0xbd9   :  { %4222 = vmatprep.subr.bf16.mxu0 %v4798_v0 }
 0xbdb   :  { %4203 = vmatpush3.bf16.msra.mxu1 %v6022_v49 }
 0xbdc   :  { %4204 = vmatprep.subr.bf16.mxu1 %v4798_v0  ;;  %4223 = vmatpush3.bf16.msra.mxu0 %v6029_v50 }
 0xbdd   :  { %4224 = vmatprep.subr.bf16.mxu0 %v4798_v0 }
 0xbdf   :  { %4205 = vmatpush3.bf16.msra.mxu1 %v6033_v23 }
 0xbe0   :  { %4230 = vmatprep.subr.bf16.mxu1 %v4798_v0  ;;  %4225 = vmatpush3.bf16.msra.mxu0 %v6040_v20 }
 0xbe1   :  { %4250 = vmatprep.subr.bf16.mxu0 %v4798_v0 }
 0xbe2   :  { %4207 = vmatmul.mubr.bf16.vlgmr.msra.gmra.mrb[68].mxu1 %v2132_v19 }
 0xbe3   :  { %4231 = vmatpush3.bf16.msra.mxu1 %v5915_v31  ;;  %4246 = vmatprep.mubr.msk.bf16.mxu1 %vm4799_vm0, %v4798_v0 }
 0xbe4   :  { %4232 = vmatprep.subr.bf16.mxu1 %v4798_v0 }
 0xbe7   :  { %4233 = vmatpush3.bf16.msra.mxu1 %v5924_v40 }
 0xbe8   :  { %4234 = vmatprep.subr.bf16.mxu1 %v4798_v0 }
 0xbeb   :  { %4235 = vmatpush3.bf16.msra.mxu1 %v5931_v34 }
 0xbec   :  { %4236 = vmatprep.subr.bf16.mxu1 %v4798_v0 }
 0xbef   :  { %4237 = vmatpush3.bf16.msra.mxu1 %v5938_v35 }
 0xbf0   :  { %4238 = vmatprep.subr.bf16.mxu1 %v4798_v0 }
 0xbf3   :  { %4239 = vmatpush3.bf16.msra.mxu1 %v5945_v2 }
 0xbf4   :  { %4240 = vmatprep.subr.bf16.mxu1 %v4798_v0 }
 0xbf7   :  { %4241 = vmatpush3.bf16.msra.mxu1 %v5952_v3 }
 0xbf8   :  { %4242 = vmatprep.subr.bf16.mxu1 %v4798_v0 }
 0xbfb   :  { %4243 = vmatpush3.bf16.msra.mxu1 %v5959_v39 }
 0xbfc   :  { %4244 = vmatprep.subr.bf16.mxu1 %v4798_v0 }
 0xbff   :  { %4245 = vmatpush3.bf16.msra.mxu1 %v5966_v47 }
 0xc00   :  { %4270 = vmatprep.subr.bf16.mxu1 %v4798_v0 }
 0xc95   :  { %v2167_v26 = vpop.f32.mrb[64].mxu1  ;;  %v2207_v28 = vpop.f32.mrb[68].mxu0 }
 0xc96   :  { %v2213_v14 = vadd.f32 %v2167_v26, %v273_v24  ;;  %v4168_v17 = vpop.f32.mrb[65].mxu1  ;;  %v4188_v30 = vpop.f32.mrb[69].mxu0  ;;  %v2263_v54 = vadd.f32 %v2207_v28, %v274_v53 }
 0xc97   :  { %v2170_v32 = vpop.f32.mrb[66].mxu1  ;;  %v2210_v33 = vpop.f32.mrb[70].mxu0 }
 0xc98   :  { %v3030_v27 = vmul.f32 -1.442695, %v2213_v14  ;;  %v4169_v43 = vpop.f32.mrb[67].mxu1  ;;  %v4189_v29 = vpop.f32.mrb[71].mxu0  ;;  %v3031_v55 = vmul.f32 -1.442695, %v2263_v54 }
 0xc9a   :  { %4622 = vpow2.f32 %v3030_v27 }
 0xc9b   :  { %4624 = vpow2.f32 %v3031_v55 }
 0xca4   :  { %v4623_v57 = vpop.eup %4622 }
 0xca5   :  { %v2217_v60 = vadd.f32 1.0, %v4623_v57  ;;  %v4625_v5 = vpop.eup %4624 }
 0xca6   :  { %v2267_v7 = vadd.f32 1.0, %v4625_v5 }
 0xca7   :  { %4626 = vrcp.f32 %v2217_v60 }
 0xca8   :  { %4628 = vrcp.f32 %v2267_v7 }
 0xcb1   :  { %v4627_v58 = vpop.eup %4626 }
 0xcb2   :  { %v4629_v22 = vpop.eup %4628 }
 0xcb3   :  { %v2270_v24 = vsub.f32 1.0, %v4629_v22  ;;  %v2272_v25 = vmul.f32 %v4629_v22, %v5978_v16  ;;  %v142_v16 = vpop.permute.xlu0 %141 }
 0xcb4   :  { %v211_v17 = vmul.f32 %v5096_v38, %v142_v16  ;;  %v212_v60 = vmul.f32 %v5105_v45, %v142_v16 }
 0xcb5   :  { %v2254_v8 = vpop.f32.mrb[68].mxu1 }
 0xcb6   :  { %v2255_v4 = vadd.f32 %v5639_v56, %v2254_v8  ;;  %v4208_v18 = vpop.f32.mrb[69].mxu1  ;;  %v276_v30 = vadd.f32 %v5102_v42, %v211_v17  ;;  %v277_v5 = vadd.f32 %v5108_v51, %v212_v60 }
 0xcb7   :  { %v2257_v10 = vpop.f32.mrb[70].mxu1 }
 0xcb8   :  { %v2260_v12 = vmul.f32 %v4627_v58, %v2255_v4  ;;  %v4209_v13 = vpop.f32.mrb[71].mxu1  ;;  %v213_v58 = vmul.f32 %v5111_v1, %v142_v16 }
 0xcba   :  { %v2261_v19 = vadd.f32 %v2260_v12, %v275_v11  ;;  %v6136_v12 = vld [vmem:[%s6332_s6] ss:$0 sm:$0xff] }
 0xcbc   :  { %4630 = vtanh.f32 %v2261_v19 }
 0xcc6   :  { %v4631_v26 = vpop.eup %4630 }
 0xcc7   :  { %v2271_v28 = vmul.f32 %v4631_v26, %v2270_v24  ;;  %v278_v26 = vadd.f32 %v5118_v21, %v213_v58 }
 0xcc9   :  { %v6070_v14 = vadd.f32 %v2272_v25, %v2271_v28 }
 0xccb   :  { %v2277_v56 = vpack.c.bf16 %v6070_v14, %v6070_v14 }
 0xccd   :  { %4227 = vmatmul.mubr.bf16.vlgmr.msra.gmra.mrb[72].mxu0 %v2277_v56  ;;  %4247 = vmatmul.mubr.bf16.vlgmr.msra.gmra.mrb[72].mxu1 %v2277_v56 }
 0xcce   :  { %4251 = vmatpush3.bf16.msra.mxu0 %v5982_v36  ;;  %4266 = vmatprep.mubr.msk.bf16.mxu0 %vm4799_vm0, %v4798_v0 }
 0xccf   :  { %4252 = vmatprep.subr.bf16.mxu0 %v4798_v0  ;;  %4271 = vmatpush3.bf16.msra.mxu1 %v5853_v44 }
 0xcd0   :  { %4272 = vmatprep.subr.bf16.mxu1 %v4798_v0  ;;  %4286 = vmatprep.mubr.msk.bf16.mxu1 %vm4799_vm0, %v4798_v0 }
 0xcd2   :  { %4253 = vmatpush3.bf16.msra.mxu0 %v5992_v37 }
 0xcd3   :  { %4254 = vmatprep.subr.bf16.mxu0 %v4798_v0  ;;  %4273 = vmatpush3.bf16.msra.mxu1 %v5864_v61 }
 0xcd4   :  { %4274 = vmatprep.subr.bf16.mxu1 %v4798_v0 }
 0xcd6   :  { %4255 = vmatpush3.bf16.msra.mxu0 %v5998_v41 }
 0xcd7   :  { %4256 = vmatprep.subr.bf16.mxu0 %v4798_v0  ;;  %4275 = vmatpush3.bf16.msra.mxu1 %v5873_v46 }
 0xcd8   :  { %4276 = vmatprep.subr.bf16.mxu1 %v4798_v0 }
 0xcda   :  { %4257 = vmatpush3.bf16.msra.mxu0 %v6004_v9 }
 0xcdb   :  { %4258 = vmatprep.subr.bf16.mxu0 %v4798_v0  ;;  %4277 = vmatpush3.bf16.msra.mxu1 %v5882_v62 }
 0xcdc   :  { %4278 = vmatprep.subr.bf16.mxu1 %v4798_v0 }
 0xcde   :  { %4259 = vmatpush3.bf16.msra.mxu0 %v6010_v48 }
 0xcdf   :  { %4260 = vmatprep.subr.bf16.mxu0 %v4798_v0  ;;  %4279 = vmatpush3.bf16.msra.mxu1 %v5891_v63 }
 0xce0   :  { %4280 = vmatprep.subr.bf16.mxu1 %v4798_v0 }
 0xce2   :  { %4261 = vmatpush3.bf16.msra.mxu0 %v6016_v15 }
 0xce3   :  { %4262 = vmatprep.subr.bf16.mxu0 %v4798_v0  ;;  %4281 = vmatpush3.bf16.msra.mxu1 %v5900_v59 }
 0xce4   :  { %4282 = vmatprep.subr.bf16.mxu1 %v4798_v0 }
 0xce6   :  { %4263 = vmatpush3.bf16.msra.mxu0 %v6022_v49 }
 0xce7   :  { %4264 = vmatprep.subr.bf16.mxu0 %v4798_v0  ;;  %4283 = vmatpush3.bf16.msra.mxu1 %v6029_v50 }
 0xce8   :  { %4284 = vmatprep.subr.bf16.mxu1 %v4798_v0 }
 0xcea   :  { %4265 = vmatpush3.bf16.msra.mxu0 %v6033_v23 }
 0xceb   :  { %4290 = vmatprep.subr.bf16.mxu0 %v4798_v0  ;;  %4285 = vmatpush3.bf16.msra.mxu1 %v6040_v20 }
 0xcec   :  { %4310 = vmatprep.subr.bf16.mxu1 %v4798_v0 }
 0xced   :  { %4267 = vmatmul.mubr.bf16.vlgmr.msra.gmra.mrb[76].mxu0 %v2277_v56 }
 0xcee   :  { %4291 = vmatpush3.bf16.msra.mxu0 %v5915_v31  ;;  %4306 = vmatprep.mubr.msk.bf16.mxu0 %vm4799_vm0, %v4798_v0 }
 0xcef   :  { %4292 = vmatprep.subr.bf16.mxu0 %v4798_v0 }
 0xcf2   :  { %4293 = vmatpush3.bf16.msra.mxu0 %v5924_v40 }
 0xcf3   :  { %4294 = vmatprep.subr.bf16.mxu0 %v4798_v0 }
 0xcf6   :  { %4295 = vmatpush3.bf16.msra.mxu0 %v5931_v34 }
 0xcf7   :  { %4296 = vmatprep.subr.bf16.mxu0 %v4798_v0 }
 0xcfa   :  { %4297 = vmatpush3.bf16.msra.mxu0 %v5938_v35 }
 0xcfb   :  { %4298 = vmatprep.subr.bf16.mxu0 %v4798_v0 }
 0xcfe   :  { %4299 = vmatpush3.bf16.msra.mxu0 %v5945_v2 }
 0xcff   :  { %4300 = vmatprep.subr.bf16.mxu0 %v4798_v0 }
 0xd02   :  { %4301 = vmatpush3.bf16.msra.mxu0 %v5952_v3 }
 0xd03   :  { %4302 = vmatprep.subr.bf16.mxu0 %v4798_v0 }
 0xd06   :  { %4303 = vmatpush3.bf16.msra.mxu0 %v5959_v39 }
 0xd07   :  { %4304 = vmatprep.subr.bf16.mxu0 %v4798_v0 }
 0xd0a   :  { %4305 = vmatpush3.bf16.msra.mxu0 %v5966_v47 }
 0xd0b   :  { %4330 = vmatprep.subr.bf16.mxu0 %v4798_v0 }
 0xda0   :  { %v2312_v32 = vpop.f32.mrb[72].mxu0  ;;  %v2352_v33 = vpop.f32.mrb[72].mxu1 }
 0xda1   :  { %v2358_v27 = vadd.f32 %v2312_v32, %v276_v30  ;;  %v4228_v43 = vpop.f32.mrb[73].mxu0  ;;  %v4248_v29 = vpop.f32.mrb[73].mxu1  ;;  %v2408_v6 = vadd.f32 %v2352_v33, %v277_v5 }
 0xda2   :  { %v2315_v52 = vpop.f32.mrb[74].mxu0  ;;  %v2355_v53 = vpop.f32.mrb[74].mxu1 }
 0xda3   :  { %v3032_v54 = vmul.f32 -1.442695, %v2358_v27  ;;  %v4229_v55 = vpop.f32.mrb[75].mxu0  ;;  %v4249_v57 = vpop.f32.mrb[75].mxu1  ;;  %v3033_v7 = vmul.f32 -1.442695, %v2408_v6 }
 0xda5   :  { %4632 = vpow2.f32 %v3032_v54 }
 0xda6   :  { %4634 = vpow2.f32 %v3033_v7 }
 0xdaf   :  { %v4633_v8 = vpop.eup %4632 }
 0xdb0   :  { %v2362_v4 = vadd.f32 1.0, %v4633_v8  ;;  %v4635_v18 = vpop.eup %4634 }
 0xdb1   :  { %v2412_v10 = vadd.f32 1.0, %v4635_v18 }
 0xdb2   :  { %4636 = vrcp.f32 %v2362_v4 }
 0xdb3   :  { %4638 = vrcp.f32 %v2412_v10 }
 0xdbc   :  { %v4637_v22 = vpop.eup %4636 }
 0xdbd   :  { %v4639_v16 = vpop.eup %4638 }
 0xdbe   :  { %v2415_v17 = vsub.f32 1.0, %v4639_v16  ;;  %v2417_v33 = vmul.f32 %v4639_v16, %v6070_v14  ;;  %v147_v14 = vpop.permute.xlu1 %146 }
 0xdbf   :  { %v214_v29 = vmul.f32 %v5096_v38, %v147_v14  ;;  %v215_v18 = vmul.f32 %v5105_v45, %v147_v14 }
 0xdc0   :  { %v2399_v11 = vpop.f32.mrb[76].mxu0 }
 0xdc1   :  { %v2400_v13 = vadd.f32 %v6136_v12, %v2399_v11  ;;  %v4268_v19 = vpop.f32.mrb[77].mxu0  ;;  %v279_v52 = vadd.f32 %v5102_v42, %v214_v29  ;;  %v280_v58 = vadd.f32 %v5108_v51, %v215_v18 }
 0xdc2   :  { %v2402_v24 = vpop.f32.mrb[78].mxu0 }
 0xdc3   :  { %v2405_v28 = vmul.f32 %v4637_v22, %v2400_v13  ;;  %v4269_v25 = vpop.f32.mrb[79].mxu0  ;;  %v216_v24 = vmul.f32 %v5111_v1, %v147_v14 }
 0xdc5   :  { %v2406_v56 = vadd.f32 %v2405_v28, %v278_v26 }
 0xdc7   :  { %4640 = vtanh.f32 %v2406_v56 }
 0xdd1   :  { %v4641_v30 = vpop.eup %4640 }
 0xdd2   :  { %v2416_v32 = vmul.f32 %v4641_v30, %v2415_v17  ;;  %v281_v30 = vadd.f32 %v5118_v21, %v216_v24 }
 0xdd4   :  { %v6141_v27 = vadd.f32 %v2417_v33, %v2416_v32 }
 0xdd6   :  { %v2422_v43 = vpack.c.bf16 %v6141_v27, %v6141_v27 }
 0xdd8   :  { %4287 = vmatmul.mubr.bf16.vlgmr.msra.gmra.mrb[76].mxu1 %v2422_v43  ;;  %4307 = vmatmul.mubr.bf16.vlgmr.msra.gmra.mrb[80].mxu0 %v2422_v43 }
 0xdd9   :  { %4311 = vmatpush3.bf16.msra.mxu1 %v5982_v36  ;;  %4326 = vmatprep.mubr.msk.bf16.mxu1 %vm4799_vm0, %v4798_v0 }
 0xdda   :  { %4312 = vmatprep.subr.bf16.mxu1 %v4798_v0  ;;  %4331 = vmatpush3.bf16.msra.mxu0 %v5853_v44 }
 0xddb   :  { %4332 = vmatprep.subr.bf16.mxu0 %v4798_v0  ;;  %4346 = vmatprep.mubr.msk.bf16.mxu0 %vm4799_vm0, %v4798_v0 }
 0xddd   :  { %4313 = vmatpush3.bf16.msra.mxu1 %v5992_v37 }
 0xdde   :  { %4314 = vmatprep.subr.bf16.mxu1 %v4798_v0  ;;  %4333 = vmatpush3.bf16.msra.mxu0 %v5864_v61 }
 0xddf   :  { %4334 = vmatprep.subr.bf16.mxu0 %v4798_v0 }
 0xde1   :  { %4315 = vmatpush3.bf16.msra.mxu1 %v5998_v41 }
 0xde2   :  { %4316 = vmatprep.subr.bf16.mxu1 %v4798_v0  ;;  %4335 = vmatpush3.bf16.msra.mxu0 %v5873_v46 }
 0xde3   :  { %4336 = vmatprep.subr.bf16.mxu0 %v4798_v0 }
 0xde5   :  { %4317 = vmatpush3.bf16.msra.mxu1 %v6004_v9 }
 0xde6   :  { %4318 = vmatprep.subr.bf16.mxu1 %v4798_v0  ;;  %4337 = vmatpush3.bf16.msra.mxu0 %v5882_v62 }
 0xde7   :  { %4338 = vmatprep.subr.bf16.mxu0 %v4798_v0 }
 0xde9   :  { %4319 = vmatpush3.bf16.msra.mxu1 %v6010_v48 }
 0xdea   :  { %4320 = vmatprep.subr.bf16.mxu1 %v4798_v0  ;;  %4339 = vmatpush3.bf16.msra.mxu0 %v5891_v63 }
 0xdeb   :  { %4340 = vmatprep.subr.bf16.mxu0 %v4798_v0 }
 0xded   :  { %4321 = vmatpush3.bf16.msra.mxu1 %v6016_v15 }
 0xdee   :  { %4322 = vmatprep.subr.bf16.mxu1 %v4798_v0  ;;  %4341 = vmatpush3.bf16.msra.mxu0 %v5900_v59 }
 0xdef   :  { %4342 = vmatprep.subr.bf16.mxu0 %v4798_v0 }
 0xdf1   :  { %4323 = vmatpush3.bf16.msra.mxu1 %v6022_v49 }
 0xdf2   :  { %4324 = vmatprep.subr.bf16.mxu1 %v4798_v0  ;;  %4343 = vmatpush3.bf16.msra.mxu0 %v6029_v50 }
 0xdf3   :  { %4344 = vmatprep.subr.bf16.mxu0 %v4798_v0 }
 0xdf5   :  { %4325 = vmatpush3.bf16.msra.mxu1 %v6033_v23 }
 0xdf6   :  { %4350 = vmatprep.subr.bf16.mxu1 %v4798_v0  ;;  %4345 = vmatpush3.bf16.msra.mxu0 %v6040_v20 }
 0xdf7   :  { %4370 = vmatprep.subr.bf16.mxu0 %v4798_v0 }
 0xdf8   :  { %4327 = vmatmul.mubr.bf16.vlgmr.msra.gmra.mrb[80].mxu1 %v2422_v43 }
 0xdf9   :  { %4351 = vmatpush3.bf16.msra.mxu1 %v5915_v31  ;;  %4366 = vmatprep.mubr.msk.bf16.mxu1 %vm4799_vm0, %v4798_v0 }
 0xdfa   :  { %4352 = vmatprep.subr.bf16.mxu1 %v4798_v0 }
 0xdfd   :  { %4353 = vmatpush3.bf16.msra.mxu1 %v5924_v40 }
 0xdfe   :  { %4354 = vmatprep.subr.bf16.mxu1 %v4798_v0 }
 0xe01   :  { %4355 = vmatpush3.bf16.msra.mxu1 %v5931_v34 }
 0xe02   :  { %4356 = vmatprep.subr.bf16.mxu1 %v4798_v0 }
 0xe05   :  { %4357 = vmatpush3.bf16.msra.mxu1 %v5938_v35 }
 0xe06   :  { %4358 = vmatprep.subr.bf16.mxu1 %v4798_v0 }
 0xe09   :  { %4359 = vmatpush3.bf16.msra.mxu1 %v5945_v2 }
 0xe0a   :  { %4360 = vmatprep.subr.bf16.mxu1 %v4798_v0 }
 0xe0d   :  { %4361 = vmatpush3.bf16.msra.mxu1 %v5952_v3 }
 0xe0e   :  { %4362 = vmatprep.subr.bf16.mxu1 %v4798_v0 }
 0xe11   :  { %4363 = vmatpush3.bf16.msra.mxu1 %v5959_v39 }
 0xe12   :  { %4364 = vmatprep.subr.bf16.mxu1 %v4798_v0 }
 0xe15   :  { %4365 = vmatpush3.bf16.msra.mxu1 %v5966_v47 }
 0xe16   :  { %4390 = vmatprep.subr.bf16.mxu1 %v4798_v0 }
 0xeab   :  { %v2457_v53 = vpop.f32.mrb[76].mxu1  ;;  %v2497_v54 = vpop.f32.mrb[80].mxu0 }
 0xeac   :  { %v2503_v55 = vadd.f32 %v2457_v53, %v279_v52  ;;  %v4288_v57 = vpop.f32.mrb[77].mxu1  ;;  %v4308_v60 = vpop.f32.mrb[81].mxu0  ;;  %v2553_v10 = vadd.f32 %v2497_v54, %v280_v58 }
 0xead   :  { %v2460_v5 = vpop.f32.mrb[78].mxu1  ;;  %v2500_v6 = vpop.f32.mrb[82].mxu0 }
 0xeae   :  { %v3034_v7 = vmul.f32 -1.442695, %v2503_v55  ;;  %v4289_v8 = vpop.f32.mrb[79].mxu1  ;;  %v4309_v4 = vpop.f32.mrb[83].mxu0  ;;  %v3035_v11 = vmul.f32 -1.442695, %v2553_v10 }
 0xeb0   :  { %4642 = vpow2.f32 %v3034_v7 }
 0xeb1   :  { %4644 = vpow2.f32 %v3035_v11 }
 0xeba   :  { %v4643_v13 = vpop.eup %4642 }
 0xebb   :  { %v2507_v19 = vadd.f32 1.0, %v4643_v13  ;;  %v4645_v22 = vpop.eup %4644 }
 0xebc   :  { %v2557_v26 = vadd.f32 1.0, %v4645_v22 }
 0xebd   :  { %4646 = vrcp.f32 %v2507_v19 }
 0xebe   :  { %4648 = vrcp.f32 %v2557_v26 }
 0xec7   :  { %v4647_v16 = vpop.eup %4646 }
 0xec8   :  { %v4649_v29 = vpop.eup %4648 }
 0xec9   :  { %v2560_v52 = vsub.f32 1.0, %v4649_v29  ;;  %v2562_v14 = vmul.f32 %v4649_v29, %v6141_v27 }
 0xecb   :  { %v2544_v28 = vpop.f32.mrb[80].mxu1 }
 0xecc   :  { %v2545_v25 = vadd.f32 %v6136_v12, %v2544_v28  ;;  %v4328_v56 = vpop.f32.mrb[81].mxu1 }
 0xecd   :  { %v2547_v17 = vpop.f32.mrb[82].mxu1 }
 0xece   :  { %v2550_v32 = vmul.f32 %v4647_v16, %v2545_v25  ;;  %v4329_v33 = vpop.f32.mrb[83].mxu1 }
 0xed0   :  { %v2551_v43 = vadd.f32 %v2550_v32, %v281_v30  ;;  %v157_v32 = vpop.permute.xlu1 %156 }
 0xed1   :  { %v220_v33 = vmul.f32 %v5096_v38, %v157_v32 }
 0xed2   :  { %4650 = vtanh.f32 %v2551_v43 }
 0xed3   :  { %v285_v43 = vadd.f32 %v5102_v42, %v220_v33 }
 0xedc   :  { %v4651_v53 = vpop.eup %4650 }
 0xedd   :  { %v2561_v54 = vmul.f32 %v4651_v53, %v2560_v52 }
 0xedf   :  { %v6207_v55 = vadd.f32 %v2562_v14, %v2561_v54 }
 0xee1   :  { %v2567_v57 = vpack.c.bf16 %v6207_v55, %v6207_v55 }
 0xee3   :  { %4347 = vmatmul.mubr.bf16.vlgmr.msra.gmra.mrb[84].mxu0 %v2567_v57  ;;  %4367 = vmatmul.mubr.bf16.vlgmr.msra.gmra.mrb[84].mxu1 %v2567_v57 }
 0xee4   :  { %4371 = vmatpush3.bf16.msra.mxu0 %v5982_v36  ;;  %4386 = vmatprep.mubr.msk.bf16.mxu0 %vm4799_vm0, %v4798_v0 }
 0xee5   :  { %4372 = vmatprep.subr.bf16.mxu0 %v4798_v0  ;;  %4391 = vmatpush3.bf16.msra.mxu1 %v5853_v44  ;;  %v152_v44 = vpop.permute.xlu0 %151 }
 0xee6   :  { %4392 = vmatprep.subr.bf16.mxu1 %v4798_v0  ;;  %4406 = vmatprep.mubr.msk.bf16.mxu1 %vm4799_vm0, %v4798_v0  ;;  %v219_v7 = vmul.f32 %v5111_v1, %v152_v44 }
 0xee8   :  { %4373 = vmatpush3.bf16.msra.mxu0 %v5992_v37  ;;  %v284_v13 = vadd.f32 %v5118_v21, %v219_v7 }
 0xee9   :  { %4374 = vmatprep.subr.bf16.mxu0 %v4798_v0  ;;  %4393 = vmatpush3.bf16.msra.mxu1 %v5864_v61  ;;  %v217_v61 = vmul.f32 %v5096_v38, %v152_v44 }
 0xeea   :  { %4394 = vmatprep.subr.bf16.mxu1 %v4798_v0 }
 0xeec   :  { %4375 = vmatpush3.bf16.msra.mxu0 %v5998_v41 }
 0xeed   :  { %4376 = vmatprep.subr.bf16.mxu0 %v4798_v0  ;;  %4395 = vmatpush3.bf16.msra.mxu1 %v5873_v46  ;;  %v282_v46 = vadd.f32 %v5102_v42, %v217_v61 }
 0xeee   :  { %4396 = vmatprep.subr.bf16.mxu1 %v4798_v0 }
 0xef0   :  { %4377 = vmatpush3.bf16.msra.mxu0 %v6004_v9 }
 0xef1   :  { %4378 = vmatprep.subr.bf16.mxu0 %v4798_v0  ;;  %4397 = vmatpush3.bf16.msra.mxu1 %v5882_v62 }
 0xef2   :  { %4398 = vmatprep.subr.bf16.mxu1 %v4798_v0 }
 0xef4   :  { %4379 = vmatpush3.bf16.msra.mxu0 %v6010_v48 }
 0xef5   :  { %4380 = vmatprep.subr.bf16.mxu0 %v4798_v0  ;;  %4399 = vmatpush3.bf16.msra.mxu1 %v5891_v63 }
 0xef6   :  { %4400 = vmatprep.subr.bf16.mxu1 %v4798_v0 }
 0xef8   :  { %4381 = vmatpush3.bf16.msra.mxu0 %v6016_v15 }
 0xef9   :  { %4382 = vmatprep.subr.bf16.mxu0 %v4798_v0  ;;  %4401 = vmatpush3.bf16.msra.mxu1 %v5900_v59 }
 0xefa   :  { %4402 = vmatprep.subr.bf16.mxu1 %v4798_v0 }
 0xefc   :  { %4383 = vmatpush3.bf16.msra.mxu0 %v6022_v49 }
 0xefd   :  { %4384 = vmatprep.subr.bf16.mxu0 %v4798_v0  ;;  %4403 = vmatpush3.bf16.msra.mxu1 %v6029_v50  ;;  %v218_v50 = vmul.f32 %v5105_v45, %v152_v44 }
 0xefe   :  { %4404 = vmatprep.subr.bf16.mxu1 %v4798_v0 }
 0xf00   :  { %4385 = vmatpush3.bf16.msra.mxu0 %v6033_v23 }
 0xf01   :  { %4410 = vmatprep.subr.bf16.mxu0 %v4798_v0  ;;  %4405 = vmatpush3.bf16.msra.mxu1 %v6040_v20 }
 0xf02   :  { %4430 = vmatprep.subr.bf16.mxu1 %v4798_v0 }
 0xf03   :  { %4387 = vmatmul.mubr.bf16.vlgmr.msra.gmra.mrb[88].mxu0 %v2567_v57 }
 0xf04   :  { %4411 = vmatpush3.bf16.msra.mxu0 %v5915_v31  ;;  %4426 = vmatprep.mubr.msk.bf16.mxu0 %vm4799_vm0, %v4798_v0 }
 0xf05   :  { %4412 = vmatprep.subr.bf16.mxu0 %v4798_v0 }
 0xf08   :  { %4413 = vmatpush3.bf16.msra.mxu0 %v5924_v40 }
 0xf09   :  { %4414 = vmatprep.subr.bf16.mxu0 %v4798_v0 }
 0xf0c   :  { %4415 = vmatpush3.bf16.msra.mxu0 %v5931_v34 }
 0xf0d   :  { %4416 = vmatprep.subr.bf16.mxu0 %v4798_v0 }
 0xf10   :  { %4417 = vmatpush3.bf16.msra.mxu0 %v5938_v35 }
 0xf11   :  { %4418 = vmatprep.subr.bf16.mxu0 %v4798_v0 }
 0xf14   :  { %4419 = vmatpush3.bf16.msra.mxu0 %v5945_v2 }
 0xf15   :  { %4420 = vmatprep.subr.bf16.mxu0 %v4798_v0 }
 0xf18   :  { %4421 = vmatpush3.bf16.msra.mxu0 %v5952_v3 }
 0xf19   :  { %4422 = vmatprep.subr.bf16.mxu0 %v4798_v0 }
 0xf1c   :  { %4423 = vmatpush3.bf16.msra.mxu0 %v5959_v39 }
 0xf1d   :  { %4424 = vmatprep.subr.bf16.mxu0 %v4798_v0 }
 0xf20   :  { %4425 = vmatpush3.bf16.msra.mxu0 %v5966_v47  ;;  %v283_v47 = vadd.f32 %v5108_v51, %v218_v50 }
 0xf21   :  { %4450 = vmatprep.subr.bf16.mxu0 %v4798_v0 }
 0xfb6   :  { %v2602_v62 = vpop.f32.mrb[84].mxu0  ;;  %v2642_v63 = vpop.f32.mrb[84].mxu1 }
 0xfb7   :  { %v2648_v59 = vadd.f32 %v2602_v62, %v282_v46  ;;  %v4348_v31 = vpop.f32.mrb[85].mxu0  ;;  %v4368_v40 = vpop.f32.mrb[85].mxu1  ;;  %v2698_v20 = vadd.f32 %v2642_v63, %v283_v47  ;;  %v221_v62 = vmul.f32 %v5105_v45, %v157_v32 }
 0xfb8   :  { %v2605_v34 = vpop.f32.mrb[86].mxu0  ;;  %v2645_v35 = vpop.f32.mrb[86].mxu1  ;;  %v222_v40 = vmul.f32 %v5111_v1, %v157_v32 }
 0xfb9   :  { %v3036_v2 = vmul.f32 -1.442695, %v2648_v59  ;;  %v4349_v3 = vpop.f32.mrb[87].mxu0  ;;  %v4369_v39 = vpop.f32.mrb[87].mxu1  ;;  %v3037_v27 = vmul.f32 -1.442695, %v2698_v20 }
 0xfba   :  { %v287_v45 = vadd.f32 %v5118_v21, %v222_v40 }
 0xfbb   :  { %4652 = vpow2.f32 %v3036_v2 }
 0xfbc   :  { %4654 = vpow2.f32 %v3037_v27 }
 0xfc5   :  { %v4653_v60 = vpop.eup %4652 }
 0xfc6   :  { %v2652_v5 = vadd.f32 1.0, %v4653_v60  ;;  %v4655_v6 = vpop.eup %4654 }
 0xfc7   :  { %v2702_v8 = vadd.f32 1.0, %v4655_v6 }
 0xfc8   :  { %4656 = vrcp.f32 %v2652_v5 }
 0xfc9   :  { %4658 = vrcp.f32 %v2702_v8 }
 0xfd2   :  { %v4657_v10 = vpop.eup %4656 }
 0xfd3   :  { %v4659_v26 = vpop.eup %4658 }
 0xfd4   :  { %v2705_v28 = vsub.f32 1.0, %v4659_v26  ;;  %v2707_v16 = vmul.f32 %v4659_v26, %v6207_v55 }
 0xfd6   :  { %v2689_v4 = vpop.f32.mrb[88].mxu0 }
 0xfd7   :  { %v2690_v18 = vadd.f32 %v6136_v12, %v2689_v4  ;;  %v4388_v58 = vpop.f32.mrb[89].mxu0 }
 0xfd8   :  { %v2692_v11 = vpop.f32.mrb[90].mxu0 }
 0xfd9   :  { %v2695_v19 = vmul.f32 %v4657_v10, %v2690_v18  ;;  %v4389_v22 = vpop.f32.mrb[91].mxu0 }
 0xfdb   :  { %v2696_v24 = vadd.f32 %v2695_v19, %v284_v13 }
 0xfdd   :  { %4660 = vtanh.f32 %v2696_v24 }
 0xfe7   :  { %v4661_v25 = vpop.eup %4660 }
 0xfe8   :  { %v2706_v56 = vmul.f32 %v4661_v25, %v2705_v28 }
 0xfea   :  { %v6273_v17 = vadd.f32 %v2707_v16, %v2706_v56 }
 0xfec   :  { %v2712_v30 = vpack.c.bf16 %v6273_v17, %v6273_v17 }
 0xfee   :  { %4407 = vmatmul.mubr.bf16.vlgmr.msra.gmra.mrb[88].mxu1 %v2712_v30  ;;  %4427 = vmatmul.mubr.bf16.vlgmr.msra.gmra.mrb[92].mxu0 %v2712_v30 }
 0xfef   :  { %4431 = vmatpush3.bf16.msra.mxu1 %v5982_v36  ;;  %4446 = vmatprep.mubr.msk.bf16.mxu1 %vm4799_vm0, %v4798_v0  ;;  %v4504_v36 = vld [vmem:[#allocation6] sm:$0xff]  }
 0xff0   :  { %4432 = vmatprep.subr.bf16.mxu1 %v4798_v0  ;;  %4466 = vmatprep.mubr.msk.bf16.mxu0 %vm4799_vm0, %v4798_v0 }
 0xff1   :  { %4451 = vmatpush3.bf16.msra.mxu0 %v4504_v36 }
 0xff2   :  { %4452 = vmatprep.subr.bf16.mxu0 %v4798_v0 }
 0xff3   :  { %4433 = vmatpush3.bf16.msra.mxu1 %v5992_v37  ;;  %v4505_v37 = vld [vmem:[#allocation6 + $0x8] sm:$0xff]  }
 0xff4   :  { %4434 = vmatprep.subr.bf16.mxu1 %v4798_v0 }
 0xff5   :  { %4453 = vmatpush3.bf16.msra.mxu0 %v4505_v37 }
 0xff6   :  { %4454 = vmatprep.subr.bf16.mxu0 %v4798_v0 }
 0xff7   :  { %4435 = vmatpush3.bf16.msra.mxu1 %v5998_v41  ;;  %v4506_v41 = vld [vmem:[#allocation6 + $0x10] sm:$0xff]  }
 0xff8   :  { %4436 = vmatprep.subr.bf16.mxu1 %v4798_v0 }
 0xff9   :  { %4455 = vmatpush3.bf16.msra.mxu0 %v4506_v41 }
 0xffa   :  { %4456 = vmatprep.subr.bf16.mxu0 %v4798_v0 }
 0xffb   :  { %4437 = vmatpush3.bf16.msra.mxu1 %v6004_v9  ;;  %v4507_v9 = vld [vmem:[#allocation6 + $0x18] sm:$0xff]  }
 0xffc   :  { %4438 = vmatprep.subr.bf16.mxu1 %v4798_v0 }
 0xffd   :  { %4457 = vmatpush3.bf16.msra.mxu0 %v4507_v9 }
 0xffe   :  { %4458 = vmatprep.subr.bf16.mxu0 %v4798_v0 }
 0xfff   :  { %4439 = vmatpush3.bf16.msra.mxu1 %v6010_v48  ;;  %v4508_v48 = vld [vmem:[#allocation6 + $0x20] sm:$0xff]  }
0x1000   :  { %4440 = vmatprep.subr.bf16.mxu1 %v4798_v0 }
0x1001   :  { %4459 = vmatpush3.bf16.msra.mxu0 %v4508_v48 }
0x1002   :  { %4460 = vmatprep.subr.bf16.mxu0 %v4798_v0 }
0x1003   :  { %4441 = vmatpush3.bf16.msra.mxu1 %v6016_v15  ;;  %v4509_v15 = vld [vmem:[#allocation6 + $0x28] sm:$0xff]  }
0x1004   :  { %4442 = vmatprep.subr.bf16.mxu1 %v4798_v0 }
0x1005   :  { %4461 = vmatpush3.bf16.msra.mxu0 %v4509_v15 }
0x1006   :  { %4462 = vmatprep.subr.bf16.mxu0 %v4798_v0 }
0x1007   :  { %4443 = vmatpush3.bf16.msra.mxu1 %v6022_v49  ;;  %v4510_v49 = vld [vmem:[#allocation6 + $0x30] sm:$0xff]  }
0x1008   :  { %4444 = vmatprep.subr.bf16.mxu1 %v4798_v0 }
0x1009   :  { %4463 = vmatpush3.bf16.msra.mxu0 %v4510_v49 }
0x100a   :  { %4464 = vmatprep.subr.bf16.mxu0 %v4798_v0  ;;  %v286_v0 = vadd.f32 %v5108_v51, %v221_v62 }
0x100b   :  { %4445 = vmatpush3.bf16.msra.mxu1 %v6033_v23  ;;  %v4511_v23 = vld [vmem:[#allocation6 + $0x38] sm:$0xff]  }
0x100d   :  { %4465 = vmatpush3.bf16.msra.mxu0 %v4511_v23 }
0x100e   :  { %4447 = vmatmul.mubr.bf16.vlgmr.msra.gmra.mrb[92].mxu1 %v2712_v30 }
0x10c1   :  { %v2747_v29 = vpop.f32.mrb[88].mxu1  ;;  %v2787_v52 = vpop.f32.mrb[92].mxu0 }
0x10c2   :  { %v2793_v53 = vadd.f32 %v2747_v29, %v285_v43  ;;  %v4408_v54 = vpop.f32.mrb[89].mxu1  ;;  %v4428_v14 = vpop.f32.mrb[93].mxu0  ;;  %v2843_v63 = vadd.f32 %v2787_v52, %v286_v0 }
0x10c3   :  { %v2750_v55 = vpop.f32.mrb[90].mxu1  ;;  %v2790_v57 = vpop.f32.mrb[94].mxu0 }
0x10c4   :  { %v3038_v44 = vmul.f32 -1.442695, %v2793_v53  ;;  %v4409_v61 = vpop.f32.mrb[91].mxu1  ;;  %v4429_v46 = vpop.f32.mrb[95].mxu0  ;;  %v3039_v59 = vmul.f32 -1.442695, %v2843_v63 }
0x10c6   :  { %4662 = vpow2.f32 %v3038_v44 }
0x10c7   :  { %4664 = vpow2.f32 %v3039_v59 }
0x10d0   :  { %v4663_v38 = vpop.eup %4662 }
0x10d1   :  { %v2797_v42 = vadd.f32 1.0, %v4663_v38  ;;  %v4665_v31 = vpop.eup %4664 }
0x10d2   :  { %v2847_v34 = vadd.f32 1.0, %v4665_v31 }
0x10d3   :  { %4666 = vrcp.f32 %v2797_v42 }
0x10d4   :  { %4668 = vrcp.f32 %v2847_v34 }
0x10dd   :  { %v4667_v39 = vpop.eup %4666 }
0x10de   :  { %v4669_v27 = vpop.eup %4668 }
0x10df   :  { %v2850_v60 = vsub.f32 1.0, %v4669_v27  ;;  %v2852_v1 = vmul.f32 %v4669_v27, %v6273_v17 }
0x10e1   :  { %v2834_v35 = vpop.f32.mrb[92].mxu1 }
0x10e2   :  { %v2835_v2 = vadd.f32 %v6136_v12, %v2834_v35  ;;  %v4448_v3 = vpop.f32.mrb[93].mxu1  ;;  %v3040_v12 = vld [vmem:[%s6334_s8] ss:$0 sm:$0xff] }
0x10e3   :  { %v2837_v50 = vpop.f32.mrb[94].mxu1 }
0x10e4   :  { %v2840_v51 = vmul.f32 %v4667_v39, %v2835_v2  ;;  %v4449_v47 = vpop.f32.mrb[95].mxu1 }
0x10e6   :  { %v2841_v20 = vadd.f32 %v2840_v51, %v287_v45 }
0x10e8   :  { %4670 = vtanh.f32 %v2841_v20 }
0x10f2   :  { %v4671_v5 = vpop.eup %4670 }
0x10f3   :  { %v2851_v6 = vmul.f32 %v4671_v5, %v2850_v60 }
0x10f5   :  { %v2853_v7 = vadd.f32 %v2852_v1, %v2851_v6 }
0x10f7   :  { %v2854_v8 = vpack.c.bf16 %v2853_v7, %v2853_v7 }
0x10f9   :  { %4467 = vmatmul.mubr.bf16.vlgmr.msra.gmra.mrb[96].mxu0 %v2854_v8 }
0x11cc   :  { %v2960_v21 = vpop.f32.mrb[96].mxu0 }
0x11cd   :  { %v2961_v4 = vadd.f32 %v3040_v12, %v2960_v21  ;;  %v4468_v18 = vpop.f32.mrb[97].mxu0 }
0x11ce   :  { %v2963_v58 = vpop.f32.mrb[98].mxu0 }
0x11cf   :  { %2966 = vst [vmem:[#allocation8] sm:$0xff] %v2961_v4  ;;  %v4469_v10 = vpop.f32.mrb[99].mxu0 }
0x11d0   :  { %4777 = shalt.err (!%p4774_p6)
}
0x11d1   :  { %s4778_s8 = scalar_lea.hbm %s6335_s9, 128 }
0x11d2   :  { %p4779_p7 = scmp.ne.s32.totalorder %s6335_s9, %s4778_s8  ;;  %p4782_p8 = scmp.lt.u32.totalorder %s4778_s8, %s6335_s9 }
0x11d4   :  { %p4784_p9 = pnand %p4782_p8, %p4779_p7 }
0x11d6   :  { %4787 = shalt.err (!%p4784_p9)
}
0x11d7   :  { %2976 = dma.vmem_to_hbm [thread:$0]  %s2974_s24, 128, %s6335_s9, [#allocation5]  }
0x11d8   :  { %4792 = dma.done.wait [#allocation5], 128  }
0x11d9   :  { %4793 = vsyncadd [#allocation5], 4294967168 }
0x11da   :  { %2980 = vsyncpa [#allocation4], 1 }
0x11db   :  { %2981 = vsyncpa [#allocation7], 1 }
0x11dc   :  { %2982 = vsyncpa [#allocation5], 1 }

</bundles_post_ra>
